<compile_context>
chip_gen: v7x
topology: tpu7x:2x2x1
jax: 0.10.0
libtpu: 0.0.40
codegen_flags: <defaults>
</compile_context>

<pallas_src>
import jax
import jax.numpy as jnp
from jax.experimental import pallas as pl
from jax.experimental.pallas import tpu as pltpu


def _silu(x):
    return x * jax.nn.sigmoid(x)


def _cdiv(a, b):
    return (a + b - 1) // b


def _round_up(x, m):
    return _cdiv(x, m) * m


def _pad_axis(x, axis, size):
    pad = size - x.shape[axis]
    if pad <= 0:
        return x
    widths = [(0, 0)] * x.ndim
    widths[axis] = (0, pad)
    return jnp.pad(x, widths)


def _tile_bytes(rows, cols, itemsize=4):
    """VMEM footprint of a 2-D f32/int32 tile (8-sublane / 128-lane padding)."""
    return _round_up(max(rows, 1), 8) * _round_up(max(cols, 1), 128) * itemsize


def _vmem_estimate(G, N, E, F, H, Hp):
    """Rough per-grid-step VMEM bytes for a given graphs-per-step G."""
    Mn, Me = G * N, G * E
    db = 2  # pipeline double-buffering
    blocked = (2 * _tile_bytes(Me, 1) + _tile_bytes(1, Me)          # row, col, row_lane
               + _tile_bytes(Mn, F) + _tile_bytes(Mn, 1)            # h, node_mask
               + _tile_bytes(Mn, F) + _tile_bytes(Me, H))           # h_out, mij
    weights = (_tile_bytes(F, 3 * Hp) + _tile_bytes(Hp, H) + _tile_bytes(H, Hp)
               + _tile_bytes(Hp, F) + 2 * _tile_bytes(1, Hp)
               + _tile_bytes(1, H) + _tile_bytes(1, F))
    temps = (2 * _tile_bytes(Me, Mn) + _tile_bytes(Mn, Me)          # one-hots
             + _tile_bytes(Mn, 3 * Hp)                              # fused projection
             + 3 * _tile_bytes(Me, Hp) + _tile_bytes(Me, H)         # gathered/m1/mij
             + 3 * _tile_bytes(Mn, Hp) + _tile_bytes(Mn, F))        # agg/n1/n2
    return db * (blocked + weights) + temps


def _choose_graphs_per_step(B, N, E, F, H, Hp, contraction_target, vmem_budget):
    # MXU fill stops improving once G*N reaches the contraction width; beyond
    # that every extra stacked graph is linear extra one-hot matmul work.
    # Clamp by the VMEM estimate so the same code fits v7x's 64 MiB VMEM.
    g = max(1, min(B, _cdiv(contraction_target, N)))
    while g > 1 and _vmem_estimate(g, N, E, F, H, Hp) > vmem_budget:
        g -= 1
    return g


def gcl_kernel(row_ref, col_ref, rowl_ref, h_ref, nmask_ref,
               wcat_ref, b1_ref, w2_ref, b2_ref, w3a_ref, b3_ref,
               w4_ref, b4_ref, h_out_ref, mij_ref):
    f32 = jnp.float32
    h = h_ref[0]                    # (Mn, F)  float32
    row_s = row_ref[0]              # (Me, 1)  int32, -1 sentinel for masked edges
    col_s = col_ref[0]              # (Me, 1)  int32, -1 sentinel for masked edges
    row_l = rowl_ref[0]             # (1, Me)  int32, -1 sentinel for masked edges
    nmask = nmask_ref[0]            # (Mn, 1)  float32
    Mn = h.shape[0]
    Me = row_s.shape[0]
    Hp = b1_ref.shape[1]

    # Fused per-node projection: [h @ w1_src | h @ w1_tgt | h @ w3_h].
    # Column blocks are zero-padded to Hp (128-multiple) in the wrapper, so
    # these lane slices are tile-aligned (free).
    hw = jnp.dot(h.astype(wcat_ref.dtype), wcat_ref[...],
                 preferred_element_type=f32)                        # (Mn, 3*Hp)
    hw_src = hw[:, :Hp]
    hw_tgt = hw[:, Hp:2 * Hp]
    hw_node = hw[:, 2 * Hp:]

    # Gather via one-hot matmuls in the natural (E, N) orientation.  Sentinel
    # index -1 on masked edges gives an all-zero row, which reproduces the
    # reference's `source/target * edge_mask` exactly for 0/1 masks.
    lane_ids = jax.lax.broadcasted_iota(jnp.int32, (Me, Mn), 1)
    oh_src = (lane_ids == row_s).astype(f32)                        # (Me, Mn)
    oh_tgt = (lane_ids == col_s).astype(f32)                        # (Me, Mn)
    gathered = (jnp.dot(oh_src, hw_src, preferred_element_type=f32)
                + jnp.dot(oh_tgt, hw_tgt, preferred_element_type=f32))  # (Me, Hp)

    # Edge MLP (the Hp-padded columns stay exactly zero through SiLU).
    m1 = _silu(gathered + b1_ref[...])                              # (Me, Hp)
    mij = _silu(jnp.dot(m1.astype(w2_ref.dtype), w2_ref[...],
                        preferred_element_type=f32) + b2_ref[...])  # (Me, H)

    # Scatter-add aggregation in the natural (N, E) orientation; sentinel
    # columns of masked edges contribute nothing == `edge_feat = mij * mask`.
    subl_ids = jax.lax.broadcasted_iota(jnp.int32, (Mn, Me), 0)
    oh_scat = (subl_ids == row_l).astype(f32)                       # (Mn, Me)
    agg = jnp.dot(oh_scat, mij, preferred_element_type=f32)         # (Mn, H)

    # Node MLP (split concat matmul: hw_node already holds h @ w3_h).
    n1 = _silu(hw_node
               + jnp.dot(agg.astype(w3a_ref.dtype), w3a_ref[...],
                         preferred_element_type=f32)
               + b3_ref[...])                                       # (Mn, Hp)
    n2 = jnp.dot(n1.astype(w4_ref.dtype), w4_ref[...],
                 preferred_element_type=f32) + b4_ref[...]          # (Mn, F)

    h_out_ref[0] = ((h + n2) * nmask).astype(h_out_ref.dtype)
    mij_ref[0] = mij.astype(mij_ref.dtype)


def gcl_forward(h, edge_index, edge_mask, node_mask, params, *,
                contraction_target=256, vmem_budget_bytes=36 * 2**20,
                mlp_dtype=jnp.float32):
    """h: (B, N, F); edge_index: (B, E, 2) int; edge_mask: (B, E, 1) in {0, 1};
    node_mask: (B, N, 1); params (matmul layout): w1 (2F,H) b1 (1,H) w2 (H,H)
    b2 (1,H) w3 (F+H,H) b3 (1,H) w4 (H,F) b4 (1,F).

    Returns (h_out (B,N,F), mij (B,E,H)) matching GCL.forward with
    attention=False, edge_attr=None, node_attr=None.  edge_mask must be exactly
    0/1: masked edges are encoded as sentinel indices, which only matches the
    reference's feature masking for binary masks.
    """
    B, N, F = h.shape
    E = edge_index.shape[1]
    H = params["w2"].shape[0]
    assert params["w4"].shape[1] == F, \
        "residual x + node_mlp(...) requires output_nf == input_nf"
    Hp = _round_up(H, 128)

    G = _choose_graphs_per_step(B, N, E, F, H, Hp,
                                contraction_target, vmem_budget_bytes)
    NB = _cdiv(B, G)
    B_pad = NB * G
    Mn, Me = G * N, G * E

    f32 = jnp.float32
    # Pad awkward batches with fully-masked dummy graphs (sentinel edges,
    # node_mask = 0) instead of falling back to G = 1.
    if B_pad > B:
        pad = B_pad - B
        h = jnp.pad(h, ((0, pad), (0, 0), (0, 0)))
        edge_index = jnp.pad(edge_index, ((0, pad), (0, 0), (0, 0)))
        edge_mask = jnp.pad(edge_mask, ((0, pad), (0, 0), (0, 0)))
        node_mask = jnp.pad(node_mask, ((0, pad), (0, 0), (0, 0)))

    # Block-diagonal indices for G stacked graphs; masked edges -> -1 sentinel.
    row = edge_index[..., 0].astype(jnp.int32).reshape(NB, G, E)
    col = edge_index[..., 1].astype(jnp.int32).reshape(NB, G, E)
    offs = (jnp.arange(G, dtype=jnp.int32) * N)[None, :, None]
    valid = edge_mask.reshape(NB, G, E) > 0
    row = jnp.where(valid, row + offs, -1).reshape(NB, Me)
    col = jnp.where(valid, col + offs, -1).reshape(NB, Me)
    row_s = row.reshape(NB, Me, 1)        # sublane layout -> gather one-hots
    col_s = col.reshape(NB, Me, 1)
    row_l = row.reshape(NB, 1, Me)        # lane layout    -> scatter one-hot

    h_b = h.astype(f32).reshape(NB, Mn, F)
    nmask_b = node_mask.astype(f32).reshape(NB, Mn, 1)

    # Weights: pre-split the concat matmuls; zero-pad only the dims that feed
    # 128-lane column blocks (exact: padded units stay zero through SiLU).
    w1 = params["w1"].astype(f32)         # (2F, H)
    w3 = params["w3"].astype(f32)         # (F+H, H)
    wcat = jnp.concatenate(
        [_pad_axis(w1[:F], 1, Hp),        # -> h @ w1_src
         _pad_axis(w1[F:], 1, Hp),        # -> h @ w1_tgt
         _pad_axis(w3[:F], 1, Hp)],       # -> h @ w3_h
        axis=1).astype(mlp_dtype)                                   # (F, 3*Hp)
    w2 = _pad_axis(params["w2"].astype(f32), 0, Hp).astype(mlp_dtype)   # (Hp, H)
    w3a = _pad_axis(w3[F:], 1, Hp).astype(mlp_dtype)                    # (H, Hp)
    w4 = _pad_axis(params["w4"].astype(f32), 0, Hp).astype(mlp_dtype)   # (Hp, F)
    b1 = _pad_axis(params["b1"].astype(f32), 1, Hp)                     # (1, Hp)
    b2 = params["b2"].astype(f32)                                       # (1, H)
    b3 = _pad_axis(params["b3"].astype(f32), 1, Hp)                     # (1, Hp)
    b4 = params["b4"].astype(f32)                                       # (1, F)

    def blocked(shape):
        return pl.BlockSpec((1,) + shape, lambda b: (b, 0, 0))

    def resident(arr):
        # Constant block index -> stays resident across grid steps.
        return pl.BlockSpec(arr.shape, lambda b: (0, 0))

    grid_spec = pltpu.PrefetchScalarGridSpec(
        num_scalar_prefetch=0,
        grid=(NB,),
        in_specs=[
            blocked((Me, 1)),            # row (sublanes, sentinel)
            blocked((Me, 1)),            # col (sublanes, sentinel)
            blocked((1, Me)),            # row (lanes, sentinel)
            blocked((Mn, F)),            # h (unpadded width)
            blocked((Mn, 1)),            # node_mask
            resident(wcat), resident(b1), resident(w2), resident(b2),
            resident(w3a), resident(b3), resident(w4), resident(b4),
        ],
        out_specs=[
            pl.BlockSpec((1, Mn, F), lambda b: (b, 0, 0)),
            pl.BlockSpec((1, Me, H), lambda b: (b, 0, 0)),
        ],
    )

    est = _vmem_estimate(G, N, E, F, H, Hp)
    vmem_limit = int(min(max(32 * 2**20, est + 8 * 2**20), 48 * 2**20))

    h_out_p, mij_p = pl.pallas_call(
        gcl_kernel,
        out_shape=[
            jax.ShapeDtypeStruct((NB, Mn, F), h.dtype),
            jax.ShapeDtypeStruct((NB, Me, H), h.dtype),
        ],
        grid_spec=grid_spec,
        compiler_params=pltpu.CompilerParams(
            dimension_semantics=("parallel",),
            vmem_limit_bytes=vmem_limit),
    )(row_s, col_s, row_l, h_b, nmask_b,
      wcat, b1, w2, b2, w3a, b3, w4, b4)

    h_out = h_out_p.reshape(B_pad, N, F)[:B]
    mij = mij_p.reshape(B_pad, E, H)[:B]
    return h_out, mij


def ref_forward(h, edge_index, edge_mask, node_mask, params):
    """Pure-JAX reference mirroring the PyTorch forward."""
    B, N, F = h.shape
    row = edge_index[:, :, 0]
    col = edge_index[:, :, 1]
    src = jax.vmap(lambda hb, rb: hb[rb])(h, row) * edge_mask
    tgt = jax.vmap(lambda hb, cb: hb[cb])(h, col) * edge_mask
    edge_in = jnp.concatenate([src, tgt], axis=2)
    m1 = jax.nn.silu(edge_in @ params["w1"] + params["b1"][0])
    mij = jax.nn.silu(m1 @ params["w2"] + params["b2"][0])
    edge_feat = mij * edge_mask
    agg = jax.vmap(
        lambda ef, rb: jax.ops.segment_sum(ef, rb, num_segments=N)
    )(edge_feat, row)
    node_in = jnp.concatenate([h, agg], axis=2)
    n1 = jax.nn.silu(node_in @ params["w3"] + params["b3"][0])
    n2 = n1 @ params["w4"] + params["b4"][0]
    out = (h + n2) * node_mask
    return out, mij


if __name__ == "__main__":
    def make_params(key, F, H):
        ks = jax.random.split(key, 8)
        return {
            "w1": jax.random.normal(ks[0], (2 * F, H), jnp.float32) * 0.1,
            "b1": jax.random.normal(ks[1], (1, H), jnp.float32) * 0.1,
            "w2": jax.random.normal(ks[2], (H, H), jnp.float32) * 0.1,
            "b2": jax.random.normal(ks[3], (1, H), jnp.float32) * 0.1,
            "w3": jax.random.normal(ks[4], (F + H, H), jnp.float32) * 0.1,
            "b3": jax.random.normal(ks[5], (1, H), jnp.float32) * 0.1,
            "w4": jax.random.normal(ks[6], (H, F), jnp.float32) * 0.1,
            "b4": jax.random.normal(ks[7], (1, F), jnp.float32) * 0.1,
        }

    def run_case(key, B, N, E, F, H, fully_connected):
        kp, k0, k1, k2, k3, k4 = jax.random.split(key, 6)
        params = make_params(kp, F, H)
        if fully_connected:
            ii = jnp.arange(N, dtype=jnp.int32)
            row = jnp.tile(jnp.repeat(ii, N)[None, :], (B, 1))    # (B, E)
            col = jnp.tile(jnp.tile(ii, N)[None, :], (B, 1))      # (B, E)
            edge_mask = (row != col).astype(jnp.float32).reshape(B, E, 1)
        else:
            row = jax.random.randint(k0, (B, E), 0, N, dtype=jnp.int32)
            col = jax.random.randint(k1, (B, E), 0, N, dtype=jnp.int32)
            edge_mask = (jax.random.uniform(k2, (B, E, 1)) > 0.15).astype(jnp.float32)
        edge_index = jnp.stack([row, col], axis=-1)
        node_mask = (jax.random.uniform(k3, (B, N, 1)) > 0.2).astype(jnp.float32)
        h = jax.random.normal(k4, (B, N, F), jnp.float32)

        h_out, mij = gcl_forward(h, edge_index, edge_mask, node_mask, params)
        jax.block_until_ready((h_out, mij))

        h_ref, mij_ref = ref_forward(h, edge_index, edge_mask, node_mask, params)
        assert h_out.shape == h_ref.shape and mij.shape == mij_ref.shape
        assert jnp.allclose(h_out, h_ref, atol=1e-4, rtol=1e-4), "h mismatch"
        assert jnp.allclose(mij, mij_ref, atol=1e-4, rtol=1e-4), "mij mismatch"

    key_a, key_b = jax.random.split(jax.random.PRNGKey(0), 2)
    # Case A: dense fully-connected graphs with masked self-loops; the small
    # batch caps G at 8 (8 graphs stacked per step, single grid step).
    run_case(key_a, B=8, N=8, E=64, F=32, H=32, fully_connected=True)
    # Case B: sparse random graphs, batch not divisible by the chosen G=2 ->
    # one fully-masked dummy graph is padded in; grid has 3 steps.
    run_case(key_b, B=5, N=128, E=256, F=32, H=32, fully_connected=False)

    print("KERNEL_OK")
</pallas_src>

<mosaic_0001>
module attributes {stable_mosaic.version = 11 : i64} {
  func.func @gcl_kernel(%arg0: i32, %arg1: memref<1x512x1xi32, #tpu.memory_space<vmem>>, %arg2: memref<1x512x1xi32, #tpu.memory_space<vmem>>, %arg3: memref<1x1x512xi32, #tpu.memory_space<vmem>>, %arg4: memref<1x64x32xf32, #tpu.memory_space<vmem>>, %arg5: memref<1x64x1xf32, #tpu.memory_space<vmem>>, %arg6: memref<32x384xf32, #tpu.memory_space<vmem>>, %arg7: memref<1x128xf32, #tpu.memory_space<vmem>>, %arg8: memref<128x32xf32, #tpu.memory_space<vmem>>, %arg9: memref<1x32xf32, #tpu.memory_space<vmem>>, %arg10: memref<32x128xf32, #tpu.memory_space<vmem>>, %arg11: memref<1x128xf32, #tpu.memory_space<vmem>>, %arg12: memref<128x32xf32, #tpu.memory_space<vmem>>, %arg13: memref<1x32xf32, #tpu.memory_space<vmem>>, %arg14: memref<1x64x32xf32, #tpu.memory_space<vmem>>, %arg15: memref<1x512x32xf32, #tpu.memory_space<vmem>>) attributes {dimension_semantics = [#tpu.dimension_semantics<parallel>], iteration_bounds = array<i64: 1>, scalar_prefetch = 0 : i64, scratch_operands = 0 : i64, tpu.core_type = #tpu.core_type<tc>, window_params = [{transform_indices = @transform_0, window_bounds = array<i64: 1, 512, 1>}, {transform_indices = @transform_1, window_bounds = array<i64: 1, 512, 1>}, {transform_indices = @transform_2, window_bounds = array<i64: 1, 1, 512>}, {transform_indices = @transform_3, window_bounds = array<i64: 1, 64, 32>}, {transform_indices = @transform_4, window_bounds = array<i64: 1, 64, 1>}, {pipeline_mode = #tpu.pipeline_mode<synchronous>, transform_indices = @transform_5, window_bounds = array<i64: 32, 384>}, {pipeline_mode = #tpu.pipeline_mode<synchronous>, transform_indices = @transform_6, window_bounds = array<i64: 1, 128>}, {pipeline_mode = #tpu.pipeline_mode<synchronous>, transform_indices = @transform_7, window_bounds = array<i64: 128, 32>}, {pipeline_mode = #tpu.pipeline_mode<synchronous>, transform_indices = @transform_8, window_bounds = array<i64: 1, 32>}, {pipeline_mode = #tpu.pipeline_mode<synchronous>, transform_indices = @transform_9, window_bounds = array<i64: 32, 128>}, {pipeline_mode = #tpu.pipeline_mode<synchronous>, transform_indices = @transform_10, window_bounds = array<i64: 1, 128>}, {pipeline_mode = #tpu.pipeline_mode<synchronous>, transform_indices = @transform_11, window_bounds = array<i64: 128, 32>}, {pipeline_mode = #tpu.pipeline_mode<synchronous>, transform_indices = @transform_12, window_bounds = array<i64: 1, 32>}, {transform_indices = @transform_13, window_bounds = array<i64: 1, 64, 32>}, {transform_indices = @transform_14, window_bounds = array<i64: 1, 512, 32>}]} {
    %c0 = arith.constant 0 : index
    %c0_0 = arith.constant 0 : index
    %c0_1 = arith.constant 0 : index
    %0 = vector.load %arg4[%c0, %c0_0, %c0_1] : memref<1x64x32xf32, #tpu.memory_space<vmem>>, vector<1x64x32xf32>
    %1 = vector.shape_cast %0 : vector<1x64x32xf32> to vector<64x32xf32>
    %c0_2 = arith.constant 0 : index
    %c0_3 = arith.constant 0 : index
    %c0_4 = arith.constant 0 : index
    %2 = vector.load %arg1[%c0_2, %c0_3, %c0_4] : memref<1x512x1xi32, #tpu.memory_space<vmem>>, vector<1x512x1xi32>
    %3 = vector.shape_cast %2 : vector<1x512x1xi32> to vector<512x1xi32>
    %c0_5 = arith.constant 0 : index
    %c0_6 = arith.constant 0 : index
    %c0_7 = arith.constant 0 : index
    %4 = vector.load %arg2[%c0_5, %c0_6, %c0_7] : memref<1x512x1xi32, #tpu.memory_space<vmem>>, vector<1x512x1xi32>
    %5 = vector.shape_cast %4 : vector<1x512x1xi32> to vector<512x1xi32>
    %c0_8 = arith.constant 0 : index
    %c0_9 = arith.constant 0 : index
    %c0_10 = arith.constant 0 : index
    %6 = vector.load %arg3[%c0_8, %c0_9, %c0_10] : memref<1x1x512xi32, #tpu.memory_space<vmem>>, vector<1x1x512xi32>
    %7 = vector.shape_cast %6 : vector<1x1x512xi32> to vector<1x512xi32>
    %c0_11 = arith.constant 0 : index
    %c0_12 = arith.constant 0 : index
    %c0_13 = arith.constant 0 : index
    %8 = vector.load %arg5[%c0_11, %c0_12, %c0_13] : memref<1x64x1xf32, #tpu.memory_space<vmem>>, vector<1x64x1xf32>
    %9 = vector.shape_cast %8 : vector<1x64x1xf32> to vector<64x1xf32>
    %c0_14 = arith.constant 0 : index
    %c0_15 = arith.constant 0 : index
    %10 = vector.load %arg6[%c0_14, %c0_15] : memref<32x384xf32, #tpu.memory_space<vmem>>, vector<32x384xf32>
    %cst = arith.constant dense<0.000000e+00> : vector<64x384xf32>
    %11 = tpu.matmul %1, %10, %cst {dimension_numbers = #tpu.dot_dimension_numbers<[1], [0], [0], [1], [0, 0, 1, 1], [], []>} : vector<64x32xf32>, vector<32x384xf32>, vector<64x384xf32> -> vector<64x384xf32>
    %12 = vector.extract_strided_slice %11 {offsets = [0, 0], sizes = [64, 128], strides = [1, 1]} : vector<64x384xf32> to vector<64x128xf32>
    %13 = vector.extract_strided_slice %11 {offsets = [0, 128], sizes = [64, 128], strides = [1, 1]} : vector<64x384xf32> to vector<64x128xf32>
    %14 = vector.extract_strided_slice %11 {offsets = [0, 256], sizes = [64, 128], strides = [1, 1]} : vector<64x384xf32> to vector<64x128xf32>
    %15 = tpu.iota {dimensions = array<i32: 1>} : vector<512x64xi32>
    %16 = vector.broadcast %3 : vector<512x1xi32> to vector<512x64xi32>
    %17 = arith.cmpi eq, %15, %16 : vector<512x64xi32>
    %18 = arith.extui %17 : vector<512x64xi1> to vector<512x64xi32>
    %19 = arith.sitofp %18 : vector<512x64xi32> to vector<512x64xf32>
    %20 = vector.broadcast %5 : vector<512x1xi32> to vector<512x64xi32>
    %21 = arith.cmpi eq, %15, %20 : vector<512x64xi32>
    %22 = arith.extui %21 : vector<512x64xi1> to vector<512x64xi32>
    %23 = arith.sitofp %22 : vector<512x64xi32> to vector<512x64xf32>
    %cst_16 = arith.constant dense<0.000000e+00> : vector<512x128xf32>
    %24 = tpu.matmul %19, %12, %cst_16 {dimension_numbers = #tpu.dot_dimension_numbers<[1], [0], [0], [1], [0, 0, 1, 1], [], []>} : vector<512x64xf32>, vector<64x128xf32>, vector<512x128xf32> -> vector<512x128xf32>
    %cst_17 = arith.constant dense<0.000000e+00> : vector<512x128xf32>
    %25 = tpu.matmul %23, %13, %cst_17 {dimension_numbers = #tpu.dot_dimension_numbers<[1], [0], [0], [1], [0, 0, 1, 1], [], []>} : vector<512x64xf32>, vector<64x128xf32>, vector<512x128xf32> -> vector<512x128xf32>
    %26 = arith.addf %24, %25 : vector<512x128xf32>
    %c0_18 = arith.constant 0 : index
    %c0_19 = arith.constant 0 : index
    %27 = vector.load %arg7[%c0_18, %c0_19] : memref<1x128xf32, #tpu.memory_space<vmem>>, vector<1x128xf32>
    %28 = vector.broadcast %27 : vector<1x128xf32> to vector<512x128xf32>
    %29 = arith.addf %26, %28 : vector<512x128xf32>
    %30 = arith.negf %29 : vector<512x128xf32>
    %31 = math.exp %30 : vector<512x128xf32>
    %cst_20 = arith.constant 1.000000e+00 : f32
    %32 = vector.broadcast %cst_20 : f32 to vector<512x128xf32>
    %33 = arith.addf %32, %31 : vector<512x128xf32>
    %34 = arith.divf %32, %33 : vector<512x128xf32>
    %35 = arith.mulf %29, %34 : vector<512x128xf32>
    %c0_21 = arith.constant 0 : index
    %c0_22 = arith.constant 0 : index
    %36 = vector.load %arg8[%c0_21, %c0_22] : memref<128x32xf32, #tpu.memory_space<vmem>>, vector<128x32xf32>
    %cst_23 = arith.constant dense<0.000000e+00> : vector<512x32xf32>
    %37 = tpu.matmul %35, %36, %cst_23 {dimension_numbers = #tpu.dot_dimension_numbers<[1], [0], [0], [1], [0, 0, 1, 1], [], []>} : vector<512x128xf32>, vector<128x32xf32>, vector<512x32xf32> -> vector<512x32xf32>
    %c0_24 = arith.constant 0 : index
    %c0_25 = arith.constant 0 : index
    %38 = vector.load %arg9[%c0_24, %c0_25] : memref<1x32xf32, #tpu.memory_space<vmem>>, vector<1x32xf32>
    %39 = vector.broadcast %38 : vector<1x32xf32> to vector<512x32xf32>
    %40 = arith.addf %37, %39 : vector<512x32xf32>
    %41 = arith.negf %40 : vector<512x32xf32>
    %42 = math.exp %41 : vector<512x32xf32>
    %cst_26 = arith.constant 1.000000e+00 : f32
    %43 = vector.broadcast %cst_26 : f32 to vector<512x32xf32>
    %44 = arith.addf %43, %42 : vector<512x32xf32>
    %45 = arith.divf %43, %44 : vector<512x32xf32>
    %46 = arith.mulf %40, %45 : vector<512x32xf32>
    %47 = tpu.iota {dimensions = array<i32: 0>} : vector<64x512xi32>
    %48 = vector.broadcast %7 : vector<1x512xi32> to vector<64x512xi32>
    %49 = arith.cmpi eq, %47, %48 : vector<64x512xi32>
    %50 = arith.extui %49 : vector<64x512xi1> to vector<64x512xi32>
    %51 = arith.sitofp %50 : vector<64x512xi32> to vector<64x512xf32>
    %cst_27 = arith.constant dense<0.000000e+00> : vector<64x32xf32>
    %52 = tpu.matmul %51, %46, %cst_27 {dimension_numbers = #tpu.dot_dimension_numbers<[1], [0], [0], [1], [0, 0, 1, 1], [], []>} : vector<64x512xf32>, vector<512x32xf32>, vector<64x32xf32> -> vector<64x32xf32>
    %c0_28 = arith.constant 0 : index
    %c0_29 = arith.constant 0 : index
    %53 = vector.load %arg10[%c0_28, %c0_29] : memref<32x128xf32, #tpu.memory_space<vmem>>, vector<32x128xf32>
    %cst_30 = arith.constant dense<0.000000e+00> : vector<64x128xf32>
    %54 = tpu.matmul %52, %53, %cst_30 {dimension_numbers = #tpu.dot_dimension_numbers<[1], [0], [0], [1], [0, 0, 1, 1], [], []>} : vector<64x32xf32>, vector<32x128xf32>, vector<64x128xf32> -> vector<64x128xf32>
    %55 = arith.addf %14, %54 : vector<64x128xf32>
    %c0_31 = arith.constant 0 : index
    %c0_32 = arith.constant 0 : index
    %56 = vector.load %arg11[%c0_31, %c0_32] : memref<1x128xf32, #tpu.memory_space<vmem>>, vector<1x128xf32>
    %57 = vector.broadcast %56 : vector<1x128xf32> to vector<64x128xf32>
    %58 = arith.addf %55, %57 : vector<64x128xf32>
    %59 = arith.negf %58 : vector<64x128xf32>
    %60 = math.exp %59 : vector<64x128xf32>
    %cst_33 = arith.constant 1.000000e+00 : f32
    %61 = vector.broadcast %cst_33 : f32 to vector<64x128xf32>
    %62 = arith.addf %61, %60 : vector<64x128xf32>
    %63 = arith.divf %61, %62 : vector<64x128xf32>
    %64 = arith.mulf %58, %63 : vector<64x128xf32>
    %c0_34 = arith.constant 0 : index
    %c0_35 = arith.constant 0 : index
    %65 = vector.load %arg12[%c0_34, %c0_35] : memref<128x32xf32, #tpu.memory_space<vmem>>, vector<128x32xf32>
    %cst_36 = arith.constant dense<0.000000e+00> : vector<64x32xf32>
    %66 = tpu.matmul %64, %65, %cst_36 {dimension_numbers = #tpu.dot_dimension_numbers<[1], [0], [0], [1], [0, 0, 1, 1], [], []>} : vector<64x128xf32>, vector<128x32xf32>, vector<64x32xf32> -> vector<64x32xf32>
    %c0_37 = arith.constant 0 : index
    %c0_38 = arith.constant 0 : index
    %67 = vector.load %arg13[%c0_37, %c0_38] : memref<1x32xf32, #tpu.memory_space<vmem>>, vector<1x32xf32>
    %68 = vector.broadcast %67 : vector<1x32xf32> to vector<64x32xf32>
    %69 = arith.addf %66, %68 : vector<64x32xf32>
    %70 = arith.addf %1, %69 : vector<64x32xf32>
    %71 = vector.broadcast %9 : vector<64x1xf32> to vector<64x32xf32>
    %72 = arith.mulf %70, %71 : vector<64x32xf32>
    %c0_39 = arith.constant 0 : index
    %c0_40 = arith.constant 0 : index
    %c0_41 = arith.constant 0 : index
    %73 = vector.load %arg14[%c0_39, %c0_40, %c0_41] : memref<1x64x32xf32, #tpu.memory_space<vmem>>, vector<1x64x32xf32>
    %74 = vector.shape_cast %73 : vector<1x64x32xf32> to vector<64x32xf32>
    %75 = vector.shape_cast %72 : vector<64x32xf32> to vector<1x64x32xf32>
    tpu.vector_store %arg14[%c0_39, %c0_40, %c0_41], %75 {strides = array<i32>} : memref<1x64x32xf32, #tpu.memory_space<vmem>>, vector<1x64x32xf32>,
    %c0_42 = arith.constant 0 : index
    %c0_43 = arith.constant 0 : index
    %c0_44 = arith.constant 0 : index
    %76 = vector.load %arg15[%c0_42, %c0_43, %c0_44] : memref<1x512x32xf32, #tpu.memory_space<vmem>>, vector<1x512x32xf32>
    %77 = vector.shape_cast %76 : vector<1x512x32xf32> to vector<512x32xf32>
    %78 = vector.shape_cast %46 : vector<512x32xf32> to vector<1x512x32xf32>
    tpu.vector_store %arg15[%c0_42, %c0_43, %c0_44], %78 {strides = array<i32>} : memref<1x512x32xf32, #tpu.memory_space<vmem>>, vector<1x512x32xf32>,
    return
  }
  func.func @transform_0(%arg0: i32) -> (i32, i32, i32) {
    %c0_i32 = arith.constant 0 : i32
    %c0_i32_0 = arith.constant 0 : i32
    %c0_i32_1 = arith.constant 0 : i32
    return %arg0, %c0_i32, %c0_i32_0 : i32, i32, i32
  }
  func.func @transform_1(%arg0: i32) -> (i32, i32, i32) {
    %c0_i32 = arith.constant 0 : i32
    %c0_i32_0 = arith.constant 0 : i32
    %c0_i32_1 = arith.constant 0 : i32
    return %arg0, %c0_i32, %c0_i32_0 : i32, i32, i32
  }
  func.func @transform_2(%arg0: i32) -> (i32, i32, i32) {
    %c0_i32 = arith.constant 0 : i32
    %c0_i32_0 = arith.constant 0 : i32
    %c0_i32_1 = arith.constant 0 : i32
    return %arg0, %c0_i32, %c0_i32_0 : i32, i32, i32
  }
  func.func @transform_3(%arg0: i32) -> (i32, i32, i32) {
    %c0_i32 = arith.constant 0 : i32
    %c0_i32_0 = arith.constant 0 : i32
    %c0_i32_1 = arith.constant 0 : i32
    return %arg0, %c0_i32, %c0_i32_0 : i32, i32, i32
  }
  func.func @transform_4(%arg0: i32) -> (i32, i32, i32) {
    %c0_i32 = arith.constant 0 : i32
    %c0_i32_0 = arith.constant 0 : i32
    %c0_i32_1 = arith.constant 0 : i32
    return %arg0, %c0_i32, %c0_i32_0 : i32, i32, i32
  }
  func.func @transform_5(%arg0: i32) -> (i32, i32) {
    %c0_i32 = arith.constant 0 : i32
    %c0_i32_0 = arith.constant 0 : i32
    %c0_i32_1 = arith.constant 0 : i32
    return %c0_i32, %c0_i32_0 : i32, i32
  }
  func.func @transform_6(%arg0: i32) -> (i32, i32) {
    %c0_i32 = arith.constant 0 : i32
    %c0_i32_0 = arith.constant 0 : i32
    %c0_i32_1 = arith.constant 0 : i32
    return %c0_i32, %c0_i32_0 : i32, i32
  }
  func.func @transform_7(%arg0: i32) -> (i32, i32) {
    %c0_i32 = arith.constant 0 : i32
    %c0_i32_0 = arith.constant 0 : i32
    %c0_i32_1 = arith.constant 0 : i32
    return %c0_i32, %c0_i32_0 : i32, i32
  }
  func.func @transform_8(%arg0: i32) -> (i32, i32) {
    %c0_i32 = arith.constant 0 : i32
    %c0_i32_0 = arith.constant 0 : i32
    %c0_i32_1 = arith.constant 0 : i32
    return %c0_i32, %c0_i32_0 : i32, i32
  }
  func.func @transform_9(%arg0: i32) -> (i32, i32) {
    %c0_i32 = arith.constant 0 : i32
    %c0_i32_0 = arith.constant 0 : i32
    %c0_i32_1 = arith.constant 0 : i32
    return %c0_i32, %c0_i32_0 : i32, i32
  }
  func.func @transform_10(%arg0: i32) -> (i32, i32) {
    %c0_i32 = arith.constant 0 : i32
    %c0_i32_0 = arith.constant 0 : i32
    %c0_i32_1 = arith.constant 0 : i32
    return %c0_i32, %c0_i32_0 : i32, i32
  }
  func.func @transform_11(%arg0: i32) -> (i32, i32) {
    %c0_i32 = arith.constant 0 : i32
    %c0_i32_0 = arith.constant 0 : i32
    %c0_i32_1 = arith.constant 0 : i32
    return %c0_i32, %c0_i32_0 : i32, i32
  }
  func.func @transform_12(%arg0: i32) -> (i32, i32) {
    %c0_i32 = arith.constant 0 : i32
    %c0_i32_0 = arith.constant 0 : i32
    %c0_i32_1 = arith.constant 0 : i32
    return %c0_i32, %c0_i32_0 : i32, i32
  }
  func.func @transform_13(%arg0: i32) -> (i32, i32, i32) {
    %c0_i32 = arith.constant 0 : i32
    %c0_i32_0 = arith.constant 0 : i32
    %c0_i32_1 = arith.constant 0 : i32
    return %arg0, %c0_i32, %c0_i32_0 : i32, i32, i32
  }
  func.func @transform_14(%arg0: i32) -> (i32, i32, i32) {
    %c0_i32 = arith.constant 0 : i32
    %c0_i32_0 = arith.constant 0 : i32
    %c0_i32_1 = arith.constant 0 : i32
    return %arg0, %c0_i32, %c0_i32_0 : i32, i32, i32
  }
}

</mosaic_0001>

<bundles_post_ra>
// kernel: tpu_custom_call.1
= control target key start
LH: loop header
LB: loop body
LE: loop exit
PB: predicated region body
PF: predicated region fallthrough
CT: control target
= control target key end

     0   :  { %v6672_v0 = vmov 0   ;;  %v6673_v12 = vmov 0.0   ;;  %vm203_vm0 = vcmask 261120   ;;  %vm1216_vm1 = vcmask 523264   ;;  %s9483_s1 = inlined_call_operand.vmem [shape: s32[1,512,1], index: 1, kind: input, shape index: {}]   ;;  %s9484_s5 = inlined_call_operand.vmem [shape: f32[32,384], index: 5, kind: input, shape index: {}]   ;;  %s9485_s3 = inlined_call_operand.vmem [shape: f32[1,64,32], index: 3, kind: input, shape index: {}]   ;;  %s9486_s0 = inlined_call_operand.vmem [shape: s32[1,512,1], index: 0, kind: input, shape index: {}]   ;;  %s9487_s4 = inlined_call_operand.vmem [shape: f32[1,64,1], index: 4, kind: input, shape index: {}]   ;;  %s9488_s7 = inlined_call_operand.vmem [shape: f32[128,32], index: 7, kind: input, shape index: {}]   ;;  %s9489_s6 = inlined_call_operand.vmem [shape: f32[1,128], index: 6, kind: input, shape index: {}]   ;;  %s9490_s8 = inlined_call_operand.vmem [shape: f32[1,32], index: 8, kind: input, shape index: {}]   ;;  %s9491_s2 = inlined_call_operand.vmem [shape: s32[1,1,512], index: 2, kind: input, shape index: {}]   ;;  %s9492_s14 = inlined_call_operand.vmem [shape: f32[1,512,32], index: 14, kind: output, shape index: {1}]   ;;  %s9493_s9 = inlined_call_operand.vmem [shape: f32[32,128], index: 9, kind: input, shape index: {}]   ;;  %s9494_s11 = inlined_call_operand.vmem [shape: f32[128,32], index: 11, kind: input, shape index: {}]   ;;  %s9495_s10 = inlined_call_operand.vmem [shape: f32[1,128], index: 10, kind: input, shape index: {}]   ;;  %s9496_s12 = inlined_call_operand.vmem [shape: f32[1,32], index: 12, kind: input, shape index: {}]   ;;  %s9497_s13 = inlined_call_operand.vmem [shape: f32[1,64,32], index: 13, kind: output, shape index: {0}]  }
   0x1   :  { %6117 = vset.pattern.permute.xlu1 %v6672_v0  ;;  %6116 = vset.pattern.permute.xlu0 %v6672_v0  ;;  %v120_v1 = vld [vmem:[%s9483_s1 + $0x10] sm:$0xff]  ;;  %v118_v2 = vld [vmem:[%s9483_s1] sm:$0xff]  ;;  %v192_v3 = vld [vmem:[%s9484_s5 + $0x8] sm:$0xff] }
   0x2   :  { %839 = vperm.xlu1 %6117, %v120_v1   ;;  %833 = vperm.xlu0 %6116, %v118_v2   ;;  %v195_v4 = vld [vmem:[%s9484_s5 + $0x20] sm:$0xff]  ;;  %v194_v6 = vld [vmem:[%s9484_s5 + $0x18] sm:$0xff]  ;;  %v119_v10 = vld [vmem:[%s9483_s1 + $0x8] sm:$0xff] }
   0x3   :  { %v191_v5 = vld [vmem:[%s9484_s5] sm:$0xff]  ;;  %v5857_v7 = vpack.c.bf16 %v195_v4, %v192_v3  ;;  %v121_v9 = vld [vmem:[%s9483_s1 + $0x18] sm:$0xff]  ;;  %292 = vmatprep.mubr.f32.mxu0 %v6673_v12  ;;  %v201_v13 = vld [vmem:[%s9484_s5 + $0x50] sm:$0xff] }
   0x4   :  { %v5859_v8 = vpack.c.bf16 %v194_v6, %v191_v5  ;;  %v198_v11 = vld [vmem:[%s9484_s5 + $0x38] sm:$0xff]  ;;  %v197_v14 = vld [vmem:[%s9484_s5 + $0x30] sm:$0xff]  ;;  %v200_v15 = vld [vmem:[%s9484_s5 + $0x48] sm:$0xff] }
   0x5   :  { %5858 = vmatprep.subr.bf16.mxu0 %v5857_v7  ;;  %v5861_v16 = vpack.c.bf16 %v201_v13, %v198_v11  ;;  %v5863_v17 = vpack.c.bf16 %v200_v15, %v197_v14  ;;  %v123_v18 = vld [vmem:[%s9483_s1 + $0x28] sm:$0xff]  ;;  %v46_v19 = vld [vmem:[%s9485_s3] sm:$0xff]  ;;  %v125_v21 = vld [vmem:[%s9483_s1 + $0x38] sm:$0xff] }
   0x6   :  { %5860 = vmatpush1.bf16.msra.mxu0 %v5859_v8  ;;  %842 = vperm.xlu1 %6117, %v121_v9   ;;  %v122_v20 = vld [vmem:[%s9483_s1 + $0x20] sm:$0xff]  ;;  %v124_v22 = vld [vmem:[%s9483_s1 + $0x30] sm:$0xff]  ;;  %v6808_v23 = vld [vmem:[%s9485_s3 + $0x8] sm:$0xff] }
   0x7   :  { %836 = vperm.xlu0 %6116, %v119_v10   ;;  %5862 = vmatprep.subr.bf16.mxu0 %v5861_v16  ;;  %v127_v24 = vld [vmem:[%s9483_s1 + $0x48] sm:$0xff]  ;;  %v126_v25 = vld [vmem:[%s9483_s1 + $0x40] sm:$0xff]  ;;  %v6822_v26 = vld [vmem:[%s9485_s3 + $0x10] sm:$0xff] }
   0x8   :  { %5429 = vmatprep.mubr.msk.f32.mxu1 %vm203_vm0, %v46_v19  ;;  %v129_v27 = vld [vmem:[%s9483_s1 + $0x58] sm:$0xff]  ;;  %v128_v28 = vld [vmem:[%s9483_s1 + $0x50] sm:$0xff]  ;;  %v131_v30 = vld [vmem:[%s9483_s1 + $0x68] sm:$0xff] }
   0x9   :  { %v6836_v29 = vld [vmem:[%s9485_s3 + $0x18] sm:$0xff]  ;;  %v130_v31 = vld [vmem:[%s9483_s1 + $0x60] sm:$0xff]  ;;  %v132_v34 = vld [vmem:[%s9483_s1 + $0x70] sm:$0xff] }
   0xa   :  { %5864 = vmatpush1.bf16.msra.mxu0 %v5863_v17  ;;  %848 = vperm.xlu1 %6117, %v123_v18   ;;  %v6850_v32 = vld [vmem:[%s9485_s3 + $0x20] sm:$0xff]  ;;  %v133_v33 = vld [vmem:[%s9483_s1 + $0x78] sm:$0xff]  ;;  %v6864_v35 = vld [vmem:[%s9485_s3 + $0x28] sm:$0xff] }
   0xb   :  { %845 = vperm.xlu0 %6116, %v122_v20   ;;  %v135_v36 = vld [vmem:[%s9483_s1 + $0x88] sm:$0xff]  ;;  %v134_v37 = vld [vmem:[%s9483_s1 + $0x80] sm:$0xff]  ;;  %v6878_v38 = vld [vmem:[%s9485_s3 + $0x30] sm:$0xff] }
   0xc   :  { %v137_v39 = vld [vmem:[%s9483_s1 + $0x98] sm:$0xff]  ;;  %v136_v40 = vld [vmem:[%s9483_s1 + $0x90] sm:$0xff]  ;;  %v139_v42 = vld [vmem:[%s9483_s1 + $0xa8] sm:$0xff] }
   0xd   :  { %4553 = vmatmul.mubr.msk.f32.vlgmr.msra.gmra.mrb[0].mxu0 %vm203_vm0, %v46_v19  ;;  %v6892_v41 = vld [vmem:[%s9485_s3 + $0x38] sm:$0xff]  ;;  %v138_v43 = vld [vmem:[%s9483_s1 + $0xa0] sm:$0xff]  ;;  %v140_v45 = vld [vmem:[%s9483_s1 + $0xb0] sm:$0xff] }
   0xe   :  { %854 = vperm.xlu1 %6117, %v125_v21   ;;  %298 = vmatprep.mubr.f32.mxu0 %v6673_v12  ;;  %v141_v44 = vld [vmem:[%s9483_s1 + $0xb8] sm:$0xff]  ;;  %v143_v46 = vld [vmem:[%s9483_s1 + $0xc8] sm:$0xff]  ;;  %v142_v47 = vld [vmem:[%s9483_s1 + $0xc0] sm:$0xff] }
   0xf   :  { %851 = vperm.xlu0 %6116, %v124_v22   ;;  %v145_v48 = vld [vmem:[%s9483_s1 + $0xd8] sm:$0xff]  ;;  %v144_v49 = vld [vmem:[%s9483_s1 + $0xd0] sm:$0xff]  ;;  %v147_v50 = vld [vmem:[%s9483_s1 + $0xe8] sm:$0xff] }
  0x10   :  { %v146_v51 = vld [vmem:[%s9483_s1 + $0xe0] sm:$0xff]  ;;  %v149_v52 = vld [vmem:[%s9483_s1 + $0xf8] sm:$0xff]  ;;  %v148_v53 = vld [vmem:[%s9483_s1 + $0xf0] sm:$0xff] }
  0x11   :  { %4554 = vmatmul.mubr.msk.f32.gmra.mrb[2].mxu0 %vm203_vm0, %v6808_v23  ;;  %v151_v54 = vld [vmem:[%s9483_s1 + $0x108] sm:$0xff]  ;;  %v150_v55 = vld [vmem:[%s9483_s1 + $0x100] sm:$0xff]  ;;  %v153_v56 = vld [vmem:[%s9483_s1 + $0x118] sm:$0xff] }
  0x12   :  { %860 = vperm.xlu1 %6117, %v127_v24   ;;  %304 = vmatprep.mubr.f32.mxu0 %v6673_v12  ;;  %v152_v57 = vld [vmem:[%s9483_s1 + $0x110] sm:$0xff]  ;;  %v155_v58 = vld [vmem:[%s9483_s1 + $0x128] sm:$0xff]  ;;  %v154_v59 = vld [vmem:[%s9483_s1 + $0x120] sm:$0xff] }
  0x13   :  { %857 = vperm.xlu0 %6116, %v126_v25   ;;  %v157_v60 = vld [vmem:[%s9483_s1 + $0x138] sm:$0xff]  ;;  %v156_v61 = vld [vmem:[%s9483_s1 + $0x130] sm:$0xff]  ;;  %v159_v62 = vld [vmem:[%s9483_s1 + $0x148] sm:$0xff] }
  0x14   :  { %v158_v63 = vld [vmem:[%s9483_s1 + $0x140] sm:$0xff]  ;;  %v161_v0 = vld [vmem:[%s9483_s1 + $0x158] sm:$0xff]  ;;  %v160_v1 = vld [vmem:[%s9483_s1 + $0x150] sm:$0xff] }
  0x15   :  { %4555 = vmatmul.mubr.msk.f32.gmra.mrb[4].mxu0 %vm203_vm0, %v6822_v26  ;;  %v163_v2 = vld [vmem:[%s9483_s1 + $0x168] sm:$0xff]  ;;  %v162_v3 = vld [vmem:[%s9483_s1 + $0x160] sm:$0xff]  ;;  %v165_v4 = vld [vmem:[%s9483_s1 + $0x178] sm:$0xff] }
  0x16   :  { %866 = vperm.xlu1 %6117, %v129_v27   ;;  %310 = vmatprep.mubr.f32.mxu0 %v6673_v12  ;;  %v164_v5 = vld [vmem:[%s9483_s1 + $0x170] sm:$0xff]  ;;  %v196_v7 = vld [vmem:[%s9484_s5 + $0x28] sm:$0xff]  ;;  %v166_v10 = vld [vmem:[%s9483_s1 + $0x180] sm:$0xff]  ;;  %v446_v27 = vlaneseq }
  0x17   :  { %863 = vperm.xlu0 %6116, %v128_v28   ;;  %v193_v6 = vld [vmem:[%s9484_s5 + $0x10] sm:$0xff]  ;;  %v167_v9 = vld [vmem:[%s9483_s1 + $0x188] sm:$0xff]  ;;  %v199_v11 = vld [vmem:[%s9484_s5 + $0x40] sm:$0xff] }
  0x18   :  { %v5865_v8 = vpack.c.bf16 %v196_v7, %v193_v6  ;;  %v202_v13 = vld [vmem:[%s9484_s5 + $0x58] sm:$0xff]  ;;  %v168_v16 = vld [vmem:[%s9483_s1 + $0x190] sm:$0xff]  ;;  %v171_v17 = vld [vmem:[%s9483_s1 + $0x1a8] sm:$0xff] }
  0x19   :  { %4556 = vmatmul.mubr.msk.f32.gmra.mrb[6].mxu0 %vm203_vm0, %v6836_v29  ;;  %v5869_v14 = vpack.c.bf16 %v202_v13, %v199_v11  ;;  %v169_v15 = vld [vmem:[%s9483_s1 + $0x198] sm:$0xff]  ;;  %v170_v18 = vld [vmem:[%s9483_s1 + $0x1a0] sm:$0xff]  ;;  %v172_v20 = vld [vmem:[%s9483_s1 + $0x1b0] sm:$0xff] }
  0x1a   :  { %872 = vperm.xlu1 %6117, %v131_v30   ;;  %316 = vmatprep.mubr.f32.mxu0 %v6673_v12  ;;  %v173_v19 = vld [vmem:[%s9483_s1 + $0x1b8] sm:$0xff]  ;;  %v175_v21 = vld [vmem:[%s9483_s1 + $0x1c8] sm:$0xff]  ;;  %v174_v22 = vld [vmem:[%s9483_s1 + $0x1c0] sm:$0xff]  ;;  %v7055_v30 = vand.u32 127, %v446_v27 }
  0x1b   :  { %869 = vperm.xlu0 %6116, %v130_v31   ;;  %5866 = vmatprep.subr.bf16.mxu1 %v5865_v8  ;;  %v176_v24 = vld [vmem:[%s9483_s1 + $0x1d0] sm:$0xff]  ;;  %v179_v25 = vld [vmem:[%s9483_s1 + $0x1e8] sm:$0xff]  ;;  %v181_v28 = vld [vmem:[%s9483_s1 + $0x1f8] sm:$0xff] }
  0x1c   :  { %5868 = vmatpush3.bf16.msra.mxu1 %v5865_v8  ;;  %v55_v31 = vld [vmem:[%s9486_s0 + $0x8] sm:$0xff]  ;;  %v77_v6 = vld [vmem:[%s9486_s0 + $0xb8] sm:$0xff]  ;;  %v76_v8 = vld [vmem:[%s9486_s0 + $0xb0] sm:$0xff] }
  0x1d   :  { %4557 = vmatmul.mubr.msk.f32.gmra.mrb[8].mxu0 %vm203_vm0, %v6850_v32  ;;  %5870 = vmatprep.subr.bf16.mxu1 %v5869_v14  ;;  %v78_v11 = vld [vmem:[%s9486_s0 + $0xc0] sm:$0xff] }
  0x1e   :  { %878 = vperm.xlu1 %6117, %v133_v33   ;;  %322 = vmatprep.mubr.f32.mxu0 %v6673_v12 }
  0x1f   :  { %875 = vperm.xlu0 %6116, %v132_v34  }
  0x20   :  { %5872 = vmatpush3.bf16.msra.mxu1 %v5869_v14  ;;  %v81_v14 = vld [vmem:[%s9486_s0 + $0xd8] sm:$0xff] }
  0x21   :  { %4558 = vmatmul.mubr.msk.f32.gmra.mrb[10].mxu0 %vm203_vm0, %v6864_v35 }
  0x22   :  { %884 = vperm.xlu1 %6117, %v135_v36   ;;  %328 = vmatprep.mubr.f32.mxu0 %v6673_v12  ;;  %v57_v36 = vld [vmem:[%s9486_s0 + $0x18] sm:$0xff] }
  0x23   :  { %881 = vperm.xlu0 %6116, %v134_v37   ;;  %5430 = vmatmul.mubr.msk.f32.vlgmr.msra.gmra.mrb[0].mxu1 %vm203_vm0, %v6808_v23  ;;  %v177_v23 = vld [vmem:[%s9483_s1 + $0x1d8] sm:$0xff]  ;;  %v56_v37 = vld [vmem:[%s9486_s0 + $0x10] sm:$0xff] }
  0x24   :  { %5432 = vmatprep.mubr.msk.f32.mxu1 %vm203_vm0, %v6822_v26  ;;  %v178_v26 = vld [vmem:[%s9483_s1 + $0x1e0] sm:$0xff] }
  0x25   :  { %4559 = vmatmul.mubr.msk.f32.gmra.mrb[12].mxu0 %vm203_vm0, %v6878_v38 }
  0x26   :  { %890 = vperm.xlu1 %6117, %v137_v39   ;;  %334 = vmatprep.mubr.f32.mxu0 %v6673_v12 }
  0x27   :  { %887 = vperm.xlu0 %6116, %v136_v40   ;;  %5433 = vmatmul.mubr.msk.f32.gmra.mrb[2].mxu1 %vm203_vm0, %v6836_v29  ;;  %v180_v29 = vld [vmem:[%s9483_s1 + $0x1f0] sm:$0xff]  ;;  %v59_v40 = vld [vmem:[%s9486_s0 + $0x28] sm:$0xff] }
  0x28   :  { %5435 = vmatprep.mubr.msk.f32.mxu1 %vm203_vm0, %v6850_v32  ;;  %v54_v32 = vld [vmem:[%s9486_s0] sm:$0xff] }
  0x29   :  { %4560 = vmatmul.mubr.msk.f32.gmra.mrb[14].mxu0 %vm203_vm0, %v6892_v41 }
  0x2a   :  { %896 = vperm.xlu1 %6117, %v139_v42  }
  0x2b   :  { %893 = vperm.xlu0 %6116, %v138_v43   ;;  %5436 = vmatmul.mubr.msk.f32.gmra.mrb[4].mxu1 %vm203_vm0, %v6864_v35 }
  0x2c   :  { %5438 = vmatprep.mubr.msk.f32.mxu1 %vm203_vm0, %v6878_v38 }
  0x2e   :  { %902 = vperm.xlu1 %6117, %v141_v44   ;;  %v61_v44 = vld [vmem:[%s9486_s0 + $0x38] sm:$0xff] }
  0x2f   :  { %899 = vperm.xlu0 %6116, %v140_v45   ;;  %5439 = vmatmul.mubr.msk.f32.gmra.mrb[6].mxu1 %vm203_vm0, %v6892_v41  ;;  %v58_v41 = vld [vmem:[%s9486_s0 + $0x20] sm:$0xff]  ;;  %v60_v45 = vld [vmem:[%s9486_s0 + $0x30] sm:$0xff] }
  0x32   :  { %908 = vperm.xlu1 %6117, %v143_v46  }
  0x33   :  { %905 = vperm.xlu0 %6116, %v142_v47   ;;  %v63_v47 = vld [vmem:[%s9486_s0 + $0x48] sm:$0xff] }
  0x36   :  { %914 = vperm.xlu1 %6117, %v145_v48   ;;  %v62_v48 = vld [vmem:[%s9486_s0 + $0x40] sm:$0xff] }
  0x37   :  { %911 = vperm.xlu0 %6116, %v144_v49  }
  0x3a   :  { %920 = vperm.xlu1 %6117, %v147_v50   ;;  %v65_v50 = vld [vmem:[%s9486_s0 + $0x58] sm:$0xff] }
  0x3b   :  { %917 = vperm.xlu0 %6116, %v146_v51  }
  0x3e   :  { %926 = vperm.xlu1 %6117, %v149_v52   ;;  %v64_v52 = vld [vmem:[%s9486_s0 + $0x50] sm:$0xff] }
  0x3f   :  { %923 = vperm.xlu0 %6116, %v148_v53  }
  0x42   :  { %932 = vperm.xlu1 %6117, %v151_v54   ;;  %v67_v54 = vld [vmem:[%s9486_s0 + $0x68] sm:$0xff] }
  0x43   :  { %929 = vperm.xlu0 %6116, %v150_v55   ;;  %v66_v55 = vld [vmem:[%s9486_s0 + $0x60] sm:$0xff] }
  0x46   :  { %938 = vperm.xlu1 %6117, %v153_v56  }
  0x47   :  { %935 = vperm.xlu0 %6116, %v152_v57   ;;  %v69_v57 = vld [vmem:[%s9486_s0 + $0x78] sm:$0xff] }
  0x4a   :  { %944 = vperm.xlu1 %6117, %v155_v58   ;;  %v68_v58 = vld [vmem:[%s9486_s0 + $0x70] sm:$0xff] }
  0x4b   :  { %941 = vperm.xlu0 %6116, %v154_v59  }
  0x4e   :  { %950 = vperm.xlu1 %6117, %v157_v60   ;;  %v71_v60 = vld [vmem:[%s9486_s0 + $0x88] sm:$0xff] }
  0x4f   :  { %947 = vperm.xlu0 %6116, %v156_v61  }
  0x52   :  { %956 = vperm.xlu1 %6117, %v159_v62   ;;  %v70_v62 = vld [vmem:[%s9486_s0 + $0x80] sm:$0xff] }
  0x53   :  { %953 = vperm.xlu0 %6116, %v158_v63  }
  0x56   :  { %962 = vperm.xlu1 %6117, %v161_v0   ;;  %v73_v0 = vld [vmem:[%s9486_s0 + $0x98] sm:$0xff] }
  0x57   :  { %959 = vperm.xlu0 %6116, %v160_v1   ;;  %v72_v1 = vld [vmem:[%s9486_s0 + $0x90] sm:$0xff] }
  0x5a   :  { %968 = vperm.xlu1 %6117, %v163_v2  }
  0x5b   :  { %965 = vperm.xlu0 %6116, %v162_v3   ;;  %v75_v3 = vld [vmem:[%s9486_s0 + $0xa8] sm:$0xff] }
  0x5e   :  { %974 = vperm.xlu1 %6117, %v165_v4   ;;  %v74_v4 = vld [vmem:[%s9486_s0 + $0xa0] sm:$0xff] }
  0x5f   :  { %971 = vperm.xlu0 %6116, %v164_v5  }
  0x62   :  { %980 = vperm.xlu1 %6117, %v167_v9  }
  0x63   :  { %977 = vperm.xlu0 %6116, %v166_v10   ;;  %v79_v10 = vld [vmem:[%s9486_s0 + $0xc8] sm:$0xff] }
  0x66   :  { %986 = vperm.xlu1 %6117, %v169_v15   ;;  %v80_v15 = vld [vmem:[%s9486_s0 + $0xd0] sm:$0xff] }
  0x67   :  { %983 = vperm.xlu0 %6116, %v168_v16  }
  0x6a   :  { %992 = vperm.xlu1 %6117, %v171_v17   ;;  %v83_v17 = vld [vmem:[%s9486_s0 + $0xe8] sm:$0xff] }
  0x6b   :  { %989 = vperm.xlu0 %6116, %v170_v18  }
  0x6e   :  { %998 = vperm.xlu1 %6117, %v173_v19   ;;  %v82_v19 = vld [vmem:[%s9486_s0 + $0xe0] sm:$0xff] }
  0x6f   :  { %995 = vperm.xlu0 %6116, %v172_v20  }
  0x72   :  { %1004 = vperm.xlu1 %6117, %v175_v21   ;;  %v85_v21 = vld [vmem:[%s9486_s0 + $0xf8] sm:$0xff] }
  0x73   :  { %1001 = vperm.xlu0 %6116, %v174_v22   ;;  %v84_v22 = vld [vmem:[%s9486_s0 + $0xf0] sm:$0xff] }
  0x76   :  { %1010 = vperm.xlu1 %6117, %v177_v23  }
  0x77   :  { %1007 = vperm.xlu0 %6116, %v176_v24   ;;  %v87_v24 = vld [vmem:[%s9486_s0 + $0x108] sm:$0xff] }
  0x7a   :  { %1016 = vperm.xlu1 %6117, %v179_v25   ;;  %v86_v25 = vld [vmem:[%s9486_s0 + $0x100] sm:$0xff] }
  0x7b   :  { %1013 = vperm.xlu0 %6116, %v178_v26  }
  0x7e   :  { %1022 = vperm.xlu1 %6117, %v181_v28   ;;  %v89_v28 = vld [vmem:[%s9486_s0 + $0x118] sm:$0xff] }
  0x7f   :  { %1019 = vperm.xlu0 %6116, %v180_v29  }
  0x81   :  { %v7063_v33 = vpop.permute.xlu1 %839  ;;  %v834_v34 = vpop.permute.xlu0 %833 }
  0x82   :  { %vm1024_vm2 = vcmp.eq.s32.totalorder %v7055_v30, %v834_v34  ;;  %452 = vperm.xlu1 %6117, %v55_v31   ;;  %v88_v31 = vld [vmem:[%s9486_s0 + $0x110] sm:$0xff]  ;;  %v91_v34 = vld [vmem:[%s9486_s0 + $0x128] sm:$0xff]  ;;  %vm1026_vm3 = vcmp.eq.s32.totalorder %v7055_v30, %v7063_v33 }
  0x83   :  { %v4633_v35 = vsel %vm1024_vm2, 1.0, %v6673_v12  ;;  %449 = vperm.xlu0 %6116, %v54_v32  }
  0x84   :  { %5457 = vmatprep.mubr.msk.f32.mxu1 %vm1216_vm1, %v4633_v35  ;;  %v90_v35 = vld [vmem:[%s9486_s0 + $0x120] sm:$0xff] }
  0x85   :  { %v7074_v38 = vpop.permute.xlu1 %842 }
  0x86   :  { %v7076_v39 = vpop.permute.xlu0 %836  ;;  %458 = vperm.xlu1 %6117, %v57_v36   ;;  %vm1027_vm5 = vcmp.eq.s32.totalorder %v7055_v30, %v7074_v38 }
  0x87   :  { %455 = vperm.xlu0 %6116, %v56_v37   ;;  %v93_v37 = vld [vmem:[%s9486_s0 + $0x138] sm:$0xff]  ;;  %vm1025_vm4 = vcmp.eq.s32.totalorder %v7055_v30, %v7076_v39  ;;  %v4636_v38 = vsel %vm1027_vm5, 1.0, %v6673_v12 }
  0x88   :  { %v4634_v33 = vsel %vm1025_vm4, 1.0, %v6673_v12  ;;  %v186_v39 = vld [vmem:[%s9487_s4 + $0x18] sm:$0xff] }
  0x89   :  { %v7086_v43 = vpop.permute.xlu1 %848 }
  0x8a   :  { %v7084_v42 = vpop.permute.xlu0 %845  ;;  %464 = vperm.xlu1 %6117, %v59_v40   ;;  %v92_v40 = vld [vmem:[%s9486_s0 + $0x130] sm:$0xff]  ;;  %vm1029_vm7 = vcmp.eq.s32.totalorder %v7055_v30, %v7086_v43 }
  0x8b   :  { %461 = vperm.xlu0 %6116, %v58_v41   ;;  %vm1028_vm6 = vcmp.eq.s32.totalorder %v7055_v30, %v7084_v42  ;;  %v4638_v43 = vsel %vm1029_vm7, 1.0, %v6673_v12 }
  0x8c   :  { %v4637_v42 = vsel %vm1028_vm6, 1.0, %v6673_v12 }
  0x8d   :  { %v7102_v49 = vpop.permute.xlu1 %854 }
  0x8e   :  { %v7094_v46 = vpop.permute.xlu0 %851  ;;  %470 = vperm.xlu1 %6117, %v61_v44   ;;  %v95_v44 = vld [vmem:[%s9486_s0 + $0x148] sm:$0xff]  ;;  %vm1031_vm9 = vcmp.eq.s32.totalorder %v7055_v30, %v7102_v49 }
  0x8f   :  { %467 = vperm.xlu0 %6116, %v60_v45   ;;  %vm1030_vm8 = vcmp.eq.s32.totalorder %v7055_v30, %v7094_v46  ;;  %v4640_v49 = vsel %vm1031_vm9, 1.0, %v6673_v12 }
  0x90   :  { %v4639_v46 = vsel %vm1030_vm8, 1.0, %v6673_v12 }
  0x91   :  { %v7112_v53 = vpop.permute.xlu1 %860 }
  0x92   :  { %476 = vperm.xlu1 %6117, %v63_v47   ;;  %v7107_v51 = vpop.permute.xlu0 %857  ;;  %v94_v47 = vld [vmem:[%s9486_s0 + $0x140] sm:$0xff]  ;;  %vm1033_vm11 = vcmp.eq.s32.totalorder %v7055_v30, %v7112_v53 }
  0x93   :  { %473 = vperm.xlu0 %6116, %v62_v48   ;;  %vm1032_vm10 = vcmp.eq.s32.totalorder %v7055_v30, %v7107_v51 }
  0x95   :  { %v7128_v59 = vpop.permute.xlu1 %866 }
  0x96   :  { %482 = vperm.xlu1 %6117, %v65_v50   ;;  %v7120_v56 = vpop.permute.xlu0 %863  ;;  %v97_v50 = vld [vmem:[%s9486_s0 + $0x158] sm:$0xff]  ;;  %vm1035_vm13 = vcmp.eq.s32.totalorder %v7055_v30, %v7128_v59 }
  0x97   :  { %479 = vperm.xlu0 %6116, %v64_v52   ;;  %v96_v52 = vld [vmem:[%s9486_s0 + $0x150] sm:$0xff]  ;;  %vm1034_vm12 = vcmp.eq.s32.totalorder %v7055_v30, %v7120_v56  ;;  %v4644_v56 = vsel %vm1035_vm13, 1.0, %v6673_v12 }
  0x99   :  { %v7138_v63 = vpop.permute.xlu1 %872 }
  0x9a   :  { %488 = vperm.xlu1 %6117, %v67_v54   ;;  %v7133_v61 = vpop.permute.xlu0 %869  ;;  %vm1037_vm15 = vcmp.eq.s32.totalorder %v7055_v30, %v7138_v63 }
  0x9b   :  { %485 = vperm.xlu0 %6116, %v66_v55   ;;  %v99_v55 = vld [vmem:[%s9486_s0 + $0x168] sm:$0xff]  ;;  %vm1036_vm14 = vcmp.eq.s32.totalorder %v7055_v30, %v7133_v61  ;;  %v4646_v59 = vsel %vm1037_vm15, 1.0, %v6673_v12 }
  0x9d   :  { %v7154_v5 = vpop.permute.xlu1 %878 }
  0x9e   :  { %494 = vperm.xlu1 %6117, %v69_v57   ;;  %v7146_v2 = vpop.permute.xlu0 %875  ;;  %v98_v57 = vld [vmem:[%s9486_s0 + $0x160] sm:$0xff] }
  0x9f   :  { %491 = vperm.xlu0 %6116, %v68_v58   ;;  %vm1038_vm2 = vcmp.eq.s32.totalorder %v7055_v30, %v7146_v2 }
  0xa0   :  { %v4647_v63 = vsel %vm1038_vm2, 1.0, %v6673_v12 }
  0xa1   :  { %v7164_v9 = vpop.permute.xlu1 %884 }
  0xa2   :  { %500 = vperm.xlu1 %6117, %v71_v60   ;;  %v7159_v7 = vpop.permute.xlu0 %881  ;;  %v101_v60 = vld [vmem:[%s9486_s0 + $0x178] sm:$0xff]  ;;  %vm1041_vm5 = vcmp.eq.s32.totalorder %v7055_v30, %v7164_v9 }
  0xa3   :  { %497 = vperm.xlu0 %6116, %v70_v62   ;;  %vm1040_vm4 = vcmp.eq.s32.totalorder %v7055_v30, %v7159_v7  ;;  %v4650_v7 = vsel %vm1041_vm5, 1.0, %v6673_v12 }
  0xa5   :  { %v7180_v16 = vpop.permute.xlu1 %890 }
  0xa6   :  { %506 = vperm.xlu1 %6117, %v73_v0   ;;  %v7172_v13 = vpop.permute.xlu0 %887  ;;  %v100_v0 = vld [vmem:[%s9486_s0 + $0x170] sm:$0xff]  ;;  %vm1043_vm7 = vcmp.eq.s32.totalorder %v7055_v30, %v7180_v16 }
  0xa7   :  { %503 = vperm.xlu0 %6116, %v72_v1   ;;  %vm1042_vm6 = vcmp.eq.s32.totalorder %v7055_v30, %v7172_v13  ;;  %v4652_v9 = vsel %vm1043_vm7, 1.0, %v6673_v12 }
  0xa9   :  { %v7190_v20 = vpop.permute.xlu1 %896 }
  0xaa   :  { %512 = vperm.xlu1 %6117, %v75_v3   ;;  %v7185_v18 = vpop.permute.xlu0 %893  ;;  %v103_v3 = vld [vmem:[%s9486_s0 + $0x188] sm:$0xff]  ;;  %vm1045_vm9 = vcmp.eq.s32.totalorder %v7055_v30, %v7190_v20 }
  0xab   :  { %509 = vperm.xlu0 %6116, %v74_v4   ;;  %vm1044_vm8 = vcmp.eq.s32.totalorder %v7055_v30, %v7185_v18  ;;  %v4654_v18 = vsel %vm1045_vm9, 1.0, %v6673_v12 }
  0xac   :  { %v4653_v16 = vsel %vm1044_vm8, 1.0, %v6673_v12 }
  0xad   :  { %v7206_v26 = vpop.permute.xlu1 %902 }
  0xae   :  { %518 = vperm.xlu1 %6117, %v77_v6   ;;  %v7198_v23 = vpop.permute.xlu0 %899  ;;  %v102_v6 = vld [vmem:[%s9486_s0 + $0x180] sm:$0xff] }
  0xaf   :  { %515 = vperm.xlu0 %6116, %v76_v8  }
  0xb1   :  { %v7216_v32 = vpop.permute.xlu1 %908 }
  0xb2   :  { %524 = vperm.xlu1 %6117, %v79_v10   ;;  %v7211_v29 = vpop.permute.xlu0 %905  ;;  %vm1049_vm13 = vcmp.eq.s32.totalorder %v7055_v30, %v7216_v32 }
  0xb3   :  { %521 = vperm.xlu0 %6116, %v78_v11   ;;  %v105_v11 = vld [vmem:[%s9486_s0 + $0x198] sm:$0xff] }
  0xb5   :  { %v7232_v41 = vpop.permute.xlu1 %914 }
  0xb6   :  { %530 = vperm.xlu1 %6117, %v81_v14   ;;  %v7224_v36 = vpop.permute.xlu0 %911  ;;  %vm1051_vm15 = vcmp.eq.s32.totalorder %v7055_v30, %v7232_v41 }
  0xb7   :  { %527 = vperm.xlu0 %6116, %v80_v15   ;;  %v104_v15 = vld [vmem:[%s9486_s0 + $0x190] sm:$0xff] }
  0xb9   :  { %v7242_v48 = vpop.permute.xlu1 %920 }
  0xba   :  { %536 = vperm.xlu1 %6117, %v83_v17   ;;  %v7237_v45 = vpop.permute.xlu0 %917 }
  0xbb   :  { %533 = vperm.xlu0 %6116, %v82_v19   ;;  %vm1052_vm2 = vcmp.eq.s32.totalorder %v7055_v30, %v7237_v45 }
  0xbd   :  { %v7258_v58 = vpop.permute.xlu1 %926 }
  0xbe   :  { %542 = vperm.xlu1 %6117, %v85_v21   ;;  %v7250_v54 = vpop.permute.xlu0 %923  ;;  %vm1055_vm5 = vcmp.eq.s32.totalorder %v7055_v30, %v7258_v58 }
  0xbf   :  { %539 = vperm.xlu0 %6116, %v84_v22  }
  0xc1   :  { %v7268_v1 = vpop.permute.xlu1 %932 }
  0xc2   :  { %548 = vperm.xlu1 %6117, %v87_v24   ;;  %v7263_v62 = vpop.permute.xlu0 %929  ;;  %v107_v24 = vld [vmem:[%s9486_s0 + $0x1a8] sm:$0xff]  ;;  %vm1057_vm7 = vcmp.eq.s32.totalorder %v7055_v30, %v7268_v1 }
  0xc3   :  { %545 = vperm.xlu0 %6116, %v86_v25  }
  0xc5   :  { %v7284_v17 = vpop.permute.xlu1 %938 }
  0xc6   :  { %554 = vperm.xlu1 %6117, %v89_v28   ;;  %v7276_v10 = vpop.permute.xlu0 %935  ;;  %vm1059_vm9 = vcmp.eq.s32.totalorder %v7055_v30, %v7284_v17 }
  0xc7   :  { %551 = vperm.xlu0 %6116, %v88_v31   ;;  %v106_v31 = vld [vmem:[%s9486_s0 + $0x1a0] sm:$0xff]  ;;  %vm1058_vm8 = vcmp.eq.s32.totalorder %v7055_v30, %v7276_v10 }
  0xca   :  { %560 = vperm.xlu1 %6117, %v91_v34   ;;  %v7291_v25 = vpop.permute.xlu0 %941 }
  0xcb   :  { %557 = vperm.xlu0 %6116, %v90_v35   ;;  %v7296_v35 = vpop.permute.xlu1 %944 }
  0xce   :  { %566 = vperm.xlu1 %6117, %v93_v37   ;;  %v109_v37 = vld [vmem:[%s9486_s0 + $0x1b8] sm:$0xff] }
  0xcf   :  { %563 = vperm.xlu0 %6116, %v92_v40  }
  0xd2   :  { %572 = vperm.xlu1 %6117, %v95_v44   ;;  %v108_v44 = vld [vmem:[%s9486_s0 + $0x1b0] sm:$0xff] }
  0xd3   :  { %569 = vperm.xlu0 %6116, %v94_v47  }
  0xd6   :  { %578 = vperm.xlu1 %6117, %v97_v50  }
  0xd7   :  { %575 = vperm.xlu0 %6116, %v96_v52   ;;  %v7306_v52 = vpop.permute.xlu0 %947 }
  0xda   :  { %584 = vperm.xlu1 %6117, %v99_v55  }
  0xdb   :  { %581 = vperm.xlu0 %6116, %v98_v57   ;;  %v111_v57 = vld [vmem:[%s9486_s0 + $0x1c8] sm:$0xff] }
  0xde   :  { %590 = vperm.xlu1 %6117, %v101_v60  }
  0xdf   :  { %587 = vperm.xlu0 %6116, %v100_v0   ;;  %v110_v0 = vld [vmem:[%s9486_s0 + $0x1c0] sm:$0xff] }
  0xe0   :  { %v294_v4 = vpop.f32.mrb[0].mxu0 }
  0xe1   :  { %v296_v8 = vpop.f32.mrb[1].mxu0 }
  0xe2   :  { %596 = vperm.xlu1 %6117, %v103_v3   ;;  %v7314_v3 = vpop.permute.xlu1 %950 }
  0xe3   :  { %593 = vperm.xlu0 %6116, %v102_v6   ;;  %v113_v6 = vld [vmem:[%s9486_s0 + $0x1d8] sm:$0xff] }
  0xe4   :  { %v300_v14 = vpop.f32.mrb[2].mxu0 }
  0xe5   :  { %v7286_v19 = vpack.c.bf16 %v300_v14, %v294_v4  ;;  %v302_v21 = vpop.f32.mrb[3].mxu0  ;;  %v112_v14 = vld [vmem:[%s9486_s0 + $0x1d0] sm:$0xff] }
  0xe6   :  { %v5873_v22 = vpack.c.bf16 %v302_v21, %v296_v8  ;;  %602 = vperm.xlu1 %6117, %v105_v11   ;;  %v7319_v8 = vpop.permute.xlu0 %953 }
  0xe7   :  { %599 = vperm.xlu0 %6116, %v104_v15  }
  0xe8   :  { %v306_v28 = vpop.f32.mrb[4].mxu0  ;;  %5874 = vmatprep.subr.bf16.mxu1 %v5873_v22 }
  0xe9   :  { %v308_v34 = vpop.f32.mrb[5].mxu0  ;;  %5876 = vmatpush3.bf16.msra.mxu1 %v5873_v22 }
  0xea   :  { %608 = vperm.xlu1 %6117, %v107_v24   ;;  %v7326_v24 = vpop.permute.xlu1 %956 }
  0xeb   :  { %605 = vperm.xlu0 %6116, %v106_v31  }
  0xec   :  { %v312_v40 = vpop.f32.mrb[6].mxu0 }
  0xed   :  { %v7304_v47 = vpack.c.bf16 %v312_v40, %v306_v28  ;;  %v314_v50 = vpop.f32.mrb[7].mxu0  ;;  %v115_v28 = vld [vmem:[%s9486_s0 + $0x1e8] sm:$0xff]  ;;  %v7334_v40 = vpop.permute.xlu0 %959 }
  0xee   :  { %v5877_v55 = vpack.c.bf16 %v314_v50, %v308_v34  ;;  %614 = vperm.xlu1 %6117, %v109_v37   ;;  %v114_v34 = vld [vmem:[%s9486_s0 + $0x1e0] sm:$0xff] }
  0xef   :  { %611 = vperm.xlu0 %6116, %v108_v44   ;;  %v117_v44 = vld [vmem:[%s9486_s0 + $0x1f8] sm:$0xff] }
  0xf0   :  { %v318_v60 = vpop.f32.mrb[8].mxu0  ;;  %5878 = vmatprep.subr.bf16.mxu1 %v5877_v55 }
  0xf1   :  { %v320_v4 = vpop.f32.mrb[9].mxu0  ;;  %5880 = vmatpush3.bf16.msra.mxu1 %v5877_v55  ;;  %v116_v55 = vld [vmem:[%s9486_s0 + $0x1f0] sm:$0xff] }
  0xf2   :  { %620 = vperm.xlu1 %6117, %v111_v57   ;;  %v7342_v57 = vpop.permute.xlu1 %962 }
  0xf3   :  { %617 = vperm.xlu0 %6116, %v110_v0  }
  0xf4   :  { %v324_v11 = vpop.f32.mrb[10].mxu0 }
  0xf5   :  { %v7324_v15 = vpack.c.bf16 %v324_v11, %v318_v60  ;;  %v326_v21 = vpop.f32.mrb[11].mxu0  ;;  %v7351_v11 = vpop.permute.xlu0 %965 }
  0xf6   :  { %v5881_v22 = vpack.c.bf16 %v326_v21, %v320_v4  ;;  %626 = vperm.xlu1 %6117, %v113_v6   ;;  %v184_v6 = vld [vmem:[%s9487_s4 + $0x8] sm:$0xff]  ;;  %v4635_v21 = vsel %vm1026_vm3, 1.0, %v6673_v12  ;;  %vm1039_vm3 = vcmp.eq.s32.totalorder %v7055_v30, %v7154_v5  ;;  %v7562_v10 = vpop.f32.mrb[0].mxu1 }
  0xf7   :  { %623 = vperm.xlu0 %6116, %v112_v14   ;;  %v183_v14 = vld [vmem:[%s9487_s4] sm:$0xff]  ;;  %v4648_v2 = vsel %vm1039_vm3, 1.0, %v6673_v12  ;;  %vm1053_vm3 = vcmp.eq.s32.totalorder %v7055_v30, %v7242_v48  ;;  %v4664_v48 = vsel %vm1055_vm5, 1.0, %v6673_v12 }
  0xf8   :  { %v330_v31 = vpop.f32.mrb[12].mxu0  ;;  %5882 = vmatprep.subr.bf16.mxu1 %v5881_v22  ;;  %v4662_v45 = vsel %vm1053_vm3, 1.0, %v6673_v12  ;;  %vm1067_vm3 = vcmp.eq.s32.totalorder %v7055_v30, %v7342_v57 }
  0xf9   :  { %v332_v37 = vpop.f32.mrb[13].mxu0  ;;  %5884 = vmatpush3.bf16.msra.mxu1 %v5881_v22  ;;  %v7359_v22 = vpop.permute.xlu1 %968 }
  0xfa   :  { %632 = vperm.xlu1 %6117, %v115_v28   ;;  %v185_v28 = vld [vmem:[%s9487_s4 + $0x10] sm:$0xff]  ;;  %vm1069_vm5 = vcmp.eq.s32.totalorder %v7055_v30, %v7359_v22 }
  0xfb   :  { %629 = vperm.xlu0 %6116, %v114_v34   ;;  %v188_v34 = vld [vmem:[%s9487_s4 + $0x28] sm:$0xff] }
  0xfc   :  { %v336_v50 = vpop.f32.mrb[14].mxu0 }
  0xfd   :  { %v5901_v60 = vpack.c.bf16 %v336_v50, %v330_v31  ;;  %v338_v0 = vpop.f32.mrb[15].mxu0  ;;  %v7374_v31 = vpop.permute.xlu0 %971 }
  0xfe   :  { %v5885_v4 = vpack.c.bf16 %v338_v0, %v332_v37  ;;  %638 = vperm.xlu1 %6117, %v117_v44   ;;  %v7390_v37 = vpop.permute.xlu1 %974  ;;  %v190_v44 = vld [vmem:[%s9487_s4 + $0x38] sm:$0xff]  ;;  %v4641_v0 = vsel %vm1032_vm10, 1.0, %v6673_v12  ;;  %vm1046_vm10 = vcmp.eq.s32.totalorder %v7055_v30, %v7198_v23 }
  0xff   :  { %635 = vperm.xlu0 %6116, %v116_v55  }
 0x100   :  { %5886 = vmatprep.subr.bf16.mxu1 %v5885_v4 }
 0x101   :  { %5888 = vmatpush3.bf16.msra.mxu1 %v5885_v4  ;;  %v7402_v50 = vpop.permute.xlu0 %977  ;;  %v4643_v4 = vsel %vm1034_vm12, 1.0, %v6673_v12  ;;  %vm1048_vm12 = vcmp.eq.s32.totalorder %v7055_v30, %v7211_v29 }
 0x102   :  { %5890 = vmatprep.subr.bf16.mxu1 %v7286_v19  ;;  %4432 = vperm.xlu1 %6117, %v184_v6   ;;  %v7413_v55 = vpop.permute.xlu1 %980 }
 0x103   :  { %4427 = vperm.xlu0 %6116, %v183_v14  }
 0x104   :  { %5458 = vmatmul.mubr.msk.f32.vlgmr.msra.gmra.mrb[8].mxu1 %vm1216_vm1, %v4634_v33  ;;  %v4651_v33 = vsel %vm1042_vm6, 1.0, %v6673_v12  ;;  %vm1056_vm6 = vcmp.eq.s32.totalorder %v7055_v30, %v7263_v62  ;;  %v4666_v62 = vsel %vm1057_vm7, 1.0, %v6673_v12  ;;  %vm1071_vm7 = vcmp.eq.s32.totalorder %v7055_v30, %v7390_v37 }
 0x105   :  { %5460 = vmatprep.mubr.msk.f32.mxu1 %vm1216_vm1, %v4635_v21  ;;  %5892 = vmatpush3.bf16.msra.mxu1 %v7286_v19  ;;  %v187_v19 = vld [vmem:[%s9487_s4 + $0x20] sm:$0xff]  ;;  %v7422_v51 = vpop.permute.xlu0 %983  ;;  %v4649_v21 = vsel %vm1040_vm4, 1.0, %v6673_v12  ;;  %vm1054_vm4 = vcmp.eq.s32.totalorder %v7055_v30, %v7250_v54  ;;  %v4665_v58 = vsel %vm1056_vm6, 1.0, %v6673_v12  ;;  %vm1070_vm6 = vcmp.eq.s32.totalorder %v7055_v30, %v7374_v31 }
 0x106   :  { %5894 = vmatprep.subr.bf16.mxu1 %v7304_v47  ;;  %4442 = vperm.xlu1 %6117, %v186_v39   ;;  %v7431_v53 = vpop.permute.xlu1 %986  ;;  %v4680_v31 = vsel %vm1071_vm7, 1.0, %v6673_v12 }
 0x107   :  { %4437 = vperm.xlu0 %6116, %v185_v28  }
 0x108   :  { %5461 = vmatmul.mubr.msk.f32.gmra.mrb[10].mxu1 %vm1216_vm1, %v4636_v38  ;;  %v4655_v38 = vsel %vm1046_vm10, 1.0, %v6673_v12  ;;  %vm1060_vm10 = vcmp.eq.s32.totalorder %v7055_v30, %v7291_v25 }
 0x109   :  { %5463 = vmatprep.mubr.msk.f32.mxu1 %vm1216_vm1, %v4637_v42  ;;  %5896 = vmatpush3.bf16.msra.mxu1 %v7304_v47  ;;  %v189_v47 = vld [vmem:[%s9487_s4 + $0x30] sm:$0xff]  ;;  %v7438_v6 = vpop.permute.xlu0 %989  ;;  %v4669_v17 = vsel %vm1060_vm10, 1.0, %v6673_v12  ;;  %vm1074_vm10 = vcmp.eq.s32.totalorder %v7055_v30, %v7422_v51 }
 0x10a   :  { %5898 = vmatprep.subr.bf16.mxu1 %v7324_v15  ;;  %4452 = vperm.xlu1 %6117, %v188_v34   ;;  %v7445_v61 = vpop.permute.xlu1 %992  ;;  %v4657_v34 = vsel %vm1048_vm12, 1.0, %v6673_v12  ;;  %vm1062_vm12 = vcmp.eq.s32.totalorder %v7055_v30, %v7306_v52 }
 0x10b   :  { %4447 = vperm.xlu0 %6116, %v187_v19  }
 0x10c   :  { %5464 = vmatmul.mubr.msk.f32.gmra.mrb[12].mxu1 %vm1216_vm1, %v4638_v43  ;;  %v4661_v43 = vsel %vm1052_vm2, 1.0, %v6673_v12  ;;  %vm1066_vm2 = vcmp.eq.s32.totalorder %v7055_v30, %v7334_v40  ;;  %v4676_v40 = vsel %vm1067_vm3, 1.0, %v6673_v12 }
 0x10d   :  { %5466 = vmatprep.mubr.msk.f32.mxu1 %vm1216_vm1, %v4639_v46  ;;  %5900 = vmatpush3.bf16.msra.mxu1 %v7324_v15  ;;  %v4642_v15 = vsel %vm1033_vm11, 1.0, %v6673_v12  ;;  %v7454_v14 = vpop.permute.xlu0 %995  ;;  %vm1047_vm11 = vcmp.eq.s32.totalorder %v7055_v30, %v7206_v26  ;;  %v4658_v26 = vsel %vm1049_vm13, 1.0, %v6673_v12  ;;  %vm1063_vm13 = vcmp.eq.s32.totalorder %v7055_v30, %v7314_v3 }
 0x10e   :  { %5902 = vmatprep.subr.bf16.mxu1 %v5901_v60  ;;  %4462 = vperm.xlu1 %6117, %v190_v44   ;;  %v7463_v5 = vpop.permute.xlu1 %998  ;;  %v4656_v23 = vsel %vm1047_vm11, 1.0, %v6673_v12  ;;  %v4663_v44 = vsel %vm1054_vm4, 1.0, %v6673_v12  ;;  %vm1061_vm11 = vcmp.eq.s32.totalorder %v7055_v30, %v7296_v35  ;;  %v4671_v35 = vsel %vm1062_vm12, 1.0, %v6673_v12 }
 0x10f   :  { %4457 = vperm.xlu0 %6116, %v189_v47   ;;  %vm1068_vm4 = vcmp.eq.s32.totalorder %v7055_v30, %v7351_v11  ;;  %v4678_v11 = vsel %vm1069_vm5, 1.0, %v6673_v12  ;;  %vm1076_vm12 = vcmp.eq.s32.totalorder %v7055_v30, %v7438_v6 }
 0x110   :  { %5467 = vmatmul.mubr.msk.f32.gmra.mrb[14].mxu1 %vm1216_vm1, %v4640_v49  ;;  %v4667_v49 = vsel %vm1058_vm8, 1.0, %v6673_v12  ;;  %v4677_v57 = vsel %vm1068_vm4, 1.0, %v6673_v12  ;;  %vm1072_vm8 = vcmp.eq.s32.totalorder %v7055_v30, %v7402_v50 }
 0x111   :  { %5469 = vmatprep.mubr.msk.f32.mxu1 %vm1216_vm1, %v4641_v0  ;;  %5904 = vmatpush3.bf16.msra.mxu1 %v5901_v60  ;;  %v4645_v60 = vsel %vm1036_vm14, 1.0, %v6673_v12  ;;  %v7470_v39 = vpop.permute.xlu0 %1001  ;;  %vm1050_vm14 = vcmp.eq.s32.totalorder %v7055_v30, %v7224_v36  ;;  %v4660_v36 = vsel %vm1051_vm15, 1.0, %v6673_v12  ;;  %v7564_v0 = vpop.f32.mrb[1].mxu1  ;;  %vm1065_vm15 = vcmp.eq.s32.totalorder %v7055_v30, %v7326_v24 }
 0x112   :  { %v7477_v13 = vpop.permute.xlu1 %1004  ;;  %v4659_v32 = vsel %vm1050_vm14, 1.0, %v6673_v12  ;;  %v7576_v25 = vpop.f32.mrb[2].mxu1  ;;  %vm1064_vm14 = vcmp.eq.s32.totalorder %v7055_v30, %v7319_v8  ;;  %v4675_v24 = vsel %vm1066_vm2, 1.0, %v6673_v12  ;;  %vm1080_vm2 = vcmp.eq.s32.totalorder %v7055_v30, %v7470_v39 }
 0x113   :  { %v4673_v3 = vsel %vm1064_vm14, 1.0, %v6673_v12  ;;  %vm1078_vm14 = vcmp.eq.s32.totalorder %v7055_v30, %v7454_v14  ;;  %vm1081_vm3 = vcmp.eq.s32.totalorder %v7055_v30, %v7477_v13 }
 0x114   :  { %5470 = vmatmul.mubr.msk.f32.gmra.mrb[16].mxu1 %vm1216_vm1, %v4642_v15  ;;  %v4668_v15 = vsel %vm1059_vm9, 1.0, %v6673_v12  ;;  %vm1073_vm9 = vcmp.eq.s32.totalorder %v7055_v30, %v7413_v55  ;;  %v4683_v55 = vsel %vm1074_vm10, 1.0, %v6673_v12  ;;  %v4690_v39 = vsel %vm1081_vm3, 1.0, %v6673_v12 }
 0x115   :  { %5472 = vmatprep.mubr.msk.f32.mxu1 %vm1216_vm1, %v4643_v4  ;;  %v7486_v28 = vpop.permute.xlu0 %1007  ;;  %v4682_v37 = vsel %vm1073_vm9, 1.0, %v6673_v12 }
 0x116   :  { %v7495_v20 = vpop.permute.xlu1 %1010  ;;  %vm1082_vm4 = vcmp.eq.s32.totalorder %v7055_v30, %v7486_v28 }
 0x117   :  { %vm1083_vm5 = vcmp.eq.s32.totalorder %v7055_v30, %v7495_v20 }
 0x118   :  { %5473 = vmatmul.mubr.msk.f32.gmra.mrb[18].mxu1 %vm1216_vm1, %v4644_v56  ;;  %v7578_v56 = vpop.f32.mrb[3].mxu1  ;;  %v4692_v28 = vsel %vm1083_vm5, 1.0, %v6673_v12 }
 0x119   :  { %5475 = vmatprep.mubr.msk.f32.mxu1 %vm1216_vm1, %v4645_v60  ;;  %v7502_v42 = vpop.permute.xlu0 %1013  ;;  %v4670_v60 = vsel %vm1061_vm11, 1.0, %v6673_v12  ;;  %v7590_v52 = vpop.f32.mrb[4].mxu1  ;;  %vm1075_vm11 = vcmp.eq.s32.totalorder %v7055_v30, %v7431_v53 }
 0x11a   :  { %v7509_v29 = vpop.permute.xlu1 %1016  ;;  %9500 = vst [vmem:[#allocation2_spill] sm:$0xff] %v7590_v52  ;;  %v4684_v51 = vsel %vm1075_vm11, 1.0, %v6673_v12 }
 0x11b   :  { %vm1085_vm7 = vcmp.eq.s32.totalorder %v7055_v30, %v7509_v29 }
 0x11c   :  { %5476 = vmatmul.mubr.msk.f32.gmra.mrb[20].mxu1 %vm1216_vm1, %v4646_v59  ;;  %v4694_v20 = vsel %vm1085_vm7, 1.0, %v6673_v12 }
 0x11d   :  { %5478 = vmatprep.mubr.msk.f32.mxu1 %vm1216_vm1, %v4647_v63  ;;  %v7518_v19 = vpop.permute.xlu0 %1019 }
 0x11e   :  { %v7527_v41 = vpop.permute.xlu1 %1022 }
 0x11f   :  { %vm1087_vm9 = vcmp.eq.s32.totalorder %v7055_v30, %v7527_v41 }
 0x120   :  { %5479 = vmatmul.mubr.msk.f32.gmra.mrb[22].mxu1 %vm1216_vm1, %v4648_v2  ;;  %v7594_v2 = vpop.f32.mrb[5].mxu1 }
 0x121   :  { %5481 = vmatprep.mubr.msk.f32.mxu1 %vm1216_vm1, %v4649_v21  ;;  %v7534_v46 = vpop.permute.xlu0 %449  ;;  %9501 = vst [vmem:[#allocation3_spill] sm:$0xff] %v7594_v2  ;;  %v4672_v21 = vsel %vm1063_vm13, 1.0, %v6673_v12  ;;  %vm1077_vm13 = vcmp.eq.s32.totalorder %v7055_v30, %v7445_v61 }
 0x122   :  { %v7541_v54 = vpop.permute.xlu1 %452  ;;  %v4686_v6 = vsel %vm1077_vm13, 1.0, %v6673_v12  ;;  %vm640_vm10 = vcmp.eq.s32.totalorder %v7055_v30, %v7534_v46 }
 0x123   :  { %vm641_vm11 = vcmp.eq.s32.totalorder %v7055_v30, %v7541_v54 }
 0x124   :  { %5482 = vmatmul.mubr.msk.f32.gmra.mrb[24].mxu1 %vm1216_vm1, %v4650_v7  ;;  %v7606_v7 = vpop.f32.mrb[6].mxu1  ;;  %v4570_v46 = vsel %vm641_vm11, 1.0, %v6673_v12 }
 0x125   :  { %5484 = vmatprep.mubr.msk.f32.mxu1 %vm1216_vm1, %v4651_v33  ;;  %v7550_v47 = vpop.permute.xlu0 %455  ;;  %9502 = vst [vmem:[#allocation4_spill] sm:$0xff] %v7606_v7  ;;  %v7608_v33 = vpop.f32.mrb[7].mxu1 }
 0x126   :  { %v7559_v1 = vpop.permute.xlu1 %458  ;;  %9503 = vst [vmem:[#allocation5_spill] sm:$0xff] %v7608_v33 }
 0x127   :  { %vm643_vm13 = vcmp.eq.s32.totalorder %v7055_v30, %v7559_v1 }
 0x128   :  { %5485 = vmatmul.mubr.msk.f32.gmra.mrb[26].mxu1 %vm1216_vm1, %v4652_v9  ;;  %v4674_v9 = vsel %vm1065_vm15, 1.0, %v6673_v12  ;;  %vm1079_vm15 = vcmp.eq.s32.totalorder %v7055_v30, %v7463_v5  ;;  %v4689_v5 = vsel %vm1080_vm2, 1.0, %v6673_v12  ;;  %v4572_v54 = vsel %vm643_vm13, 1.0, %v6673_v12 }
 0x129   :  { %5487 = vmatprep.mubr.msk.f32.mxu1 %vm1216_vm1, %v4653_v16  ;;  %v7570_v4 = vpop.permute.xlu0 %461  ;;  %v4688_v61 = vsel %vm1079_vm15, 1.0, %v6673_v12 }
 0x12a   :  { %v7581_v59 = vpop.permute.xlu1 %464 }
 0x12b   :  { %vm645_vm15 = vcmp.eq.s32.totalorder %v7055_v30, %v7581_v59 }
 0x12c   :  { %5488 = vmatmul.mubr.msk.f32.gmra.mrb[28].mxu1 %vm1216_vm1, %v4654_v18 }
 0x12d   :  { %5490 = vmatprep.mubr.msk.f32.mxu1 %vm1216_vm1, %v4655_v38  ;;  %v7592_v63 = vpop.permute.xlu0 %467 }
 0x12e   :  { %v7603_v8 = vpop.permute.xlu1 %470  ;;  %vm646_vm2 = vcmp.eq.s32.totalorder %v7055_v30, %v7592_v63 }
 0x12f   :  { %vm647_vm3 = vcmp.eq.s32.totalorder %v7055_v30, %v7603_v8 }
 0x130   :  { %5491 = vmatmul.mubr.msk.f32.gmra.mrb[30].mxu1 %vm1216_vm1, %v4656_v23  ;;  %v4679_v23 = vsel %vm1070_vm6, 1.0, %v6673_v12  ;;  %vm1084_vm6 = vcmp.eq.s32.totalorder %v7055_v30, %v7502_v42  ;;  %v4576_v63 = vsel %vm647_vm3, 1.0, %v6673_v12 }
 0x131   :  { %5493 = vmatprep.mubr.msk.f32.mxu1 %vm1216_vm1, %v4657_v34  ;;  %v7614_v16 = vpop.permute.xlu0 %473  ;;  %v4681_v34 = vsel %vm1072_vm8, 1.0, %v6673_v12  ;;  %vm1086_vm8 = vcmp.eq.s32.totalorder %v7055_v30, %v7518_v19  ;;  %v4696_v19 = vsel %vm1087_vm9, 1.0, %v6673_v12 }
 0x132   :  { %v7621_v18 = vpop.permute.xlu1 %476  ;;  %v4695_v29 = vsel %vm1086_vm8, 1.0, %v6673_v12 }
 0x133   :  { %vm649_vm5 = vcmp.eq.s32.totalorder %v7055_v30, %v7621_v18 }
 0x134   :  { %5494 = vmatmul.mubr.msk.f32.gmra.mrb[32].mxu1 %vm1216_vm1, %v4658_v26  ;;  %v4578_v8 = vsel %vm649_vm5, 1.0, %v6673_v12 }
 0x135   :  { %5496 = vmatprep.mubr.msk.f32.mxu1 %vm1216_vm1, %v4659_v32  ;;  %v7630_v38 = vpop.permute.xlu0 %479 }
 0x136   :  { %v7639_v22 = vpop.permute.xlu1 %482 }
 0x137   :  { %vm651_vm7 = vcmp.eq.s32.totalorder %v7055_v30, %v7639_v22 }
 0x138   :  { %5497 = vmatmul.mubr.msk.f32.gmra.mrb[34].mxu1 %vm1216_vm1, %v4660_v36  ;;  %v4685_v36 = vsel %vm1076_vm12, 1.0, %v6673_v12  ;;  %vm642_vm12 = vcmp.eq.s32.totalorder %v7055_v30, %v7550_v47  ;;  %v4580_v18 = vsel %vm651_vm7, 1.0, %v6673_v12 }
 0x139   :  { %5499 = vmatprep.mubr.msk.f32.mxu1 %vm1216_vm1, %v4661_v43  ;;  %v7646_v26 = vpop.permute.xlu0 %485  ;;  %v4687_v43 = vsel %vm1078_vm14, 1.0, %v6673_v12  ;;  %vm644_vm14 = vcmp.eq.s32.totalorder %v7055_v30, %v7570_v4  ;;  %v4574_v4 = vsel %vm645_vm15, 1.0, %v6673_v12 }
 0x13a   :  { %v7653_v50 = vpop.permute.xlu1 %488  ;;  %v4573_v1 = vsel %vm644_vm14, 1.0, %v6673_v12  ;;  %vm652_vm8 = vcmp.eq.s32.totalorder %v7055_v30, %v7646_v26 }
 0x13b   :  { %vm653_vm9 = vcmp.eq.s32.totalorder %v7055_v30, %v7653_v50 }
 0x13c   :  { %5500 = vmatmul.mubr.msk.f32.gmra.mrb[36].mxu1 %vm1216_vm1, %v4662_v45 }
 0x13d   :  { %5502 = vmatprep.mubr.msk.f32.mxu1 %vm1216_vm1, %v4663_v44  ;;  %v7662_v32 = vpop.permute.xlu0 %491 }
 0x13e   :  { %v7671_v53 = vpop.permute.xlu1 %494 }
 0x13f   :  { %vm655_vm11 = vcmp.eq.s32.totalorder %v7055_v30, %v7671_v53 }
 0x140   :  { %5503 = vmatmul.mubr.msk.f32.gmra.mrb[38].mxu1 %vm1216_vm1, %v4664_v48  ;;  %v4691_v48 = vsel %vm1082_vm4, 1.0, %v6673_v12  ;;  %vm648_vm4 = vcmp.eq.s32.totalorder %v7055_v30, %v7614_v16 }
 0x141   :  { %5505 = vmatprep.mubr.msk.f32.mxu1 %vm1216_vm1, %v4665_v58  ;;  %v7678_v45 = vpop.permute.xlu0 %497  ;;  %v4693_v58 = vsel %vm1084_vm6, 1.0, %v6673_v12  ;;  %vm650_vm6 = vcmp.eq.s32.totalorder %v7055_v30, %v7630_v38 }
 0x142   :  { %v7685_v14 = vpop.permute.xlu1 %500  ;;  %v4579_v16 = vsel %vm650_vm6, 1.0, %v6673_v12 }
 0x143   :  { %vm657_vm13 = vcmp.eq.s32.totalorder %v7055_v30, %v7685_v14 }
 0x144   :  { %5506 = vmatmul.mubr.msk.f32.gmra.mrb[40].mxu1 %vm1216_vm1, %v4666_v62  ;;  %v4586_v50 = vsel %vm657_vm13, 1.0, %v6673_v12 }
 0x145   :  { %5508 = vmatprep.mubr.msk.f32.mxu1 %vm1216_vm1, %v4667_v49  ;;  %v7694_v44 = vpop.permute.xlu0 %503 }
 0x146   :  { %v7703_v13 = vpop.permute.xlu1 %506  ;;  %vm658_vm14 = vcmp.eq.s32.totalorder %v7055_v30, %v7694_v44 }
 0x147   :  { %vm659_vm15 = vcmp.eq.s32.totalorder %v7055_v30, %v7703_v13 }
 0x148   :  { %5509 = vmatmul.mubr.msk.f32.gmra.mrb[42].mxu1 %vm1216_vm1, %v4668_v15  ;;  %v4569_v15 = vsel %vm640_vm10, 1.0, %v6673_v12  ;;  %vm654_vm10 = vcmp.eq.s32.totalorder %v7055_v30, %v7662_v32 }
 0x149   :  { %5511 = vmatprep.mubr.msk.f32.mxu1 %vm1216_vm1, %v4669_v17  ;;  %v7710_v62 = vpop.permute.xlu0 %509  ;;  %v4571_v17 = vsel %vm642_vm12, 1.0, %v6673_v12  ;;  %vm656_vm12 = vcmp.eq.s32.totalorder %v7055_v30, %v7678_v45 }
 0x14a   :  { %v7717_v42 = vpop.permute.xlu1 %512  ;;  %v4585_v26 = vsel %vm656_vm12, 1.0, %v6673_v12 }
 0x14b   :  { %vm661_vm3 = vcmp.eq.s32.totalorder %v7055_v30, %v7717_v42 }
 0x14c   :  { %5512 = vmatmul.mubr.msk.f32.gmra.mrb[44].mxu1 %vm1216_vm1, %v4670_v60 }
 0x14d   :  { %5514 = vmatprep.mubr.msk.f32.mxu1 %vm1216_vm1, %v4671_v35  ;;  %v7726_v49 = vpop.permute.xlu0 %515 }
 0x14e   :  { %v7735_v41 = vpop.permute.xlu1 %518 }
 0x14f   :  { %vm663_vm5 = vcmp.eq.s32.totalorder %v7055_v30, %v7735_v41 }
 0x150   :  { %5515 = vmatmul.mubr.msk.f32.gmra.mrb[46].mxu1 %vm1216_vm1, %v4672_v21  ;;  %v4575_v21 = vsel %vm646_vm2, 1.0, %v6673_v12  ;;  %vm660_vm2 = vcmp.eq.s32.totalorder %v7055_v30, %v7710_v62  ;;  %v4592_v14 = vsel %vm663_vm5, 1.0, %v6673_v12 }
 0x151   :  { %5517 = vmatprep.mubr.msk.f32.mxu1 %vm1216_vm1, %v4673_v3  ;;  %v7742_v60 = vpop.permute.xlu0 %521  ;;  %v4577_v3 = vsel %vm648_vm4, 1.0, %v6673_v12  ;;  %vm662_vm4 = vcmp.eq.s32.totalorder %v7055_v30, %v7726_v49 }
 0x152   :  { %v7749_v47 = vpop.permute.xlu1 %524  ;;  %v4591_v45 = vsel %vm662_vm4, 1.0, %v6673_v12  ;;  %vm664_vm6 = vcmp.eq.s32.totalorder %v7055_v30, %v7742_v60 }
 0x153   :  { %vm665_vm7 = vcmp.eq.s32.totalorder %v7055_v30, %v7749_v47 }
 0x154   :  { %5518 = vmatmul.mubr.msk.f32.gmra.mrb[48].mxu1 %vm1216_vm1, %v4674_v9 }
 0x155   :  { %5520 = vmatprep.mubr.msk.f32.mxu1 %vm1216_vm1, %v4675_v24  ;;  %v7758_v35 = vpop.permute.xlu0 %527 }
 0x156   :  { %v7767_v59 = vpop.permute.xlu1 %530 }
 0x158   :  { %5521 = vmatmul.mubr.msk.f32.gmra.mrb[50].mxu1 %vm1216_vm1, %v4676_v40 }
 0x159   :  { %5523 = vmatprep.mubr.msk.f32.mxu1 %vm1216_vm1, %v4677_v57  ;;  %v7774_v9 = vpop.permute.xlu0 %533  ;;  %v4581_v57 = vsel %vm652_vm8, 1.0, %v6673_v12  ;;  %vm666_vm8 = vcmp.eq.s32.totalorder %v7055_v30, %v7758_v35 }
 0x15a   :  { %v7781_v24 = vpop.permute.xlu1 %536 }
 0x15c   :  { %5524 = vmatmul.mubr.msk.f32.gmra.mrb[52].mxu1 %vm1216_vm1, %v4678_v11  ;;  %v4582_v11 = vsel %vm653_vm9, 1.0, %v6673_v12  ;;  %vm667_vm9 = vcmp.eq.s32.totalorder %v7055_v30, %v7767_v59 }
 0x15d   :  { %5526 = vmatprep.mubr.msk.f32.mxu1 %vm1216_vm1, %v4679_v23  ;;  %v7790_v40 = vpop.permute.xlu0 %539  ;;  %v4583_v23 = vsel %vm654_vm10, 1.0, %v6673_v12  ;;  %vm668_vm10 = vcmp.eq.s32.totalorder %v7055_v30, %v7774_v9 }
 0x15e   :  { %v7799_v38 = vpop.permute.xlu1 %542  ;;  %v4597_v62 = vsel %vm668_vm10, 1.0, %v6673_v12  ;;  %vm670_vm12 = vcmp.eq.s32.totalorder %v7055_v30, %v7790_v40 }
 0x15f   :  { %vm671_vm13 = vcmp.eq.s32.totalorder %v7055_v30, %v7799_v38 }
 0x160   :  { %5527 = vmatmul.mubr.msk.f32.gmra.mrb[54].mxu1 %vm1216_vm1, %v4680_v31  ;;  %v4584_v31 = vsel %vm655_vm11, 1.0, %v6673_v12  ;;  %vm669_vm11 = vcmp.eq.s32.totalorder %v7055_v30, %v7781_v24 }
 0x161   :  { %5529 = vmatprep.mubr.msk.f32.mxu1 %vm1216_vm1, %v4681_v34  ;;  %v7806_v22 = vpop.permute.xlu0 %545  ;;  %v4598_v42 = vsel %vm669_vm11, 1.0, %v6673_v12 }
 0x162   :  { %v7813_v34 = vpop.permute.xlu1 %548 }
 0x164   :  { %5530 = vmatmul.mubr.msk.f32.gmra.mrb[56].mxu1 %vm1216_vm1, %v4682_v37 }
 0x165   :  { %5532 = vmatprep.mubr.msk.f32.mxu1 %vm1216_vm1, %v4683_v55  ;;  %v7822_v37 = vpop.permute.xlu0 %551  ;;  %v4587_v55 = vsel %vm658_vm14, 1.0, %v6673_v12  ;;  %vm672_vm14 = vcmp.eq.s32.totalorder %v7055_v30, %v7806_v22 }
 0x166   :  { %v555_v32 = vpop.permute.xlu1 %554 }
 0x168   :  { %5533 = vmatmul.mubr.msk.f32.gmra.mrb[58].mxu1 %vm1216_vm1, %v4684_v51  ;;  %v4588_v51 = vsel %vm659_vm15, 1.0, %v6673_v12  ;;  %vm673_vm15 = vcmp.eq.s32.totalorder %v7055_v30, %v7813_v34  ;;  %v2893_v34 = vld [vmem:[%s9488_s7 + $0x18] sm:$0xff] }
 0x169   :  { %5535 = vmatprep.mubr.msk.f32.mxu1 %vm1216_vm1, %v4685_v36  ;;  %v4589_v36 = vsel %vm660_vm2, 1.0, %v6673_v12  ;;  %v558_v53 = vpop.permute.xlu0 %557  ;;  %vm674_vm2 = vcmp.eq.s32.totalorder %v7055_v30, %v7822_v37 }
 0x16a   :  { %v4603_v60 = vsel %vm674_vm2, 1.0, %v6673_v12  ;;  %vm676_vm4 = vcmp.eq.s32.totalorder %v7055_v30, %v558_v53 }
 0x16c   :  { %5536 = vmatmul.mubr.msk.f32.gmra.mrb[60].mxu1 %vm1216_vm1, %v4686_v6  ;;  %v4590_v6 = vsel %vm661_vm3, 1.0, %v6673_v12  ;;  %vm675_vm3 = vcmp.eq.s32.totalorder %v7055_v30, %v555_v32  ;;  %v2894_v32 = vld [vmem:[%s9488_s7 + $0x20] sm:$0xff] }
 0x16d   :  { %5538 = vmatprep.mubr.msk.f32.mxu1 %vm1216_vm1, %v4687_v43  ;;  %v561_v43 = vpop.permute.xlu1 %560  ;;  %v4604_v47 = vsel %vm675_vm3, 1.0, %v6673_v12 }
 0x16e   :  { %vm677_vm5 = vcmp.eq.s32.totalorder %v7055_v30, %v561_v43 }
 0x170   :  { %5539 = vmatmul.mubr.msk.f32.gmra.mrb[62].mxu1 %vm1216_vm1, %v4688_v61  ;;  %v564_v61 = vpop.permute.xlu0 %563 }
 0x171   :  { %5541 = vmatprep.mubr.msk.f32.mxu1 %vm1216_vm1, %v4689_v5  ;;  %v4593_v5 = vsel %vm664_vm6, 1.0, %v6673_v12  ;;  %v567_v44 = vpop.permute.xlu1 %566  ;;  %vm678_vm6 = vcmp.eq.s32.totalorder %v7055_v30, %v564_v61 }
 0x174   :  { %5542 = vmatmul.mubr.msk.f32.gmra.mrb[64].mxu1 %vm1216_vm1, %v4690_v39  ;;  %v4594_v39 = vsel %vm665_vm7, 1.0, %v6673_v12  ;;  %v570_v13 = vpop.permute.xlu0 %569  ;;  %vm679_vm7 = vcmp.eq.s32.totalorder %v7055_v30, %v567_v44 }
 0x175   :  { %5544 = vmatprep.mubr.msk.f32.mxu1 %vm1216_vm1, %v4691_v48  ;;  %v4595_v48 = vsel %vm666_vm8, 1.0, %v6673_v12  ;;  %vm680_vm8 = vcmp.eq.s32.totalorder %v7055_v30, %v570_v13 }
 0x176   :  { %v4609_v9 = vsel %vm680_vm8, 1.0, %v6673_v12 }
 0x178   :  { %5545 = vmatmul.mubr.msk.f32.gmra.mrb[66].mxu1 %vm1216_vm1, %v4692_v28  ;;  %v4596_v28 = vsel %vm667_vm9, 1.0, %v6673_v12 }
 0x179   :  { %5547 = vmatprep.mubr.msk.f32.mxu1 %vm1216_vm1, %v4693_v58  ;;  %v573_v58 = vpop.permute.xlu1 %572 }
 0x17a   :  { %vm681_vm9 = vcmp.eq.s32.totalorder %v7055_v30, %v573_v58  ;;  %v2898_v58 = vld [vmem:[%s9488_s7 + $0x40] sm:$0xff] }
 0x17b   :  { %v4610_v24 = vsel %vm681_vm9, 1.0, %v6673_v12 }
 0x17c   :  { %5548 = vmatmul.mubr.msk.f32.gmra.mrb[68].mxu1 %vm1216_vm1, %v4694_v20  ;;  %v576_v20 = vpop.permute.xlu0 %575 }
 0x17d   :  { %5550 = vmatprep.mubr.msk.f32.mxu1 %vm1216_vm1, %v4695_v29  ;;  %v4599_v29 = vsel %vm670_vm12, 1.0, %v6673_v12  ;;  %v579_v49 = vpop.permute.xlu1 %578  ;;  %vm682_vm10 = vcmp.eq.s32.totalorder %v7055_v30, %v576_v20 }
 0x17e   :  { %vm683_vm11 = vcmp.eq.s32.totalorder %v7055_v30, %v579_v49 }
 0x180   :  { %5551 = vmatmul.mubr.msk.f32.gmra.mrb[70].mxu1 %vm1216_vm1, %v4696_v19  ;;  %v4600_v19 = vsel %vm671_vm13, 1.0, %v6673_v12  ;;  %v582_v41 = vpop.permute.xlu0 %581 }
 0x181   :  { %5569 = vmatprep.mubr.msk.f32.mxu1 %vm1216_vm1, %v4569_v15  ;;  %v4601_v15 = vsel %vm672_vm14, 1.0, %v6673_v12  ;;  %vm684_vm12 = vcmp.eq.s32.totalorder %v7055_v30, %v582_v41 }
 0x184   :  { %5570 = vmatmul.mubr.msk.f32.vlgmr.msra.gmra.mrb[8].mxu1 %vm1216_vm1, %v4570_v46  ;;  %v4602_v46 = vsel %vm673_vm15, 1.0, %v6673_v12 }
 0x185   :  { %5572 = vmatprep.mubr.msk.f32.mxu1 %vm1216_vm1, %v4571_v17  ;;  %v585_v17 = vpop.permute.xlu1 %584 }
 0x186   :  { %vm685_vm13 = vcmp.eq.s32.totalorder %v7055_v30, %v585_v17 }
 0x187   :  { %v4614_v37 = vsel %vm685_vm13, 1.0, %v6673_v12 }
 0x188   :  { %5573 = vmatmul.mubr.msk.f32.gmra.mrb[10].mxu1 %vm1216_vm1, %v4572_v54  ;;  %v588_v54 = vpop.permute.xlu0 %587 }
 0x189   :  { %5575 = vmatprep.mubr.msk.f32.mxu1 %vm1216_vm1, %v4573_v1  ;;  %v4605_v1 = vsel %vm676_vm4, 1.0, %v6673_v12  ;;  %v591_v35 = vpop.permute.xlu1 %590  ;;  %vm686_vm14 = vcmp.eq.s32.totalorder %v7055_v30, %v588_v54  ;;  %v2902_v54 = vld [vmem:[%s9488_s7 + $0x60] sm:$0xff] }
 0x18a   :  { %vm687_vm15 = vcmp.eq.s32.totalorder %v7055_v30, %v591_v35 }
 0x18c   :  { %5576 = vmatmul.mubr.msk.f32.gmra.mrb[12].mxu1 %vm1216_vm1, %v4574_v4  ;;  %v4606_v4 = vsel %vm677_vm5, 1.0, %v6673_v12  ;;  %v594_v59 = vpop.permute.xlu0 %593 }
 0x18d   :  { %5578 = vmatprep.mubr.msk.f32.mxu1 %vm1216_vm1, %v4575_v21  ;;  %v4607_v21 = vsel %vm678_vm6, 1.0, %v6673_v12  ;;  %vm688_vm2 = vcmp.eq.s32.totalorder %v7055_v30, %v594_v59 }
 0x18e   :  { %v4617_v43 = vsel %vm688_vm2, 1.0, %v6673_v12 }
 0x190   :  { %5579 = vmatmul.mubr.msk.f32.gmra.mrb[14].mxu1 %vm1216_vm1, %v4576_v63  ;;  %v4608_v63 = vsel %vm679_vm7, 1.0, %v6673_v12 }
 0x191   :  { %5581 = vmatprep.mubr.msk.f32.mxu1 %vm1216_vm1, %v4577_v3  ;;  %v597_v3 = vpop.permute.xlu1 %596 }
 0x192   :  { %vm689_vm3 = vcmp.eq.s32.totalorder %v7055_v30, %v597_v3  ;;  %v2905_v3 = vld [vmem:[%s9488_s7 + $0x78] sm:$0xff] }
 0x193   :  { %v4618_v61 = vsel %vm689_vm3, 1.0, %v6673_v12 }
 0x194   :  { %5582 = vmatmul.mubr.msk.f32.gmra.mrb[16].mxu1 %vm1216_vm1, %v4578_v8  ;;  %v600_v8 = vpop.permute.xlu0 %599 }
 0x195   :  { %5584 = vmatprep.mubr.msk.f32.mxu1 %vm1216_vm1, %v4579_v16  ;;  %v4611_v16 = vsel %vm682_vm10, 1.0, %v6673_v12  ;;  %v603_v40 = vpop.permute.xlu1 %602  ;;  %vm690_vm4 = vcmp.eq.s32.totalorder %v7055_v30, %v600_v8 }
 0x196   :  { %vm691_vm5 = vcmp.eq.s32.totalorder %v7055_v30, %v603_v40  ;;  %v4619_v44 = vsel %vm690_vm4, 1.0, %v6673_v12 }
 0x197   :  { %v4620_v13 = vsel %vm691_vm5, 1.0, %v6673_v12 }
 0x198   :  { %5585 = vmatmul.mubr.msk.f32.gmra.mrb[18].mxu1 %vm1216_vm1, %v4580_v18  ;;  %v2890_v18 = vld [vmem:[%s9488_s7] sm:$0xff]  ;;  %v606_v22 = vpop.permute.xlu0 %605 }
 0x199   :  { %5587 = vmatprep.mubr.msk.f32.mxu1 %vm1216_vm1, %v4581_v57  ;;  %v2891_v57 = vld [vmem:[%s9488_s7 + $0x8] sm:$0xff]  ;;  %vm692_vm6 = vcmp.eq.s32.totalorder %v7055_v30, %v606_v22 }
 0x19a   :  { %v5905_v38 = vpack.c.bf16 %v2891_v57, %v2890_v18  ;;  %v4621_v20 = vsel %vm692_vm6, 1.0, %v6673_v12 }
 0x19c   :  { %5588 = vmatmul.mubr.msk.f32.gmra.mrb[20].mxu1 %vm1216_vm1, %v4582_v11  ;;  %v4612_v11 = vsel %vm683_vm11, 1.0, %v6673_v12  ;;  %5906 = vmatprep.subr.bf16.mxu0 %v5905_v38 }
 0x19d   :  { %5590 = vmatprep.mubr.msk.f32.mxu1 %vm1216_vm1, %v4583_v23  ;;  %v4613_v23 = vsel %vm684_vm12, 1.0, %v6673_v12  ;;  %5908 = vmatpush3.bf16.msra.mxu0 %v5905_v38 }
 0x1a0   :  { %5591 = vmatmul.mubr.msk.f32.gmra.mrb[22].mxu1 %vm1216_vm1, %v4584_v31  ;;  %v2892_v31 = vld [vmem:[%s9488_s7 + $0x10] sm:$0xff] }
 0x1a1   :  { %5593 = vmatprep.mubr.msk.f32.mxu1 %vm1216_vm1, %v4585_v26  ;;  %v5909_v26 = vpack.c.bf16 %v2893_v34, %v2892_v31 }
 0x1a3   :  { %5910 = vmatprep.subr.bf16.mxu0 %v5909_v26 }
 0x1a4   :  { %5594 = vmatmul.mubr.msk.f32.gmra.mrb[24].mxu1 %vm1216_vm1, %v4586_v50  ;;  %v609_v50 = vpop.permute.xlu1 %608  ;;  %5912 = vmatpush3.bf16.msra.mxu0 %v5909_v26 }
 0x1a5   :  { %5596 = vmatprep.mubr.msk.f32.mxu1 %vm1216_vm1, %v4587_v55  ;;  %v4615_v55 = vsel %vm686_vm14, 1.0, %v6673_v12  ;;  %vm693_vm7 = vcmp.eq.s32.totalorder %v7055_v30, %v609_v50 }
 0x1a6   :  { %v4622_v49 = vsel %vm693_vm7, 1.0, %v6673_v12 }
 0x1a8   :  { %5597 = vmatmul.mubr.msk.f32.gmra.mrb[26].mxu1 %vm1216_vm1, %v4588_v51  ;;  %v2895_v51 = vld [vmem:[%s9488_s7 + $0x28] sm:$0xff] }
 0x1a9   :  { %5599 = vmatprep.mubr.msk.f32.mxu1 %vm1216_vm1, %v4589_v36  ;;  %v612_v36 = vpop.permute.xlu0 %611  ;;  %v5913_v53 = vpack.c.bf16 %v2895_v51, %v2894_v32 }
 0x1aa   :  { %vm694_vm8 = vcmp.eq.s32.totalorder %v7055_v30, %v612_v36 }
 0x1ab   :  { %5914 = vmatprep.subr.bf16.mxu0 %v5913_v53  ;;  %v4623_v41 = vsel %vm694_vm8, 1.0, %v6673_v12 }
 0x1ac   :  { %5600 = vmatmul.mubr.msk.f32.gmra.mrb[28].mxu1 %vm1216_vm1, %v4590_v6  ;;  %v4616_v6 = vsel %vm687_vm15, 1.0, %v6673_v12  ;;  %5916 = vmatpush3.bf16.msra.mxu0 %v5913_v53 }
 0x1ad   :  { %5602 = vmatprep.mubr.msk.f32.mxu1 %vm1216_vm1, %v4591_v45  ;;  %v615_v45 = vpop.permute.xlu1 %614 }
 0x1ae   :  { %vm695_vm9 = vcmp.eq.s32.totalorder %v7055_v30, %v615_v45 }
 0x1b0   :  { %5603 = vmatmul.mubr.msk.f32.gmra.mrb[30].mxu1 %vm1216_vm1, %v4592_v14  ;;  %v2896_v14 = vld [vmem:[%s9488_s7 + $0x30] sm:$0xff] }
 0x1b1   :  { %5605 = vmatprep.mubr.msk.f32.mxu1 %vm1216_vm1, %v4593_v5  ;;  %v2897_v5 = vld [vmem:[%s9488_s7 + $0x38] sm:$0xff] }
 0x1b4   :  { %5606 = vmatmul.mubr.msk.f32.gmra.mrb[32].mxu1 %vm1216_vm1, %v4594_v39  ;;  %v618_v39 = vpop.permute.xlu0 %617 }
 0x1b5   :  { %5608 = vmatprep.mubr.msk.f32.mxu1 %vm1216_vm1, %v4595_v48  ;;  %v5917_v48 = vpack.c.bf16 %v2897_v5, %v2896_v14  ;;  %vm696_vm10 = vcmp.eq.s32.totalorder %v7055_v30, %v618_v39 }
 0x1b7   :  { %5918 = vmatprep.subr.bf16.mxu0 %v5917_v48 }
 0x1b8   :  { %5609 = vmatmul.mubr.msk.f32.gmra.mrb[34].mxu1 %vm1216_vm1, %v4596_v28  ;;  %v621_v28 = vpop.permute.xlu1 %620  ;;  %5920 = vmatpush3.bf16.msra.mxu0 %v5917_v48 }
 0x1b9   :  { %5611 = vmatprep.mubr.msk.f32.mxu1 %vm1216_vm1, %v4597_v62  ;;  %v2899_v62 = vld [vmem:[%s9488_s7 + $0x48] sm:$0xff]  ;;  %vm697_vm11 = vcmp.eq.s32.totalorder %v7055_v30, %v621_v28 }
 0x1bc   :  { %5612 = vmatmul.mubr.msk.f32.gmra.mrb[36].mxu1 %vm1216_vm1, %v4598_v42  ;;  %v5921_v42 = vpack.c.bf16 %v2899_v62, %v2898_v58  ;;  %v627_v17 = vpop.permute.xlu1 %626 }
 0x1bd   :  { %5614 = vmatprep.mubr.msk.f32.mxu1 %vm1216_vm1, %v4599_v29  ;;  %v624_v29 = vpop.permute.xlu0 %623  ;;  %vm699_vm13 = vcmp.eq.s32.totalorder %v7055_v30, %v627_v17 }
 0x1be   :  { %5922 = vmatprep.subr.bf16.mxu0 %v5921_v42  ;;  %vm698_vm12 = vcmp.eq.s32.totalorder %v7055_v30, %v624_v29 }
 0x1bf   :  { %5924 = vmatpush3.bf16.msra.mxu0 %v5921_v42 }
 0x1c0   :  { %5615 = vmatmul.mubr.msk.f32.gmra.mrb[38].mxu1 %vm1216_vm1, %v4600_v19  ;;  %v2900_v19 = vld [vmem:[%s9488_s7 + $0x50] sm:$0xff]  ;;  %v633_v59 = vpop.permute.xlu1 %632 }
 0x1c1   :  { %5617 = vmatprep.mubr.msk.f32.mxu1 %vm1216_vm1, %v4601_v15  ;;  %v2901_v15 = vld [vmem:[%s9488_s7 + $0x58] sm:$0xff]  ;;  %v630_v35 = vpop.permute.xlu0 %629  ;;  %vm701_vm15 = vcmp.eq.s32.totalorder %v7055_v30, %v633_v59 }
 0x1c2   :  { %vm700_vm14 = vcmp.eq.s32.totalorder %v7055_v30, %v630_v35  ;;  %v4630_v57 = vsel %vm701_vm15, 1.0, %v6673_v12 }
 0x1c3   :  { %v4629_v40 = vsel %vm700_vm14, 1.0, %v6673_v12 }
 0x1c4   :  { %5618 = vmatmul.mubr.msk.f32.gmra.mrb[40].mxu1 %vm1216_vm1, %v4602_v46  ;;  %v5925_v46 = vpack.c.bf16 %v2901_v15, %v2900_v19  ;;  %v639_v18 = vpop.permute.xlu1 %638 }
 0x1c5   :  { %5620 = vmatprep.mubr.msk.f32.mxu1 %vm1216_vm1, %v4603_v60  ;;  %v4624_v60 = vsel %vm695_vm9, 1.0, %v6673_v12  ;;  %vm703_vm3 = vcmp.eq.s32.totalorder %v7055_v30, %v639_v18 }
 0x1c6   :  { %5926 = vmatprep.subr.bf16.mxu0 %v5925_v46 }
 0x1c7   :  { %5928 = vmatpush3.bf16.msra.mxu0 %v5925_v46 }
 0x1c8   :  { %5621 = vmatmul.mubr.msk.f32.gmra.mrb[42].mxu1 %vm1216_vm1, %v4604_v47  ;;  %v2903_v47 = vld [vmem:[%s9488_s7 + $0x68] sm:$0xff] }
 0x1c9   :  { %5623 = vmatprep.mubr.msk.f32.mxu1 %vm1216_vm1, %v4605_v1  ;;  %v4625_v1 = vsel %vm696_vm10, 1.0, %v6673_v12 }
 0x1cc   :  { %5624 = vmatmul.mubr.msk.f32.gmra.mrb[44].mxu1 %vm1216_vm1, %v4606_v4  ;;  %v5929_v4 = vpack.c.bf16 %v2903_v47, %v2902_v54 }
 0x1cd   :  { %5626 = vmatprep.mubr.msk.f32.mxu1 %vm1216_vm1, %v4607_v21  ;;  %v4626_v21 = vsel %vm697_vm11, 1.0, %v6673_v12 }
 0x1ce   :  { %5930 = vmatprep.subr.bf16.mxu0 %v5929_v4 }
 0x1cf   :  { %5932 = vmatpush3.bf16.msra.mxu0 %v5929_v4 }
 0x1d0   :  { %5627 = vmatmul.mubr.msk.f32.gmra.mrb[46].mxu1 %vm1216_vm1, %v4608_v63  ;;  %v2904_v63 = vld [vmem:[%s9488_s7 + $0x70] sm:$0xff] }
 0x1d1   :  { %5629 = vmatprep.mubr.msk.f32.mxu1 %vm1216_vm1, %v4609_v9  ;;  %v4627_v9 = vsel %vm698_vm12, 1.0, %v6673_v12  ;;  %v5933_v8 = vpack.c.bf16 %v2905_v3, %v2904_v63 }
 0x1d3   :  { %5934 = vmatprep.subr.bf16.mxu0 %v5933_v8 }
 0x1d4   :  { %5630 = vmatmul.mubr.msk.f32.gmra.mrb[48].mxu1 %vm1216_vm1, %v4610_v24  ;;  %v636_v24 = vpop.permute.xlu0 %635  ;;  %5936 = vmatpush3.bf16.msra.mxu0 %v5933_v8 }
 0x1d5   :  { %5632 = vmatprep.mubr.msk.f32.mxu1 %vm1216_vm1, %v4611_v16  ;;  %v4628_v16 = vsel %vm699_vm13, 1.0, %v6673_v12  ;;  %vm702_vm2 = vcmp.eq.s32.totalorder %v7055_v30, %v636_v24 }
 0x1d6   :  { %v4631_v38 = vsel %vm702_vm2, 1.0, %v6673_v12 }
 0x1d8   :  { %5633 = vmatmul.mubr.msk.f32.gmra.mrb[50].mxu1 %vm1216_vm1, %v4612_v11  ;;  %v4632_v11 = vsel %vm703_vm3, 1.0, %v6673_v12 }
 0x1d9   :  { %5635 = vmatprep.mubr.msk.f32.mxu1 %vm1216_vm1, %v4613_v23  ;;  %v8030_v23 = vld [vmem:[%s9489_s6] ss:$0 sm:$0xff] }
 0x1dc   :  { %5636 = vmatmul.mubr.msk.f32.gmra.mrb[52].mxu1 %vm1216_vm1, %v4614_v37 }
 0x1dd   :  { %5638 = vmatprep.mubr.msk.f32.mxu1 %vm1216_vm1, %v4615_v55 }
 0x1e0   :  { %5639 = vmatmul.mubr.msk.f32.gmra.mrb[54].mxu1 %vm1216_vm1, %v4616_v6 }
 0x1e1   :  { %5641 = vmatprep.mubr.msk.f32.mxu1 %vm1216_vm1, %v4617_v43 }
 0x1e4   :  { %5642 = vmatmul.mubr.msk.f32.gmra.mrb[56].mxu1 %vm1216_vm1, %v4618_v61 }
 0x1e5   :  { %5644 = vmatprep.mubr.msk.f32.mxu1 %vm1216_vm1, %v4619_v44 }
 0x1e8   :  { %5645 = vmatmul.mubr.msk.f32.gmra.mrb[58].mxu1 %vm1216_vm1, %v4620_v13 }
 0x1e9   :  { %5647 = vmatprep.mubr.msk.f32.mxu1 %vm1216_vm1, %v4621_v20 }
 0x1ec   :  { %5648 = vmatmul.mubr.msk.f32.gmra.mrb[60].mxu1 %vm1216_vm1, %v4622_v49 }
 0x1ed   :  { %5650 = vmatprep.mubr.msk.f32.mxu1 %vm1216_vm1, %v4623_v41 }
 0x1f0   :  { %5651 = vmatmul.mubr.msk.f32.gmra.mrb[62].mxu1 %vm1216_vm1, %v4624_v60 }
 0x1f1   :  { %5653 = vmatprep.mubr.msk.f32.mxu1 %vm1216_vm1, %v4625_v1 }
 0x1f4   :  { %5654 = vmatmul.mubr.msk.f32.gmra.mrb[64].mxu1 %vm1216_vm1, %v4626_v21 }
 0x1f5   :  { %5656 = vmatprep.mubr.msk.f32.mxu1 %vm1216_vm1, %v4627_v9 }
 0x1f8   :  { %5657 = vmatmul.mubr.msk.f32.gmra.mrb[66].mxu1 %vm1216_vm1, %v4628_v16 }
 0x1f9   :  { %5659 = vmatprep.mubr.msk.f32.mxu1 %vm1216_vm1, %v4629_v40 }
 0x1fc   :  { %5660 = vmatmul.mubr.msk.f32.gmra.mrb[68].mxu1 %vm1216_vm1, %v4630_v57 }
 0x1fd   :  { %5662 = vmatprep.mubr.msk.f32.mxu1 %vm1216_vm1, %v4631_v38 }
 0x200   :  { %5663 = vmatmul.mubr.msk.f32.gmra.mrb[70].mxu1 %vm1216_vm1, %v4632_v11 }
 0x257   :  { %v5571_v22 = vpop.f32.mrb[8].mxu1 }
 0x258   :  { %v8033_v31 = vadd.f32 %v5571_v22, %v8030_v23  ;;  %v2052_v30 = vpop.f32.mrb[9].mxu1 }
 0x259   :  { %v8036_v34 = vadd.f32 %v8030_v23, %v2052_v30 }
 0x25a   :  { %v4827_v26 = vmul.f32 -1.442695, %v8033_v31 }
 0x25b   :  { %v4826_v37 = vmul.f32 -1.442695, %v8036_v34  ;;  %v5574_v12 = vpop.f32.mrb[10].mxu1 }
 0x25c   :  { %6118 = vpow2.f32 %v4827_v26  ;;  %v8041_v50 = vadd.f32 %v5574_v12, %v8030_v23  ;;  %v2062_v55 = vpop.f32.mrb[11].mxu1 }
 0x25d   :  { %6120 = vpow2.f32 %v4826_v37  ;;  %v8044_v32 = vadd.f32 %v8030_v23, %v2062_v55 }
 0x25e   :  { %v4829_v51 = vmul.f32 -1.442695, %v8041_v50 }
 0x25f   :  { %v4828_v36 = vmul.f32 -1.442695, %v8044_v32  ;;  %v5577_v53 = vpop.f32.mrb[12].mxu1 }
 0x260   :  { %6122 = vpow2.f32 %v4829_v51  ;;  %v8049_v6 = vadd.f32 %v5577_v53, %v8030_v23  ;;  %v2072_v43 = vpop.f32.mrb[13].mxu1 }
 0x261   :  { %6124 = vpow2.f32 %v4828_v36  ;;  %v8052_v45 = vadd.f32 %v8030_v23, %v2072_v43 }
 0x262   :  { %v4831_v61 = vmul.f32 -1.442695, %v8049_v6 }
 0x263   :  { %v4830_v14 = vmul.f32 -1.442695, %v8052_v45  ;;  %v5580_v5 = vpop.f32.mrb[14].mxu1 }
 0x264   :  { %6126 = vpow2.f32 %v4831_v61  ;;  %v8057_v44 = vadd.f32 %v5580_v5, %v8030_v23  ;;  %v2082_v39 = vpop.f32.mrb[15].mxu1 }
 0x265   :  { %6128 = vpow2.f32 %v4830_v14  ;;  %v8060_v48 = vadd.f32 %v8030_v23, %v2082_v39 }
 0x266   :  { %v6119_v13 = vpop.eup %6118  ;;  %v4833_v28 = vmul.f32 -1.442695, %v8057_v44 }
 0x267   :  { %v6121_v58 = vpop.eup %6120  ;;  %v2635_v62 = vadd.f32 1.0, %v6119_v13  ;;  %v4832_v20 = vmul.f32 -1.442695, %v8060_v48  ;;  %v5583_v42 = vpop.f32.mrb[16].mxu1 }
 0x268   :  { %v2634_v29 = vadd.f32 1.0, %v6121_v58  ;;  %6130 = vpow2.f32 %v4833_v28  ;;  %v8065_v49 = vadd.f32 %v5583_v42, %v8030_v23  ;;  %v2092_v19 = vpop.f32.mrb[17].mxu1 }
 0x269   :  { %6132 = vrcp.f32 %v2635_v62  ;;  %v8068_v15 = vadd.f32 %v8030_v23, %v2092_v19 }
 0x26a   :  { %v6123_v41 = vpop.eup %6122  ;;  %6134 = vrcp.f32 %v2634_v29  ;;  %v4835_v46 = vmul.f32 -1.442695, %v8065_v49 }
 0x26b   :  { %v6125_v17 = vpop.eup %6124  ;;  %v2637_v60 = vadd.f32 1.0, %v6123_v41  ;;  %6136 = vpow2.f32 %v4832_v20  ;;  %v4834_v54 = vmul.f32 -1.442695, %v8068_v15  ;;  %v5586_v47 = vpop.f32.mrb[18].mxu1 }
 0x26c   :  { %v2636_v1 = vadd.f32 1.0, %v6125_v17  ;;  %6138 = vpow2.f32 %v4835_v46  ;;  %v8073_v35 = vadd.f32 %v5586_v47, %v8030_v23  ;;  %v2102_v4 = vpop.f32.mrb[19].mxu1 }
 0x26d   :  { %6140 = vrcp.f32 %v2637_v60  ;;  %v8076_v21 = vadd.f32 %v8030_v23, %v2102_v4 }
 0x26e   :  { %v6127_v59 = vpop.eup %6126  ;;  %6142 = vrcp.f32 %v2636_v1  ;;  %v4837_v63 = vmul.f32 -1.442695, %v8073_v35 }
 0x26f   :  { %v6129_v3 = vpop.eup %6128  ;;  %v2639_v9 = vadd.f32 1.0, %v6127_v59  ;;  %6144 = vpow2.f32 %v4834_v54  ;;  %v4836_v8 = vmul.f32 -1.442695, %v8076_v21  ;;  %v5589_v24 = vpop.f32.mrb[20].mxu1 }
 0x270   :  { %v2638_v16 = vadd.f32 1.0, %v6129_v3  ;;  %6146 = vpow2.f32 %v4837_v63  ;;  %v8081_v40 = vadd.f32 %v5589_v24, %v8030_v23  ;;  %v2112_v18 = vpop.f32.mrb[21].mxu1 }
 0x271   :  { %6148 = vrcp.f32 %v2639_v9  ;;  %v8084_v57 = vadd.f32 %v8030_v23, %v2112_v18 }
 0x272   :  { %v6131_v38 = vpop.eup %6130  ;;  %6150 = vrcp.f32 %v2638_v16  ;;  %v4839_v11 = vmul.f32 -1.442695, %v8081_v40 }
 0x273   :  { %v6133_v22 = vpop.eup %6132  ;;  %v2641_v30 = vadd.f32 1.0, %v6131_v38  ;;  %6152 = vpow2.f32 %v4836_v8  ;;  %v4838_v26 = vmul.f32 -1.442695, %v8084_v57  ;;  %v5592_v37 = vpop.f32.mrb[22].mxu1 }
 0x274   :  { %v6135_v12 = vpop.eup %6134  ;;  %6154 = vpow2.f32 %v4839_v11  ;;  %v8089_v55 = vadd.f32 %v5592_v37, %v8030_v23  ;;  %v2122_v51 = vpop.f32.mrb[23].mxu1  ;;  %v2827_v14 = vmul.f32 %v6133_v22, %v8033_v31 }
 0x275   :  { %v6137_v36 = vpop.eup %6136  ;;  %v2826_v53 = vmul.f32 %v6135_v12, %v8036_v34  ;;  %v8093_v43 = vadd.f32 %v8030_v23, %v2122_v51  ;;  %6156 = vpow2.f32 %v4838_v26 }
 0x276   :  { %v6139_v61 = vpop.eup %6138  ;;  %v2640_v5 = vadd.f32 1.0, %v6137_v36  ;;  %v4841_v39 = vmul.f32 -1.442695, %v8089_v55  ;;  %6158 = vrcp.f32 %v2641_v30 }
 0x277   :  { %v6141_v13 = vpop.eup %6140  ;;  %v2643_v28 = vadd.f32 1.0, %v6139_v61  ;;  %v4840_v58 = vmul.f32 -1.442695, %v8093_v43  ;;  %v5595_v62 = vpop.f32.mrb[24].mxu1  ;;  %5697 = vmatprep.mubr.f32.mxu0 %v2826_v53 }
 0x278   :  { %v6143_v20 = vpop.eup %6142  ;;  %6160 = vrcp.f32 %v2640_v5  ;;  %v8099_v34 = vadd.f32 %v5595_v62, %v8030_v23  ;;  %v2132_v42 = vpop.f32.mrb[25].mxu1  ;;  %5698 = vmatmul.mubr.f32.vlgmr.msra.gmra.mrb[16].mxu0 %v2827_v14  ;;  %v2829_v46 = vmul.f32 %v6141_v13, %v8041_v50 }
 0x279   :  { %v6145_v29 = vpop.eup %6144  ;;  %v2828_v31 = vmul.f32 %v6143_v20, %v8044_v32  ;;  %6162 = vrcp.f32 %v2643_v28  ;;  %v8103_v19 = vadd.f32 %v8030_v23, %v2132_v42 }
 0x27a   :  { %v6147_v41 = vpop.eup %6146  ;;  %v2642_v17 = vadd.f32 1.0, %v6145_v29  ;;  %6164 = vpow2.f32 %v4841_v39  ;;  %v4843_v60 = vmul.f32 -1.442695, %v8099_v34 }
 0x27b   :  { %v6149_v54 = vpop.eup %6148  ;;  %v2645_v47 = vadd.f32 1.0, %v6147_v41  ;;  %6166 = vpow2.f32 %v4840_v58  ;;  %v4842_v1 = vmul.f32 -1.442695, %v8103_v19  ;;  %v5598_v4 = vpop.f32.mrb[26].mxu1  ;;  %5700 = vmatprep.mubr.f32.mxu0 %v2828_v31 }
 0x27c   :  { %v6151_v59 = vpop.eup %6150  ;;  %6168 = vrcp.f32 %v2642_v17  ;;  %v8109_v32 = vadd.f32 %v5598_v4, %v8030_v23  ;;  %v2142_v63 = vpop.f32.mrb[27].mxu1  ;;  %5701 = vmatmul.mubr.f32.gmra.mrb[18].mxu0 %v2829_v46  ;;  %v2831_v24 = vmul.f32 %v6149_v54, %v8049_v6 }
 0x27d   :  { %v6153_v3 = vpop.eup %6152  ;;  %v2830_v50 = vmul.f32 %v6151_v59, %v8052_v45  ;;  %6170 = vrcp.f32 %v2645_v47  ;;  %v8113_v9 = vadd.f32 %v8030_v23, %v2142_v63 }
 0x27e   :  { %v6155_v8 = vpop.eup %6154  ;;  %v2644_v16 = vadd.f32 1.0, %v6153_v3  ;;  %6172 = vpow2.f32 %v4843_v60  ;;  %v4845_v18 = vmul.f32 -1.442695, %v8109_v32 }
 0x27f   :  { %v2647_v38 = vadd.f32 1.0, %v6155_v8  ;;  %6174 = vpow2.f32 %v4842_v1  ;;  %v5601_v11 = vpop.f32.mrb[28].mxu1  ;;  %5703 = vmatprep.mubr.f32.mxu0 %v2830_v50  ;;  %v6157_v22 = vpop.eup %6156  ;;  %v4844_v30 = vmul.f32 -1.442695, %v8113_v9 }
 0x280   :  { %6176 = vrcp.f32 %v2644_v16  ;;  %v8119_v45 = vadd.f32 %v5601_v11, %v8030_v23  ;;  %v2152_v26 = vpop.f32.mrb[29].mxu1  ;;  %5704 = vmatmul.mubr.f32.gmra.mrb[20].mxu0 %v2831_v24  ;;  %v6159_v37 = vpop.eup %6158  ;;  %v2646_v6 = vadd.f32 1.0, %v6157_v22 }
 0x281   :  { %6178 = vrcp.f32 %v2647_v38  ;;  %v8122_v12 = vadd.f32 %v8030_v23, %v2152_v26  ;;  %v2833_v13 = vmul.f32 %v6159_v37, %v8057_v44 }
 0x282   :  { %v6161_v51 = vpop.eup %6160  ;;  %6180 = vpow2.f32 %v4845_v18  ;;  %v4847_v36 = vmul.f32 -1.442695, %v8119_v45 }
 0x283   :  { %v6163_v53 = vpop.eup %6162  ;;  %v2832_v61 = vmul.f32 %v6161_v51, %v8060_v48  ;;  %6182 = vrcp.f32 %v2646_v6  ;;  %v4846_v14 = vmul.f32 -1.442695, %v8122_v12  ;;  %v5604_v5 = vpop.f32.mrb[30].mxu1 }
 0x284   :  { %v6165_v39 = vpop.eup %6164  ;;  %6184 = vpow2.f32 %v4844_v30  ;;  %v8129_v28 = vadd.f32 %v5604_v5, %v8030_v23  ;;  %v2162_v58 = vpop.f32.mrb[31].mxu1  ;;  %v2835_v54 = vmul.f32 %v6163_v53, %v8065_v49 }
 0x285   :  { %v6167_v62 = vpop.eup %6166  ;;  %v2649_v20 = vadd.f32 1.0, %v6165_v39  ;;  %6186 = vpow2.f32 %v4847_v36  ;;  %5706 = vmatprep.mubr.f32.mxu0 %v2832_v61  ;;  %v8132_v42 = vadd.f32 %v8030_v23, %v2162_v58 }
 0x286   :  { %v6169_v48 = vpop.eup %6168  ;;  %v2648_v29 = vadd.f32 1.0, %v6167_v62  ;;  %6188 = vpow2.f32 %v4846_v14  ;;  %v4849_v31 = vmul.f32 -1.442695, %v8129_v28  ;;  %5707 = vmatmul.mubr.f32.gmra.mrb[22].mxu0 %v2833_v13 }
 0x287   :  { %v6171_v41 = vpop.eup %6170  ;;  %v2834_v44 = vmul.f32 %v6169_v48, %v8068_v15  ;;  %6190 = vrcp.f32 %v2649_v20  ;;  %v4848_v46 = vmul.f32 -1.442695, %v8132_v42  ;;  %v5607_v17 = vpop.f32.mrb[32].mxu1 }
 0x288   :  { %v6173_v60 = vpop.eup %6172  ;;  %6192 = vrcp.f32 %v2648_v29  ;;  %v8139_v47 = vadd.f32 %v5607_v17, %v8030_v23  ;;  %v2172_v1 = vpop.f32.mrb[33].mxu1  ;;  %v2837_v38 = vmul.f32 %v6171_v41, %v8073_v35 }
 0x289   :  { %v6175_v4 = vpop.eup %6174  ;;  %v2651_v59 = vadd.f32 1.0, %v6173_v60  ;;  %6194 = vpow2.f32 %v4849_v31  ;;  %5709 = vmatprep.mubr.f32.mxu0 %v2834_v44  ;;  %v8142_v63 = vadd.f32 %v8030_v23, %v2172_v1 }
 0x28a   :  { %v6177_v15 = vpop.eup %6176  ;;  %v2650_v3 = vadd.f32 1.0, %v6175_v4  ;;  %6196 = vpow2.f32 %v4848_v46  ;;  %v4851_v50 = vmul.f32 -1.442695, %v8139_v47  ;;  %5710 = vmatmul.mubr.f32.gmra.mrb[24].mxu0 %v2835_v54 }
 0x28b   :  { %v6179_v8 = vpop.eup %6178  ;;  %v2836_v49 = vmul.f32 %v6177_v15, %v8076_v21  ;;  %6198 = vrcp.f32 %v2651_v59  ;;  %v4850_v24 = vmul.f32 -1.442695, %v8142_v63  ;;  %v5610_v16 = vpop.f32.mrb[34].mxu1 }
 0x28c   :  { %v6181_v18 = vpop.eup %6180  ;;  %6200 = vrcp.f32 %v2650_v3  ;;  %v8149_v11 = vadd.f32 %v5610_v16, %v8030_v23  ;;  %v2182_v22 = vpop.f32.mrb[35].mxu1  ;;  %v2839_v36 = vmul.f32 %v6179_v8, %v8081_v40 }
 0x28d   :  { %v6183_v30 = vpop.eup %6182  ;;  %v2653_v26 = vadd.f32 1.0, %v6181_v18  ;;  %6202 = vpow2.f32 %v4851_v50  ;;  %5712 = vmatprep.mubr.f32.mxu0 %v2836_v49  ;;  %v8152_v37 = vadd.f32 %v8030_v23, %v2182_v22 }
 0x28e   :  { %v6185_v21 = vpop.eup %6184  ;;  %v2838_v6 = vmul.f32 %v6183_v30, %v8084_v57  ;;  %6204 = vpow2.f32 %v4850_v24  ;;  %v4853_v51 = vmul.f32 -1.442695, %v8149_v11  ;;  %5713 = vmatmul.mubr.f32.gmra.mrb[26].mxu0 %v2837_v38 }
 0x28f   :  { %v6187_v35 = vpop.eup %6186  ;;  %6206 = vrcp.f32 %v2653_v26  ;;  %v2652_v53 = vadd.f32 1.0, %v6185_v21  ;;  %v5613_v61 = vpop.f32.mrb[36].mxu1  ;;  %v4852_v39 = vmul.f32 -1.442695, %v8152_v37 }
 0x290   :  { %v6189_v14 = vpop.eup %6188  ;;  %v2655_v5 = vadd.f32 1.0, %v6187_v35  ;;  %6208 = vpow2.f32 %v4853_v51  ;;  %v8159_v13 = vadd.f32 %v5613_v61, %v8030_v23  ;;  %5715 = vmatprep.mubr.f32.mxu0 %v2838_v6  ;;  %v2192_v57 = vpop.f32.mrb[37].mxu1 }
 0x291   :  { %v6191_v58 = vpop.eup %6190  ;;  %6210 = vrcp.f32 %v2652_v53  ;;  %v2654_v62 = vadd.f32 1.0, %v6189_v14  ;;  %v8162_v20 = vadd.f32 %v8030_v23, %v2192_v57 }
 0x292   :  { %v6193_v40 = vpop.eup %6192  ;;  %6212 = vrcp.f32 %v2655_v5  ;;  %v4855_v48 = vmul.f32 -1.442695, %v8159_v13  ;;  %5716 = vmatmul.mubr.f32.gmra.mrb[28].mxu0 %v2839_v36  ;;  %v2841_v31 = vmul.f32 %v6191_v58, %v8089_v55 }
 0x293   :  { %v6195_v29 = vpop.eup %6194  ;;  %v2840_v41 = vmul.f32 %v6193_v40, %v8093_v43  ;;  %6214 = vrcp.f32 %v2654_v62  ;;  %v5616_v44 = vpop.f32.mrb[38].mxu1  ;;  %v4854_v60 = vmul.f32 -1.442695, %v8162_v20 }
 0x294   :  { %v6197_v46 = vpop.eup %6196  ;;  %v2657_v17 = vadd.f32 1.0, %v6195_v29  ;;  %6216 = vpow2.f32 %v4852_v39  ;;  %v8169_v54 = vadd.f32 %v5616_v44, %v8030_v23  ;;  %v2202_v1 = vpop.f32.mrb[39].mxu1 }
 0x295   :  { %v6199_v4 = vpop.eup %6198  ;;  %v2656_v59 = vadd.f32 1.0, %v6197_v46  ;;  %6218 = vpow2.f32 %v4855_v48  ;;  %5718 = vmatprep.mubr.f32.mxu0 %v2840_v41  ;;  %v8172_v15 = vadd.f32 %v8030_v23, %v2202_v1 }
 0x296   :  { %v6201_v55 = vpop.eup %6200  ;;  %6220 = vrcp.f32 %v2657_v17  ;;  %v4857_v43 = vmul.f32 -1.442695, %v8169_v54  ;;  %5719 = vmatmul.mubr.f32.gmra.mrb[30].mxu0 %v2841_v31  ;;  %v2843_v50 = vmul.f32 %v6199_v4, %v8099_v34 }
 0x297   :  { %v6203_v3 = vpop.eup %6202  ;;  %v2842_v8 = vmul.f32 %v6201_v55, %v8103_v19  ;;  %6222 = vrcp.f32 %v2656_v59  ;;  %v5619_v49 = vpop.f32.mrb[40].mxu1  ;;  %v4856_v18 = vmul.f32 -1.442695, %v8172_v15 }
 0x298   :  { %v6205_v24 = vpop.eup %6204  ;;  %v2659_v16 = vadd.f32 1.0, %v6203_v3  ;;  %6224 = vpow2.f32 %v4854_v60  ;;  %v8179_v38 = vadd.f32 %v5619_v49, %v8030_v23  ;;  %v2212_v22 = vpop.f32.mrb[41].mxu1 }
 0x299   :  { %v6207_v30 = vpop.eup %6206  ;;  %v2658_v26 = vadd.f32 1.0, %v6205_v24  ;;  %6226 = vpow2.f32 %v4857_v43  ;;  %5721 = vmatprep.mubr.f32.mxu0 %v2842_v8  ;;  %v8182_v21 = vadd.f32 %v8030_v23, %v2212_v22 }
 0x29a   :  { %v6209_v34 = vpop.eup %6208  ;;  %6228 = vrcp.f32 %v2659_v16  ;;  %v4859_v19 = vmul.f32 -1.442695, %v8179_v38  ;;  %5722 = vmatmul.mubr.f32.gmra.mrb[32].mxu0 %v2843_v50  ;;  %v2845_v57 = vmul.f32 %v6207_v30, %v8109_v32 }
 0x29b   :  { %v6211_v6 = vpop.eup %6210  ;;  %6230 = vrcp.f32 %v2658_v26  ;;  %v2661_v51 = vadd.f32 1.0, %v6209_v34  ;;  %v4858_v35 = vmul.f32 -1.442695, %v8182_v21  ;;  %v5622_v36 = vpop.f32.mrb[42].mxu1 }
 0x29c   :  { %v6213_v53 = vpop.eup %6212  ;;  %v2844_v61 = vmul.f32 %v6211_v6, %v8113_v9  ;;  %6232 = vpow2.f32 %v4856_v18  ;;  %v8188_v14 = vadd.f32 %v5622_v36, %v8030_v23  ;;  %v2222_v5 = vpop.f32.mrb[43].mxu1 }
 0x29d   :  { %v6215_v39 = vpop.eup %6214  ;;  %6234 = vrcp.f32 %v2661_v51  ;;  %v8192_v58 = vadd.f32 %v8030_v23, %v2222_v5  ;;  %v2847_v60 = vmul.f32 %v6213_v53, %v8119_v45 }
 0x29e   :  { %v6217_v62 = vpop.eup %6216  ;;  %v2846_v40 = vmul.f32 %v6215_v39, %v8122_v12  ;;  %6236 = vpow2.f32 %v4859_v19  ;;  %v4861_v48 = vmul.f32 -1.442695, %v8188_v14  ;;  %5724 = vmatprep.mubr.f32.mxu0 %v2844_v61 }
 0x29f   :  { %v6219_v9 = vpop.eup %6218  ;;  %v2660_v29 = vadd.f32 1.0, %v6217_v62  ;;  %6238 = vpow2.f32 %v4858_v35  ;;  %v4860_v31 = vmul.f32 -1.442695, %v8192_v58  ;;  %5725 = vmatmul.mubr.f32.gmra.mrb[34].mxu0 %v2845_v57  ;;  %v5625_v41 = vpop.f32.mrb[44].mxu1 }
 0x2a0   :  { %v6221_v44 = vpop.eup %6220  ;;  %v2663_v32 = vadd.f32 1.0, %v6219_v9  ;;  %6240 = vpow2.f32 %v4861_v48  ;;  %v8198_v46 = vadd.f32 %v5625_v41, %v8030_v23  ;;  %5727 = vmatprep.mubr.f32.mxu0 %v2846_v40  ;;  %v2232_v17 = vpop.f32.mrb[45].mxu1 }
 0x2a1   :  { %v6223_v12 = vpop.eup %6222  ;;  %6242 = vrcp.f32 %v2660_v29  ;;  %v8202_v1 = vadd.f32 %v8030_v23, %v2232_v17 }
 0x2a2   :  { %v6225_v4 = vpop.eup %6224  ;;  %v2848_v59 = vmul.f32 %v6223_v12, %v8132_v42  ;;  %6244 = vrcp.f32 %v2663_v32  ;;  %v4863_v55 = vmul.f32 -1.442695, %v8198_v46  ;;  %v2849_v42 = vmul.f32 %v6221_v44, %v8129_v28 }
 0x2a3   :  { %v6227_v43 = vpop.eup %6226  ;;  %v2662_v3 = vadd.f32 1.0, %v6225_v4  ;;  %6246 = vpow2.f32 %v4860_v31  ;;  %v4862_v50 = vmul.f32 -1.442695, %v8202_v1  ;;  %5728 = vmatmul.mubr.f32.gmra.mrb[36].mxu0 %v2847_v60  ;;  %v5628_v8 = vpop.f32.mrb[46].mxu1 }
 0x2a4   :  { %v6229_v49 = vpop.eup %6228  ;;  %v2665_v24 = vadd.f32 1.0, %v6227_v43  ;;  %6248 = vpow2.f32 %v4863_v55  ;;  %v8208_v45 = vadd.f32 %v5628_v8, %v8030_v23  ;;  %5730 = vmatprep.mubr.f32.mxu0 %v2848_v59  ;;  %v2242_v16 = vpop.f32.mrb[47].mxu1 }
 0x2a5   :  { %v6231_v18 = vpop.eup %6230  ;;  %6250 = vrcp.f32 %v2662_v3  ;;  %v8212_v22 = vadd.f32 %v8030_v23, %v2242_v16 }
 0x2a6   :  { %v6233_v30 = vpop.eup %6232  ;;  %v2850_v26 = vmul.f32 %v6231_v18, %v8142_v63  ;;  %6252 = vrcp.f32 %v2665_v24  ;;  %v4865_v34 = vmul.f32 -1.442695, %v8208_v45  ;;  %v2851_v63 = vmul.f32 %v6229_v49, %v8139_v47 }
 0x2a7   :  { %v6235_v19 = vpop.eup %6234  ;;  %v2664_v6 = vadd.f32 1.0, %v6233_v30  ;;  %6254 = vpow2.f32 %v4862_v50  ;;  %v4864_v51 = vmul.f32 -1.442695, %v8212_v22  ;;  %5731 = vmatmul.mubr.f32.gmra.mrb[38].mxu0 %v2849_v42  ;;  %v5631_v35 = vpop.f32.mrb[48].mxu1 }
 0x2a8   :  { %v6237_v36 = vpop.eup %6236  ;;  %6256 = vpow2.f32 %v4865_v34  ;;  %v8218_v28 = vadd.f32 %v5631_v35, %v8030_v23  ;;  %5733 = vmatprep.mubr.f32.mxu0 %v2850_v26  ;;  %v2252_v53 = vpop.f32.mrb[49].mxu1  ;;  %v2853_v12 = vmul.f32 %v6235_v19, %v8149_v11 }
 0x2a9   :  { %v6239_v61 = vpop.eup %6238  ;;  %6258 = vrcp.f32 %v2664_v6  ;;  %v2667_v5 = vadd.f32 1.0, %v6237_v36  ;;  %v8222_v39 = vadd.f32 %v8030_v23, %v2252_v53 }
 0x2aa   :  { %v6241_v57 = vpop.eup %6240  ;;  %v2666_v62 = vadd.f32 1.0, %v6239_v61  ;;  %6260 = vpow2.f32 %v4864_v51  ;;  %v4867_v40 = vmul.f32 -1.442695, %v8218_v28 }
 0x2ab   :  { %v6243_v48 = vpop.eup %6242  ;;  %6262 = vrcp.f32 %v2667_v5  ;;  %v2669_v9 = vadd.f32 1.0, %v6241_v57  ;;  %v4866_v29 = vmul.f32 -1.442695, %v8222_v39  ;;  %5734 = vmatmul.mubr.f32.gmra.mrb[40].mxu0 %v2851_v63  ;;  %v5634_v31 = vpop.f32.mrb[50].mxu1 }
 0x2ac   :  { %v6245_v41 = vpop.eup %6244  ;;  %v2852_v47 = vmul.f32 %v6243_v48, %v8152_v37  ;;  %6264 = vrcp.f32 %v2666_v62  ;;  %v8228_v44 = vadd.f32 %v5634_v31, %v8030_v23  ;;  %v2262_v32 = vpop.f32.mrb[51].mxu1 }
 0x2ad   :  { %v6247_v17 = vpop.eup %6246  ;;  %6266 = vrcp.f32 %v2669_v9  ;;  %v8232_v60 = vadd.f32 %v8030_v23, %v2262_v32  ;;  %v2855_v18 = vmul.f32 %v6245_v41, %v8159_v13 }
 0x2ae   :  { %v6249_v4 = vpop.eup %6248  ;;  %v2668_v59 = vadd.f32 1.0, %v6247_v17  ;;  %6268 = vpow2.f32 %v4867_v40  ;;  %v4869_v55 = vmul.f32 -1.442695, %v8228_v44  ;;  %5736 = vmatprep.mubr.f32.mxu0 %v2852_v47 }
 0x2af   :  { %v6251_v43 = vpop.eup %6250  ;;  %v2671_v37 = vadd.f32 1.0, %v6249_v4  ;;  %6270 = vpow2.f32 %v4866_v29  ;;  %v4868_v3 = vmul.f32 -1.442695, %v8232_v60  ;;  %5737 = vmatmul.mubr.f32.gmra.mrb[42].mxu0 %v2853_v12  ;;  %v5637_v50 = vpop.f32.mrb[52].mxu1 }
 0x2b0   :  { %v6253_v8 = vpop.eup %6252  ;;  %v2854_v11 = vmul.f32 %v6251_v43, %v8162_v20  ;;  %6272 = vrcp.f32 %v2668_v59  ;;  %v8238_v49 = vadd.f32 %v5637_v50, %v8030_v23  ;;  %v2272_v24 = vpop.f32.mrb[53].mxu1 }
 0x2b1   :  { %v6255_v16 = vpop.eup %6254  ;;  %6274 = vrcp.f32 %v2671_v37  ;;  %v8242_v42 = vadd.f32 %v8030_v23, %v2272_v24  ;;  %v2857_v63 = vmul.f32 %v6253_v8, %v8169_v54 }
 0x2b2   :  { %v6257_v30 = vpop.eup %6256  ;;  %v2670_v26 = vadd.f32 1.0, %v6255_v16  ;;  %6276 = vpow2.f32 %v4869_v55  ;;  %v4871_v34 = vmul.f32 -1.442695, %v8238_v49  ;;  %5739 = vmatprep.mubr.f32.mxu0 %v2854_v11 }
 0x2b3   :  { %v6259_v19 = vpop.eup %6258  ;;  %v2673_v20 = vadd.f32 1.0, %v6257_v30  ;;  %6278 = vpow2.f32 %v4868_v3  ;;  %5740 = vmatmul.mubr.f32.gmra.mrb[44].mxu0 %v2855_v18  ;;  %v5640_v6 = vpop.f32.mrb[54].mxu1  ;;  %v4870_v13 = vmul.f32 -1.442695, %v8242_v42 }
 0x2b4   :  { %v6261_v51 = vpop.eup %6260  ;;  %v2856_v35 = vmul.f32 %v6259_v19, %v8172_v15  ;;  %6280 = vrcp.f32 %v2670_v26  ;;  %v8248_v36 = vadd.f32 %v5640_v6, %v8030_v23  ;;  %v2282_v53 = vpop.f32.mrb[55].mxu1 }
 0x2b5   :  { %v6263_v61 = vpop.eup %6262  ;;  %6282 = vrcp.f32 %v2673_v20  ;;  %v2672_v5 = vadd.f32 1.0, %v6261_v51  ;;  %v8252_v57 = vadd.f32 %v8030_v23, %v2282_v53 }
 0x2b6   :  { %v6265_v62 = vpop.eup %6264  ;;  %6284 = vpow2.f32 %v4871_v34  ;;  %v4873_v40 = vmul.f32 -1.442695, %v8248_v36  ;;  %5742 = vmatprep.mubr.f32.mxu0 %v2856_v35  ;;  %v2859_v32 = vmul.f32 %v6263_v61, %v8179_v38 }
 0x2b7   :  { %v6267_v15 = vpop.eup %6266  ;;  %v2858_v48 = vmul.f32 %v6265_v62, %v8182_v21  ;;  %6286 = vrcp.f32 %v2672_v5  ;;  %v4872_v9 = vmul.f32 -1.442695, %v8252_v57  ;;  %5743 = vmatmul.mubr.f32.gmra.mrb[46].mxu0 %v2857_v63  ;;  %v5643_v29 = vpop.f32.mrb[56].mxu1 }
 0x2b8   :  { %v6269_v31 = vpop.eup %6268  ;;  %6288 = vpow2.f32 %v4870_v13  ;;  %v8258_v54 = vadd.f32 %v5643_v29, %v8030_v23  ;;  %v2292_v41 = vpop.f32.mrb[57].mxu1  ;;  %v2861_v24 = vmul.f32 %v6267_v15, %v8188_v14 }
 0x2b9   :  { %v6271_v47 = vpop.eup %6270  ;;  %v2675_v17 = vadd.f32 1.0, %v6269_v31  ;;  %6290 = vpow2.f32 %v4873_v40  ;;  %5745 = vmatprep.mubr.f32.mxu0 %v2858_v48  ;;  %v8262_v12 = vadd.f32 %v8030_v23, %v2292_v41 }
 0x2ba   :  { %v6273_v21 = vpop.eup %6272  ;;  %v2674_v4 = vadd.f32 1.0, %v6271_v47  ;;  %6292 = vpow2.f32 %v4872_v9  ;;  %v4875_v59 = vmul.f32 -1.442695, %v8258_v54 }
 0x2bb   :  { %v6275_v55 = vpop.eup %6274  ;;  %v2860_v43 = vmul.f32 %v6273_v21, %v8192_v58  ;;  %6294 = vrcp.f32 %v2675_v17  ;;  %v4874_v37 = vmul.f32 -1.442695, %v8262_v12  ;;  %5746 = vmatmul.mubr.f32.gmra.mrb[48].mxu0 %v2859_v32  ;;  %v5646_v3 = vpop.f32.mrb[58].mxu1 }
 0x2bc   :  { %v6277_v38 = vpop.eup %6276  ;;  %6296 = vrcp.f32 %v2674_v4  ;;  %v8268_v50 = vadd.f32 %v5646_v3, %v8030_v23  ;;  %v2302_v8 = vpop.f32.mrb[59].mxu1  ;;  %v2863_v53 = vmul.f32 %v6275_v55, %v8198_v46 }
 0x2bd   :  { %v6279_v11 = vpop.eup %6278  ;;  %v2677_v16 = vadd.f32 1.0, %v6277_v38  ;;  %6298 = vpow2.f32 %v4875_v59  ;;  %5748 = vmatprep.mubr.f32.mxu0 %v2860_v43  ;;  %v8272_v18 = vadd.f32 %v8030_v23, %v2302_v8 }
 0x2be   :  { %v6281_v58 = vpop.eup %6280  ;;  %v2676_v30 = vadd.f32 1.0, %v6279_v11  ;;  %6300 = vpow2.f32 %v4874_v37  ;;  %v4877_v26 = vmul.f32 -1.442695, %v8268_v50 }
 0x2bf   :  { %v6283_v34 = vpop.eup %6282  ;;  %v2862_v19 = vmul.f32 %v6281_v58, %v8202_v1  ;;  %6302 = vrcp.f32 %v2677_v16  ;;  %v4876_v20 = vmul.f32 -1.442695, %v8272_v18  ;;  %5749 = vmatmul.mubr.f32.gmra.mrb[50].mxu0 %v2861_v24  ;;  %v5649_v6 = vpop.f32.mrb[60].mxu1 }
 0x2c0   :  { %v6285_v14 = vpop.eup %6284  ;;  %6304 = vrcp.f32 %v2676_v30  ;;  %v8278_v51 = vadd.f32 %v5649_v6, %v8030_v23  ;;  %v2312_v35 = vpop.f32.mrb[61].mxu1 }
 0x2c1   :  { %v6287_v13 = vpop.eup %6286  ;;  %v2679_v61 = vadd.f32 1.0, %v6285_v14  ;;  %6306 = vpow2.f32 %v4877_v26  ;;  %5751 = vmatprep.mubr.f32.mxu0 %v2862_v19  ;;  %v8282_v63 = vadd.f32 %v8030_v23, %v2312_v35 }
 0x2c2   :  { %v6289_v1 = vpop.eup %6288  ;;  %v2864_v5 = vmul.f32 %v6287_v13, %v8212_v22  ;;  %6308 = vpow2.f32 %v4876_v20  ;;  %v4879_v62 = vmul.f32 -1.442695, %v8278_v51  ;;  %v2865_v22 = vmul.f32 %v6283_v34, %v8208_v45 }
 0x2c3   :  { %v6291_v40 = vpop.eup %6290  ;;  %6310 = vrcp.f32 %v2679_v61  ;;  %v2678_v15 = vadd.f32 1.0, %v6289_v1  ;;  %5752 = vmatmul.mubr.f32.gmra.mrb[52].mxu0 %v2863_v53  ;;  %v5652_v48 = vpop.f32.mrb[62].mxu1  ;;  %v4878_v46 = vmul.f32 -1.442695, %v8282_v63 }
 0x2c4   :  { %v6293_v9 = vpop.eup %6292  ;;  %v2681_v29 = vadd.f32 1.0, %v6291_v40  ;;  %6312 = vpow2.f32 %v4879_v62  ;;  %v8288_v31 = vadd.f32 %v5652_v48, %v8030_v23  ;;  %5754 = vmatprep.mubr.f32.mxu0 %v2864_v5  ;;  %v2322_v41 = vpop.f32.mrb[63].mxu1 }
 0x2c5   :  { %v6295_v47 = vpop.eup %6294  ;;  %6314 = vrcp.f32 %v2678_v15  ;;  %v2680_v32 = vadd.f32 1.0, %v6293_v9  ;;  %v8292_v17 = vadd.f32 %v8030_v23, %v2322_v41 }
 0x2c6   :  { %v6297_v21 = vpop.eup %6296  ;;  %6316 = vrcp.f32 %v2681_v29  ;;  %v4881_v4 = vmul.f32 -1.442695, %v8288_v31  ;;  %v2867_v24 = vmul.f32 %v6295_v47, %v8218_v28 }
 0x2c7   :  { %v6299_v59 = vpop.eup %6298  ;;  %v2866_v55 = vmul.f32 %v6297_v21, %v8222_v39  ;;  %6318 = vrcp.f32 %v2680_v32  ;;  %5755 = vmatmul.mubr.f32.gmra.mrb[54].mxu0 %v2865_v22  ;;  %v5655_v43 = vpop.f32.mrb[64].mxu1  ;;  %v4880_v45 = vmul.f32 -1.442695, %v8292_v17 }
 0x2c8   :  { %v6301_v37 = vpop.eup %6300  ;;  %v2683_v3 = vadd.f32 1.0, %v6299_v59  ;;  %6320 = vpow2.f32 %v4878_v46  ;;  %v8298_v38 = vadd.f32 %v5655_v43, %v8030_v23  ;;  %v2332_v8 = vpop.f32.mrb[65].mxu1 }
 0x2c9   :  { %v6303_v11 = vpop.eup %6302  ;;  %v2682_v16 = vadd.f32 1.0, %v6301_v37  ;;  %6322 = vpow2.f32 %v4881_v4  ;;  %5757 = vmatprep.mubr.f32.mxu0 %v2866_v55  ;;  %v8302_v39 = vadd.f32 %v8030_v23, %v2332_v8  ;;  %v6662_v23 = vld [vmem:[%s9489_s6] ss:$0 sm:$0xff] }
 0x2ca   :  { %v6305_v58 = vpop.eup %6304  ;;  %6324 = vrcp.f32 %v2683_v3  ;;  %v4883_v30 = vmul.f32 -1.442695, %v8298_v38  ;;  %v2869_v53 = vmul.f32 %v6303_v11, %v8228_v44 }
 0x2cb   :  { %v6307_v26 = vpop.eup %6306  ;;  %v2868_v34 = vmul.f32 %v6305_v58, %v8232_v60  ;;  %6326 = vrcp.f32 %v2682_v16  ;;  %5758 = vmatmul.mubr.f32.gmra.mrb[56].mxu0 %v2867_v24  ;;  %v5658_v19 = vpop.f32.mrb[66].mxu1  ;;  %v4882_v28 = vmul.f32 -1.442695, %v8302_v39 }
 0x2cc   :  { %v6309_v20 = vpop.eup %6308  ;;  %v2685_v6 = vadd.f32 1.0, %v6307_v26  ;;  %6328 = vpow2.f32 %v4880_v45  ;;  %v8310_v14 = vadd.f32 %v6662_v23, %v5658_v19  ;;  %v2342_v35 = vpop.f32.mrb[67].mxu1 }
 0x2cd   :  { %v6311_v13 = vpop.eup %6310  ;;  %v2684_v61 = vadd.f32 1.0, %v6309_v20  ;;  %6330 = vpow2.f32 %v4883_v30  ;;  %5760 = vmatprep.mubr.f32.mxu0 %v2868_v34  ;;  %v8313_v60 = vadd.f32 %v6662_v23, %v2342_v35 }
 0x2ce   :  { %v6313_v1 = vpop.eup %6312  ;;  %6332 = vrcp.f32 %v2685_v6  ;;  %v4885_v5 = vmul.f32 -1.442695, %v8310_v14  ;;  %v2871_v47 = vmul.f32 %v6311_v13, %v8238_v49 }
 0x2cf   :  { %v6315_v62 = vpop.eup %6314  ;;  %6334 = vrcp.f32 %v2684_v61  ;;  %v2687_v40 = vadd.f32 1.0, %v6313_v1  ;;  %v4884_v15 = vmul.f32 -1.442695, %v8313_v60  ;;  %5761 = vmatmul.mubr.f32.gmra.mrb[58].mxu0 %v2869_v53  ;;  %v5661_v48 = vpop.f32.mrb[68].mxu1 }
 0x2d0   :  { %v6317_v9 = vpop.eup %6316  ;;  %v2870_v29 = vmul.f32 %v6315_v62, %v8242_v42  ;;  %6336 = vpow2.f32 %v4882_v28  ;;  %v8318_v44 = vadd.f32 %v6662_v23, %v5661_v48  ;;  %v2352_v46 = vpop.f32.mrb[69].mxu1 }
 0x2d1   :  { %v6319_v41 = vpop.eup %6318  ;;  %6338 = vrcp.f32 %v2687_v40  ;;  %v8321_v22 = vadd.f32 %v6662_v23, %v2352_v46 }
 0x2d2   :  { %v6321_v32 = vpop.eup %6320  ;;  %v2872_v21 = vmul.f32 %v6319_v41, %v8252_v57  ;;  %6340 = vpow2.f32 %v4885_v5  ;;  %v4887_v4 = vmul.f32 -1.442695, %v8318_v44  ;;  %5763 = vmatprep.mubr.f32.mxu0 %v2870_v29  ;;  %v2873_v57 = vmul.f32 %v6317_v9, %v8248_v36 }
 0x2d3   :  { %v6323_v59 = vpop.eup %6322  ;;  %v2686_v55 = vadd.f32 1.0, %v6321_v32  ;;  %6342 = vpow2.f32 %v4884_v15  ;;  %v4886_v42 = vmul.f32 -1.442695, %v8321_v22  ;;  %5764 = vmatmul.mubr.f32.gmra.mrb[60].mxu0 %v2871_v47  ;;  %v5664_v43 = vpop.f32.mrb[70].mxu1 }
 0x2d4   :  { %v6325_v37 = vpop.eup %6324  ;;  %v2689_v3 = vadd.f32 1.0, %v6323_v59  ;;  %6344 = vpow2.f32 %v4887_v4  ;;  %v8326_v49 = vadd.f32 %v6662_v23, %v5664_v43  ;;  %5766 = vmatprep.mubr.f32.mxu0 %v2872_v21  ;;  %v2362_v45 = vpop.f32.mrb[71].mxu1 }
 0x2d5   :  { %v6327_v8 = vpop.eup %6326  ;;  %6346 = vrcp.f32 %v2686_v55  ;;  %v8329_v11 = vadd.f32 %v6662_v23, %v2362_v45  ;;  %v2875_v6 = vmul.f32 %v6325_v37, %v8258_v54 }
 0x2d6   :  { %v6329_v24 = vpop.eup %6328  ;;  %v2874_v16 = vmul.f32 %v6327_v8, %v8262_v12  ;;  %6348 = vrcp.f32 %v2689_v3  ;;  %v4889_v58 = vmul.f32 -1.442695, %v8326_v49 }
 0x2d7   :  { %v6331_v30 = vpop.eup %6330  ;;  %v2688_v26 = vadd.f32 1.0, %v6329_v24  ;;  %6350 = vpow2.f32 %v4886_v42  ;;  %v4888_v34 = vmul.f32 -1.442695, %v8329_v11  ;;  %5767 = vmatmul.mubr.f32.gmra.mrb[62].mxu0 %v2873_v57 }
 0x2d8   :  { %v6333_v19 = vpop.eup %6332  ;;  %v2691_v20 = vadd.f32 1.0, %v6331_v30  ;;  %6352 = vpow2.f32 %v4889_v58  ;;  %5769 = vmatprep.mubr.f32.mxu0 %v2874_v16 }
 0x2d9   :  { %v6335_v36 = vpop.eup %6334  ;;  %6354 = vrcp.f32 %v2688_v26  ;;  %v2877_v61 = vmul.f32 %v6333_v19, %v8268_v50 }
 0x2da   :  { %v6337_v28 = vpop.eup %6336  ;;  %v2876_v12 = vmul.f32 %v6335_v36, %v8272_v18  ;;  %6356 = vpow2.f32 %v4888_v34  ;;  %v8369_v34 = vld [vmem:[%s9491_s2] sm:$0xf] }
 0x2db   :  { %v6339_v23 = vpop.eup %6338  ;;  %v2690_v35 = vadd.f32 1.0, %v6337_v28  ;;  %5770 = vmatmul.mubr.f32.gmra.mrb[64].mxu0 %v2875_v6  ;;  %6358 = vrcp.f32 %v2691_v20 }
 0x2dc   :  { %v6341_v13 = vpop.eup %6340  ;;  %5772 = vmatprep.mubr.f32.mxu0 %v2876_v12  ;;  %v2879_v9 = vmul.f32 %v6339_v23, %v8278_v51 }
 0x2dd   :  { %v6343_v53 = vpop.eup %6342  ;;  %6360 = vrcp.f32 %v2690_v35  ;;  %v2693_v1 = vadd.f32 1.0, %v6341_v13  ;;  %v9498_v13 = vmov 1.0  }
 0x2de   :  { %v6345_v5 = vpop.eup %6344  ;;  %v2692_v62 = vadd.f32 1.0, %v6343_v53 }
 0x2df   :  { %v6347_v40 = vpop.eup %6346  ;;  %6362 = vrcp.f32 %v2693_v1  ;;  %v2695_v54 = vadd.f32 1.0, %v6345_v5  ;;  %5773 = vmatmul.mubr.f32.gmra.mrb[66].mxu0 %v2877_v61 }
 0x2e0   :  { %v6349_v15 = vpop.eup %6348  ;;  %v2878_v18 = vmul.f32 %v6347_v40, %v8282_v63  ;;  %6364 = vrcp.f32 %v2692_v62 }
 0x2e1   :  { %v6351_v48 = vpop.eup %6350  ;;  %6366 = vrcp.f32 %v2695_v54  ;;  %v2881_v21 = vmul.f32 %v6349_v15, %v8288_v31 }
 0x2e2   :  { %v6353_v29 = vpop.eup %6352  ;;  %v2694_v46 = vadd.f32 1.0, %v6351_v48  ;;  %5775 = vmatprep.mubr.f32.mxu0 %v2878_v18 }
 0x2e3   :  { %v6355_v41 = vpop.eup %6354  ;;  %v2697_v50 = vadd.f32 1.0, %v6353_v29  ;;  %5776 = vmatmul.mubr.f32.gmra.mrb[68].mxu0 %v2879_v9 }
 0x2e4   :  { %v2880_v47 = vmul.f32 %v6355_v41, %v8292_v17  ;;  %6368 = vrcp.f32 %v2694_v46  ;;  %v6357_v32 = vpop.eup %6356 }
 0x2e5   :  { %v6359_v4 = vpop.eup %6358  ;;  %v2696_v59 = vadd.f32 1.0, %v6357_v32  ;;  %6370 = vrcp.f32 %v2697_v50 }
 0x2e6   :  { %5778 = vmatprep.mubr.f32.mxu0 %v2880_v47  ;;  %v2883_v42 = vmul.f32 %v6359_v4, %v8298_v38 }
 0x2e7   :  { %v6361_v63 = vpop.eup %6360  ;;  %5779 = vmatmul.mubr.f32.gmra.mrb[70].mxu0 %v2881_v21  ;;  %6372 = vrcp.f32 %v2696_v59 }
 0x2e8   :  { %v2882_v51 = vmul.f32 %v6361_v63, %v8302_v39 }
 0x2e9   :  { %v6363_v55 = vpop.eup %6362 }
 0x2ea   :  { %v6365_v43 = vpop.eup %6364  ;;  %5781 = vmatprep.mubr.f32.mxu0 %v2882_v51  ;;  %v2885_v31 = vmul.f32 %v6363_v55, %v8310_v14  ;;  %v8352_v14 = vld [vmem:[%s9490_s8] ss:$0 sm:$0xff] }
 0x2eb   :  { %v2884_v17 = vmul.f32 %v6365_v43, %v8313_v60  ;;  %5782 = vmatmul.mubr.f32.gmra.mrb[72].mxu0 %v2883_v42  ;;  %v6367_v37 = vpop.eup %6366 }
 0x2ec   :  { %v2887_v39 = vmul.f32 %v6367_v37, %v8318_v44  ;;  %v8358_v44 = vshrl.u32 %v446_v27, 7 }
 0x2ed   :  { %5784 = vmatprep.mubr.f32.mxu0 %v2884_v17 }
 0x2ee   :  { %v6369_v3 = vpop.eup %6368  ;;  %v3761_v58 = vsub.s32 1, %v8358_v44  ;;  %v3757_v19 = vsub.s32 0, %v8358_v44  ;;  %v8395_v1 = vadd.s32 8, %v8358_v44  ;;  %v8407_v54 = vadd.s32 16, %v8358_v44 }
 0x2ef   :  { %v2886_v45 = vmul.f32 %v6369_v3, %v8321_v22  ;;  %5785 = vmatmul.mubr.f32.gmra.mrb[74].mxu0 %v2885_v31  ;;  %v6371_v8 = vpop.eup %6370  ;;  %v8421_v32 = vadd.s32 24, %v8358_v44  ;;  %v8436_v31 = vadd.s32 32, %v8358_v44 }
 0x2f0   :  { %v2889_v24 = vmul.f32 %v6371_v8, %v8326_v49  ;;  %v8376_v36 = vrot.slane %v8369_v34, %v3761_v58  ;;  %v8382_v28 = vrot.slane %v8369_v34, %v3757_v19  ;;  %v8451_v58 = vadd.s32 40, %v8358_v44 }
 0x2f1   :  { %5787 = vmatprep.mubr.f32.mxu0 %v2886_v45  ;;  %v6373_v57 = vpop.eup %6372 }
 0x2f2   :  { %v2888_v38 = vmul.f32 %v6373_v57, %v8329_v11  ;;  %vm3772_vm1 = vcmp.eq.s32.totalorder %v8358_v44, %v8376_v36  ;;  %vm3771_vm4 = vcmp.eq.s32.totalorder %v8358_v44, %v8382_v28  ;;  %vm3776_vm5 = vcmp.eq.s32.totalorder %v8395_v1, %v8376_v36 }
 0x2f3   :  { %5788 = vmatmul.mubr.f32.gmra.mrb[76].mxu0 %v2887_v39  ;;  %vm3775_vm6 = vcmp.eq.s32.totalorder %v8395_v1, %v8382_v28  ;;  %vm3780_vm7 = vcmp.eq.s32.totalorder %v8407_v54, %v8376_v36  ;;  %vm3779_vm8 = vcmp.eq.s32.totalorder %v8407_v54, %v8382_v28  ;;  %vm3784_vm9 = vcmp.eq.s32.totalorder %v8421_v32, %v8376_v36 }
 0x2f4   :  { %5790 = vmatprep.mubr.f32.mxu0 %v2888_v38  ;;  %vm3783_vm10 = vcmp.eq.s32.totalorder %v8421_v32, %v8382_v28  ;;  %vm3788_vm11 = vcmp.eq.s32.totalorder %v8436_v31, %v8376_v36  ;;  %vm3787_vm12 = vcmp.eq.s32.totalorder %v8436_v31, %v8382_v28  ;;  %vm3792_vm13 = vcmp.eq.s32.totalorder %v8451_v58, %v8376_v36 }
 0x2f5   :  { %vm3791_vm14 = vcmp.eq.s32.totalorder %v8451_v58, %v8382_v28 }
 0x2f7   :  { %5791 = vmatmul.mubr.f32.gmra.mrb[78].mxu0 %v2889_v24 }
 0x2f8   :  { %4987 = vmatprep.mubr.msk.f32.mxu0 %vm3772_vm1, %v9498_v13 }
 0x34b   :  { %v5699_v60 = vpop.f32.mrb[16].mxu0 }
 0x34c   :  { %v8355_v22 = vadd.f32 %v5699_v60, %v8352_v14  ;;  %v2979_v16 = vpop.f32.mrb[17].mxu0 }
 0x34d   :  { %v8361_v11 = vadd.f32 %v8352_v14, %v2979_v16 }
 0x34e   :  { %v4892_v49 = vmul.f32 -1.442695, %v8355_v22 }
 0x34f   :  { %v4891_v30 = vmul.f32 -1.442695, %v8361_v11  ;;  %v5702_v26 = vpop.f32.mrb[18].mxu0 }
 0x350   :  { %6374 = vpow2.f32 %v4892_v49  ;;  %v8373_v27 = vadd.f32 %v5702_v26, %v8352_v14  ;;  %v2989_v20 = vpop.f32.mrb[19].mxu0 }
 0x351   :  { %6376 = vpow2.f32 %v4891_v30  ;;  %v8379_v6 = vadd.f32 %v8352_v14, %v2989_v20 }
 0x352   :  { %v4894_v12 = vmul.f32 -1.442695, %v8373_v27 }
 0x353   :  { %v4893_v23 = vmul.f32 -1.442695, %v8379_v6  ;;  %v5705_v35 = vpop.f32.mrb[20].mxu0 }
 0x354   :  { %6378 = vpow2.f32 %v4894_v12  ;;  %v8392_v53 = vadd.f32 %v5705_v35, %v8352_v14  ;;  %v2999_v61 = vpop.f32.mrb[21].mxu0 }
 0x355   :  { %6380 = vpow2.f32 %v4893_v23  ;;  %v8398_v5 = vadd.f32 %v8352_v14, %v2999_v61 }
 0x356   :  { %v4896_v62 = vmul.f32 -1.442695, %v8392_v53 }
 0x357   :  { %v4895_v40 = vmul.f32 -1.442695, %v8398_v5 }
 0x358   :  { %6382 = vpow2.f32 %v4896_v62 }
 0x359   :  { %6384 = vpow2.f32 %v4895_v40  ;;  %v5708_v15 = vpop.f32.mrb[22].mxu0  ;;  %v8469_v40 = vadd.s32 48, %v8358_v44 }
 0x35a   :  { %v6375_v18 = vpop.eup %6374  ;;  %v8410_v48 = vadd.f32 %v5708_v15, %v8352_v14  ;;  %v3009_v9 = vpop.f32.mrb[23].mxu0 }
 0x35b   :  { %v6377_v29 = vpop.eup %6376  ;;  %v3491_v46 = vadd.f32 1.0, %v6375_v18  ;;  %v8415_v41 = vadd.f32 %v8352_v14, %v3009_v9  ;;  %vm3796_vm15 = vcmp.eq.s32.totalorder %v8469_v40, %v8376_v36 }
 0x35c   :  { %v3490_v50 = vadd.f32 1.0, %v6377_v29  ;;  %v4898_v47 = vmul.f32 -1.442695, %v8410_v48 }
 0x35d   :  { %6386 = vrcp.f32 %v3491_v46  ;;  %v4897_v21 = vmul.f32 -1.442695, %v8415_v41  ;;  %v5711_v4 = vpop.f32.mrb[24].mxu0 }
 0x35e   :  { %v6379_v59 = vpop.eup %6378  ;;  %6388 = vrcp.f32 %v3490_v50  ;;  %v8425_v63 = vadd.f32 %v5711_v4, %v8352_v14  ;;  %v3019_v51 = vpop.f32.mrb[25].mxu0 }
 0x35f   :  { %v6381_v55 = vpop.eup %6380  ;;  %v3493_v42 = vadd.f32 1.0, %v6379_v59  ;;  %6390 = vpow2.f32 %v4898_v47  ;;  %v8430_v43 = vadd.f32 %v8352_v14, %v3019_v51 }
 0x360   :  { %v3492_v17 = vadd.f32 1.0, %v6381_v55  ;;  %6392 = vpow2.f32 %v4897_v21  ;;  %v4900_v37 = vmul.f32 -1.442695, %v8425_v63 }
 0x361   :  { %6394 = vrcp.f32 %v3493_v42  ;;  %v4899_v3 = vmul.f32 -1.442695, %v8430_v43  ;;  %v5714_v45 = vpop.f32.mrb[26].mxu0 }
 0x362   :  { %v6383_v8 = vpop.eup %6382  ;;  %6396 = vrcp.f32 %v3492_v17  ;;  %v8440_v39 = vadd.f32 %v5714_v45, %v8352_v14  ;;  %v3029_v57 = vpop.f32.mrb[27].mxu0 }
 0x363   :  { %v6385_v38 = vpop.eup %6384  ;;  %v3495_v24 = vadd.f32 1.0, %v6383_v8  ;;  %6398 = vpow2.f32 %v4900_v37  ;;  %v8445_v60 = vadd.f32 %v8352_v14, %v3029_v57  ;;  %v8506_v8 = vadd.s32 56, %v8358_v44 }
 0x364   :  { %v3494_v16 = vadd.f32 1.0, %v6385_v38  ;;  %6400 = vpow2.f32 %v4899_v3  ;;  %v4902_v49 = vmul.f32 -1.442695, %v8440_v39 }
 0x365   :  { %6402 = vrcp.f32 %v3495_v24  ;;  %v4901_v30 = vmul.f32 -1.442695, %v8445_v60  ;;  %v5717_v26 = vpop.f32.mrb[28].mxu0 }
 0x366   :  { %6404 = vrcp.f32 %v3494_v16  ;;  %v8455_v19 = vadd.f32 %v5717_v26, %v8352_v14  ;;  %v3039_v20 = vpop.f32.mrb[29].mxu0 }
 0x367   :  { %v6387_v12 = vpop.eup %6386  ;;  %6406 = vpow2.f32 %v4902_v49  ;;  %v8460_v23 = vadd.f32 %v8352_v14, %v3039_v20 }
 0x368   :  { %v6389_v35 = vpop.eup %6388  ;;  %v8465_v61 = vmul.f32 %v6387_v12, %v8355_v22  ;;  %6408 = vpow2.f32 %v4901_v30  ;;  %v4904_v62 = vmul.f32 -1.442695, %v8455_v19 }
 0x369   :  { %v6391_v15 = vpop.eup %6390  ;;  %v8472_v18 = vmul.f32 %v6389_v35, %v8361_v11  ;;  %v4903_v9 = vmul.f32 -1.442695, %v8460_v23  ;;  %v5720_v29 = vpop.f32.mrb[30].mxu0 }
 0x36a   :  { %v6393_v46 = vpop.eup %6392  ;;  %4482 = vst.msk [vmem:[%s9492_s14 + $0x8] sm:$0xff] %vm203_vm0, %v8465_v61  ;;  %v3497_v22 = vadd.f32 1.0, %v6391_v15  ;;  %6410 = vpow2.f32 %v4904_v62  ;;  %v8481_v50 = vadd.f32 %v5720_v29, %v8352_v14  ;;  %v3049_v47 = vpop.f32.mrb[31].mxu0 }
 0x36b   :  { %v6395_v11 = vpop.eup %6394  ;;  %4481 = vst.msk [vmem:[%s9492_s14] sm:$0xff] %vm203_vm0, %v8472_v18  ;;  %v3496_v4 = vadd.f32 1.0, %v6393_v46  ;;  %6412 = vpow2.f32 %v4903_v9  ;;  %v8493_v59 = vadd.f32 %v8352_v14, %v3049_v47  ;;  %v3769_v46 = vsub.s32 3, %v8358_v44 }
 0x36c   :  { %v6397_v51 = vpop.eup %6396  ;;  %v8496_v55 = vmul.f32 %v6395_v11, %v8373_v27  ;;  %6414 = vrcp.f32 %v3497_v22  ;;  %v4906_v42 = vmul.f32 -1.442695, %v8481_v50 }
 0x36d   :  { %v6399_v17 = vpop.eup %6398  ;;  %v8502_v37 = vmul.f32 %v6397_v51, %v8379_v6  ;;  %6416 = vrcp.f32 %v3496_v4  ;;  %v4905_v3 = vmul.f32 -1.442695, %v8493_v59  ;;  %v5723_v45 = vpop.f32.mrb[32].mxu0 }
 0x36e   :  { %v6401_v57 = vpop.eup %6400  ;;  %4484 = vst.msk [vmem:[%s9492_s14 + $0x18] sm:$0xff] %vm203_vm0, %v8496_v55  ;;  %v3499_v27 = vadd.f32 1.0, %v6399_v17  ;;  %6418 = vpow2.f32 %v4906_v42  ;;  %v8514_v38 = vadd.f32 %v5723_v45, %v8352_v14  ;;  %v3059_v6 = vpop.f32.mrb[33].mxu0  ;;  %v8559_v17 = vrot.slane %v8369_v34, %v3769_v46 }
 0x36f   :  { %v6403_v24 = vpop.eup %6402  ;;  %4483 = vst.msk [vmem:[%s9492_s14 + $0x10] sm:$0xff] %vm203_vm0, %v8502_v37  ;;  %v3498_v49 = vadd.f32 1.0, %v6401_v57  ;;  %6420 = vpow2.f32 %v4905_v3  ;;  %v8524_v30 = vadd.f32 %v8352_v14, %v3059_v6 }
 0x370   :  { %v6405_v26 = vpop.eup %6404  ;;  %v8527_v20 = vmul.f32 %v6403_v24, %v8392_v53  ;;  %6422 = vrcp.f32 %v3499_v27  ;;  %v4908_v12 = vmul.f32 -1.442695, %v8514_v38  ;;  %vm3774_vm1 = vcmp.eq.s32.totalorder %v8358_v44, %v8559_v17 }
 0x371   :  { %v6407_v35 = vpop.eup %6406  ;;  %v8533_v62 = vmul.f32 %v6405_v26, %v8398_v5  ;;  %6424 = vrcp.f32 %v3498_v49  ;;  %v4907_v15 = vmul.f32 -1.442695, %v8524_v30  ;;  %v3765_v5 = vsub.s32 2, %v8358_v44 }
 0x372   :  { %v6409_v9 = vpop.eup %6408  ;;  %4486 = vst.msk [vmem:[%s9492_s14 + $0x28] sm:$0xff] %vm203_vm0, %v8527_v20  ;;  %v3501_v53 = vadd.f32 1.0, %v6407_v35  ;;  %6426 = vpow2.f32 %v4908_v12  ;;  %v5726_v29 = vpop.f32.mrb[34].mxu0  ;;  %vm3802_vm2 = vcmp.eq.s32.totalorder %v8506_v8, %v8559_v17 }
 0x373   :  { %4485 = vst.msk [vmem:[%s9492_s14 + $0x20] sm:$0xff] %vm203_vm0, %v8533_v62  ;;  %v3500_v47 = vadd.f32 1.0, %v6409_v9  ;;  %6428 = vpow2.f32 %v4907_v15  ;;  %v8553_v11 = vadd.f32 %v5726_v29, %v8352_v14  ;;  %v3069_v4 = vpop.f32.mrb[35].mxu0  ;;  %v8562_v3 = vrot.slane %v8369_v34, %v3765_v5 }
 0x374   :  { %v6411_v51 = vpop.eup %6410  ;;  %6430 = vrcp.f32 %v3501_v53  ;;  %v8556_v42 = vadd.f32 %v8352_v14, %v3069_v4 }
 0x375   :  { %v6413_v45 = vpop.eup %6412  ;;  %6432 = vrcp.f32 %v3500_v47  ;;  %v3503_v57 = vadd.f32 1.0, %v6411_v51  ;;  %v4910_v27 = vmul.f32 -1.442695, %v8553_v11  ;;  %vm3801_vm3 = vcmp.eq.s32.totalorder %v8506_v8, %v8562_v3 }
 0x376   :  { %v6415_v6 = vpop.eup %6414  ;;  %v3502_v24 = vadd.f32 1.0, %v6413_v45  ;;  %v4909_v49 = vmul.f32 -1.442695, %v8556_v42  ;;  %v5729_v26 = vpop.f32.mrb[36].mxu0 }
 0x377   :  { %v6417_v12 = vpop.eup %6416  ;;  %v8571_v34 = vmul.f32 %v6415_v6, %v8410_v48  ;;  %6434 = vrcp.f32 %v3503_v57  ;;  %v8574_v35 = vadd.f32 %v5729_v26, %v8352_v14  ;;  %v3079_v15 = vpop.f32.mrb[37].mxu0 }
 0x378   :  { %v6419_v9 = vpop.eup %6418  ;;  %v8579_v53 = vmul.f32 %v6417_v12, %v8415_v41  ;;  %6436 = vrcp.f32 %v3502_v24  ;;  %v8582_v29 = vadd.f32 %v8352_v14, %v3079_v15 }
 0x379   :  { %v6421_v48 = vpop.eup %6420  ;;  %4488 = vst.msk [vmem:[%s9492_s14 + $0x38] sm:$0xff] %vm203_vm0, %v8571_v34  ;;  %v3505_v46 = vadd.f32 1.0, %v6419_v9  ;;  %6438 = vpow2.f32 %v4910_v27  ;;  %v4912_v5 = vmul.f32 -1.442695, %v8574_v35 }
 0x37a   :  { %v6423_v41 = vpop.eup %6422  ;;  %4487 = vst.msk [vmem:[%s9492_s14 + $0x30] sm:$0xff] %vm203_vm0, %v8579_v53  ;;  %v3504_v4 = vadd.f32 1.0, %v6421_v48  ;;  %6440 = vpow2.f32 %v4909_v49  ;;  %v4911_v51 = vmul.f32 -1.442695, %v8582_v29  ;;  %v5732_v45 = vpop.f32.mrb[38].mxu0 }
 0x37b   :  { %v6425_v57 = vpop.eup %6424  ;;  %v8603_v27 = vmul.f32 %v6423_v41, %v8425_v63  ;;  %6442 = vrcp.f32 %v3505_v46  ;;  %v8606_v6 = vadd.f32 %v5732_v45, %v8352_v14  ;;  %v3089_v24 = vpop.f32.mrb[39].mxu0 }
 0x37c   :  { %v6427_v26 = vpop.eup %6426  ;;  %v8611_v12 = vmul.f32 %v6425_v57, %v8430_v43  ;;  %6444 = vrcp.f32 %v3504_v4  ;;  %v8614_v49 = vadd.f32 %v8352_v14, %v3089_v24 }
 0x37d   :  { %v6429_v15 = vpop.eup %6428  ;;  %4490 = vst.msk [vmem:[%s9492_s14 + $0x48] sm:$0xff] %vm203_vm0, %v8603_v27  ;;  %v3507_v63 = vadd.f32 1.0, %v6427_v26  ;;  %6446 = vpow2.f32 %v4912_v5  ;;  %v4914_v9 = vmul.f32 -1.442695, %v8606_v6 }
 0x37e   :  { %v6431_v43 = vpop.eup %6430  ;;  %4489 = vst.msk [vmem:[%s9492_s14 + $0x40] sm:$0xff] %vm203_vm0, %v8611_v12  ;;  %v3506_v46 = vadd.f32 1.0, %v6429_v15  ;;  %6448 = vpow2.f32 %v4911_v51  ;;  %v4913_v41 = vmul.f32 -1.442695, %v8614_v49  ;;  %v5735_v5 = vpop.f32.mrb[40].mxu0 }
 0x37f   :  { %v6433_v4 = vpop.eup %6432  ;;  %v8633_v45 = vmul.f32 %v6431_v43, %v8440_v39  ;;  %6450 = vrcp.f32 %v3507_v63  ;;  %v8636_v57 = vadd.f32 %v5735_v5, %v8352_v14  ;;  %v3099_v24 = vpop.f32.mrb[41].mxu0 }
 0x380   :  { %v8641_v26 = vmul.f32 %v6433_v4, %v8445_v60  ;;  %6452 = vrcp.f32 %v3506_v46  ;;  %v8644_v51 = vadd.f32 %v8352_v14, %v3099_v24 }
 0x381   :  { %v6435_v15 = vpop.eup %6434  ;;  %4492 = vst.msk [vmem:[%s9492_s14 + $0x58] sm:$0xff] %vm203_vm0, %v8633_v45  ;;  %6454 = vpow2.f32 %v4914_v9  ;;  %v4916_v39 = vmul.f32 -1.442695, %v8636_v57 }
 0x382   :  { %v6437_v63 = vpop.eup %6436  ;;  %4491 = vst.msk [vmem:[%s9492_s14 + $0x50] sm:$0xff] %vm203_vm0, %v8641_v26  ;;  %v8662_v43 = vmul.f32 %v6435_v15, %v8455_v19  ;;  %6456 = vpow2.f32 %v4913_v41  ;;  %v4915_v9 = vmul.f32 -1.442695, %v8644_v51  ;;  %v5738_v46 = vpop.f32.mrb[42].mxu0 }
 0x383   :  { %v6439_v5 = vpop.eup %6438  ;;  %v8666_v4 = vmul.f32 %v6437_v63, %v8460_v23  ;;  %6458 = vpow2.f32 %v4916_v39  ;;  %v8669_v24 = vadd.f32 %v5738_v46, %v8352_v14  ;;  %v3109_v13 = vpop.f32.mrb[43].mxu0 }
 0x384   :  { %v6441_v60 = vpop.eup %6440  ;;  %4494 = vst.msk [vmem:[%s9492_s14 + $0x68] sm:$0xff] %vm203_vm0, %v8662_v43  ;;  %v3509_v19 = vadd.f32 1.0, %v6439_v5  ;;  %6460 = vpow2.f32 %v4915_v9  ;;  %v8679_v23 = vadd.f32 %v8352_v14, %v3109_v13 }
 0x385   :  { %v6443_v41 = vpop.eup %6442  ;;  %4493 = vst.msk [vmem:[%s9492_s14 + $0x60] sm:$0xff] %vm203_vm0, %v8666_v4  ;;  %v3508_v39 = vadd.f32 1.0, %v6441_v60  ;;  %v4918_v63 = vmul.f32 -1.442695, %v8669_v24 }
 0x386   :  { %v6445_v9 = vpop.eup %6444  ;;  %v8692_v13 = vmul.f32 %v6443_v41, %v8481_v50  ;;  %6462 = vrcp.f32 %v3509_v19  ;;  %v4917_v46 = vmul.f32 -1.442695, %v8679_v23  ;;  %v5741_v5 = vpop.f32.mrb[44].mxu0 }
 0x387   :  { %v6447_v15 = vpop.eup %6446  ;;  %v8698_v48 = vmul.f32 %v6445_v9, %v8493_v59  ;;  %6464 = vrcp.f32 %v3508_v39  ;;  %v8701_v60 = vadd.f32 %v5741_v5, %v8352_v14  ;;  %v3119_v47 = vpop.f32.mrb[45].mxu0 }
 0x388   :  { %v6449_v22 = vpop.eup %6448  ;;  %4496 = vst.msk [vmem:[%s9492_s14 + $0x78] sm:$0xff] %vm203_vm0, %v8692_v13  ;;  %v3511_v50 = vadd.f32 1.0, %v6447_v15  ;;  %6466 = vpow2.f32 %v4918_v63  ;;  %v8709_v19 = vadd.f32 %v8352_v14, %v3119_v47 }
 0x389   :  { %v6451_v41 = vpop.eup %6450  ;;  %4495 = vst.msk [vmem:[%s9492_s14 + $0x70] sm:$0xff] %vm203_vm0, %v8698_v48  ;;  %v3510_v39 = vadd.f32 1.0, %v6449_v22  ;;  %6468 = vpow2.f32 %v4917_v46  ;;  %v4920_v9 = vmul.f32 -1.442695, %v8701_v60 }
 0x38a   :  { %v6453_v5 = vpop.eup %6452  ;;  %v3699_v15 = vmul.f32 %v6451_v41, %v8514_v38  ;;  %6470 = vrcp.f32 %v3511_v50  ;;  %v4919_v47 = vmul.f32 -1.442695, %v8709_v19  ;;  %v5744_v63 = vpop.f32.mrb[46].mxu0 }
 0x38b   :  { %v6455_v59 = vpop.eup %6454  ;;  %v3698_v16 = vmul.f32 %v6453_v5, %v8524_v30  ;;  %6472 = vrcp.f32 %v3510_v39  ;;  %v8725_v21 = vadd.f32 %v5744_v63, %v8352_v14  ;;  %v3129_v22 = vpop.f32.mrb[47].mxu0 }
 0x38c   :  { %v6457_v46 = vpop.eup %6456  ;;  %4498 = vst.msk [vmem:[%s9492_s14 + $0x88] sm:$0xff] %vm203_vm0, %v3699_v15  ;;  %v3513_v38 = vadd.f32 1.0, %v6455_v59  ;;  %6474 = vpow2.f32 %v4920_v9  ;;  %v8734_v50 = vadd.f32 %v8352_v14, %v3129_v22 }
 0x38d   :  { %v6459_v30 = vpop.eup %6458  ;;  %4497 = vst.msk [vmem:[%s9492_s14 + $0x80] sm:$0xff] %vm203_vm0, %v3698_v16  ;;  %v3512_v41 = vadd.f32 1.0, %v6457_v46  ;;  %6476 = vpow2.f32 %v4919_v47  ;;  %v4922_v39 = vmul.f32 -1.442695, %v8725_v21  ;;  %v5937_v5 = vpack.c.bf16 %v3699_v15, %v3698_v16 }
 0x38e   :  { %v6461_v63 = vpop.eup %6460  ;;  %6478 = vrcp.f32 %v3513_v38  ;;  %v3515_v33 = vadd.f32 1.0, %v6459_v30  ;;  %v4921_v59 = vmul.f32 -1.442695, %v8734_v50  ;;  %v5747_v9 = vpop.f32.mrb[48].mxu0  ;;  %v9504_v47 = vpack.c.bf16 %v8465_v61, %v8472_v18 }
 0x38f   :  { %6480 = vrcp.f32 %v3512_v41  ;;  %v3514_v22 = vadd.f32 1.0, %v6461_v63  ;;  %v8745_v7 = vadd.f32 %v5747_v9, %v8352_v14  ;;  %v3139_v2 = vpop.f32.mrb[49].mxu0  ;;  %5938 = vmatprep.subr.bf16.mxu0 %v5937_v5 }
 0x390   :  { %v6463_v16 = vpop.eup %6462  ;;  %6482 = vrcp.f32 %v3515_v33  ;;  %v8750_v15 = vadd.f32 %v8352_v14, %v3139_v2  ;;  %5940 = vmatpush3.bf16.msra.mxu0 %v9504_v47 }
 0x391   :  { %v6465_v46 = vpop.eup %6464  ;;  %v3701_v38 = vmul.f32 %v6463_v16, %v8553_v11  ;;  %6484 = vrcp.f32 %v3514_v22  ;;  %v4924_v30 = vmul.f32 -1.442695, %v8745_v7 }
 0x392   :  { %v6467_v41 = vpop.eup %6466  ;;  %v3700_v5 = vmul.f32 %v6465_v46, %v8556_v42  ;;  %6486 = vpow2.f32 %v4922_v39  ;;  %v5750_v63 = vpop.f32.mrb[50].mxu0  ;;  %v4923_v33 = vmul.f32 -1.442695, %v8750_v15 }
 0x393   :  { %v6469_v9 = vpop.eup %6468  ;;  %4500 = vst.msk [vmem:[%s9492_s14 + $0x98] sm:$0xff] %vm203_vm0, %v3701_v38  ;;  %v3517_v2 = vadd.f32 1.0, %v6467_v41  ;;  %6488 = vpow2.f32 %v4921_v59  ;;  %v8764_v61 = vadd.f32 %v5750_v63, %v8352_v14  ;;  %v3149_v18 = vpop.f32.mrb[51].mxu0 }
 0x394   :  { %v6471_v11 = vpop.eup %6470  ;;  %4499 = vst.msk [vmem:[%s9492_s14 + $0x90] sm:$0xff] %vm203_vm0, %v3700_v5  ;;  %v3516_v42 = vadd.f32 1.0, %v6469_v9  ;;  %6490 = vpow2.f32 %v4924_v30  ;;  %v8771_v39 = vadd.f32 %v8352_v14, %v3149_v18  ;;  %v5941_v22 = vpack.c.bf16 %v3701_v38, %v3700_v5 }
 0x395   :  { %v6473_v16 = vpop.eup %6472  ;;  %v3703_v59 = vmul.f32 %v6471_v11, %v8574_v35  ;;  %6492 = vrcp.f32 %v3517_v2  ;;  %v4926_v47 = vmul.f32 -1.442695, %v8764_v61  ;;  %v9505_v35 = vpack.c.bf16 %v8496_v55, %v8502_v37 }
 0x396   :  { %v6475_v46 = vpop.eup %6474  ;;  %v3702_v41 = vmul.f32 %v6473_v16, %v8582_v29  ;;  %6494 = vrcp.f32 %v3516_v42  ;;  %5942 = vmatprep.subr.bf16.mxu0 %v5941_v22  ;;  %v5753_v63 = vpop.f32.mrb[52].mxu0  ;;  %v4925_v38 = vmul.f32 -1.442695, %v8771_v39 }
 0x397   :  { %v6477_v52 = vpop.eup %6476  ;;  %4502 = vst.msk [vmem:[%s9492_s14 + $0xa8] sm:$0xff] %vm203_vm0, %v3703_v59  ;;  %v3519_v30 = vadd.f32 1.0, %v6475_v46  ;;  %6496 = vpow2.f32 %v4923_v33  ;;  %5944 = vmatpush3.bf16.msra.mxu0 %v9505_v35  ;;  %v8785_v5 = vadd.f32 %v5753_v63, %v8352_v14  ;;  %v3159_v29 = vpop.f32.mrb[53].mxu0 }
 0x398   :  { %v6479_v9 = vpop.eup %6478  ;;  %4501 = vst.msk [vmem:[%s9492_s14 + $0xa0] sm:$0xff] %vm203_vm0, %v3702_v41  ;;  %v3518_v2 = vadd.f32 1.0, %v6477_v52  ;;  %6498 = vpow2.f32 %v4926_v47  ;;  %v8792_v33 = vadd.f32 %v8352_v14, %v3159_v29  ;;  %v5945_v18 = vpack.c.bf16 %v3703_v59, %v3702_v41 }
 0x399   :  { %v6481_v11 = vpop.eup %6480  ;;  %v3705_v55 = vmul.f32 %v6479_v9, %v8606_v6  ;;  %6500 = vrcp.f32 %v3519_v30  ;;  %v4928_v37 = vmul.f32 -1.442695, %v8785_v5  ;;  %v9506_v6 = vpack.c.bf16 %v8527_v20, %v8533_v62 }
 0x39a   :  { %v6483_v42 = vpop.eup %6482  ;;  %v3704_v22 = vmul.f32 %v6481_v11, %v8614_v49  ;;  %6502 = vrcp.f32 %v3518_v2  ;;  %v4927_v16 = vmul.f32 -1.442695, %v8792_v33  ;;  %5946 = vmatprep.subr.bf16.mxu0 %v5945_v18  ;;  %v5756_v46 = vpop.f32.mrb[54].mxu0 }
 0x39b   :  { %v6485_v52 = vpop.eup %6484  ;;  %4504 = vst.msk [vmem:[%s9492_s14 + $0xb8] sm:$0xff] %vm203_vm0, %v3705_v55  ;;  %v3707_v59 = vmul.f32 %v6483_v42, %v8636_v57  ;;  %6504 = vpow2.f32 %v4925_v38  ;;  %5948 = vmatpush3.bf16.msra.mxu0 %v9506_v6  ;;  %v8807_v49 = vadd.f32 %v5756_v46, %v8352_v14  ;;  %v3169_v47 = vpop.f32.mrb[55].mxu0 }
 0x39c   :  { %v6487_v41 = vpop.eup %6486  ;;  %4503 = vst.msk [vmem:[%s9492_s14 + $0xb0] sm:$0xff] %vm203_vm0, %v3704_v22  ;;  %v3706_v63 = vmul.f32 %v6485_v52, %v8644_v51  ;;  %6506 = vpow2.f32 %v4928_v37  ;;  %v8815_v57 = vadd.f32 %v8352_v14, %v3169_v47  ;;  %v5949_v30 = vpack.c.bf16 %v3705_v55, %v3704_v22 }
 0x39d   :  { %v6489_v38 = vpop.eup %6488  ;;  %4506 = vst.msk [vmem:[%s9492_s14 + $0xc8] sm:$0xff] %vm203_vm0, %v3707_v59  ;;  %v3521_v20 = vadd.f32 1.0, %v6487_v41  ;;  %6508 = vpow2.f32 %v4927_v16  ;;  %v4930_v35 = vmul.f32 -1.442695, %v8807_v49  ;;  %v9507_v55 = vpack.c.bf16 %v8571_v34, %v8579_v53 }
 0x39e   :  { %v6491_v62 = vpop.eup %6490  ;;  %4505 = vst.msk [vmem:[%s9492_s14 + $0xc0] sm:$0xff] %vm203_vm0, %v3706_v63  ;;  %v3520_v51 = vadd.f32 1.0, %v6489_v38  ;;  %5950 = vmatprep.subr.bf16.mxu0 %v5949_v30  ;;  %v5759_v29 = vpop.f32.mrb[56].mxu0  ;;  %v5953_v9 = vpack.c.bf16 %v3707_v59, %v3706_v63  ;;  %v4929_v11 = vmul.f32 -1.442695, %v8815_v57  ;;  %v9508_v63 = vpack.c.bf16 %v8603_v27, %v8611_v12 }
 0x39f   :  { %v6493_v2 = vpop.eup %6492  ;;  %6510 = vrcp.f32 %v3521_v20  ;;  %v3523_v18 = vadd.f32 1.0, %v6491_v62  ;;  %5952 = vmatpush3.bf16.msra.mxu0 %v9507_v55  ;;  %v8831_v37 = vadd.f32 %v5759_v29, %v8352_v14  ;;  %v3179_v42 = vpop.f32.mrb[57].mxu0 }
 0x3a0   :  { %v6495_v22 = vpop.eup %6494  ;;  %v3709_v16 = vmul.f32 %v6493_v2, %v8669_v24  ;;  %6512 = vrcp.f32 %v3520_v51  ;;  %v8835_v46 = vadd.f32 %v8352_v14, %v3179_v42  ;;  %5954 = vmatprep.subr.bf16.mxu0 %v5953_v9 }
 0x3a1   :  { %v6497_v52 = vpop.eup %6496  ;;  %v3708_v59 = vmul.f32 %v6495_v22, %v8679_v23  ;;  %6514 = vrcp.f32 %v3523_v18  ;;  %v4932_v53 = vmul.f32 -1.442695, %v8831_v37 }
 0x3a2   :  { %v6499_v6 = vpop.eup %6498  ;;  %4508 = vst.msk [vmem:[%s9492_s14 + $0xd8] sm:$0xff] %vm203_vm0, %v3709_v16  ;;  %v3522_v34 = vadd.f32 1.0, %v6497_v52  ;;  %6516 = vpow2.f32 %v4930_v35  ;;  %v4931_v24 = vmul.f32 -1.442695, %v8835_v46  ;;  %v5762_v47 = vpop.f32.mrb[58].mxu0 }
 0x3a3   :  { %v6501_v41 = vpop.eup %6500  ;;  %4507 = vst.msk [vmem:[%s9492_s14 + $0xd0] sm:$0xff] %vm203_vm0, %v3708_v59  ;;  %v3525_v23 = vadd.f32 1.0, %v6499_v6  ;;  %6518 = vpow2.f32 %v4929_v11  ;;  %5956 = vmatpush3.bf16.msra.mxu0 %v9508_v63  ;;  %v8852_v30 = vadd.f32 %v5762_v47, %v8352_v14  ;;  %v3189_v38 = vpop.f32.mrb[59].mxu0  ;;  %v5957_v20 = vpack.c.bf16 %v3709_v16, %v3708_v59 }
 0x3a4   :  { %v6503_v62 = vpop.eup %6502  ;;  %v3711_v51 = vmul.f32 %v6501_v41, %v8701_v60  ;;  %6520 = vrcp.f32 %v3522_v34  ;;  %v8856_v35 = vadd.f32 %v8352_v14, %v3189_v38  ;;  %v9509_v11 = vpack.c.bf16 %v8633_v45, %v8641_v26 }
 0x3a5   :  { %v6505_v29 = vpop.eup %6504  ;;  %v3710_v9 = vmul.f32 %v6503_v62, %v8709_v19  ;;  %6522 = vrcp.f32 %v3525_v23  ;;  %5958 = vmatprep.subr.bf16.mxu0 %v5957_v20  ;;  %v4934_v12 = vmul.f32 -1.442695, %v8852_v30  ;;  %v9510_v23 = vpack.c.bf16 %v8662_v43, %v8666_v4 }
 0x3a6   :  { %v6507_v2 = vpop.eup %6506  ;;  %4510 = vst.msk [vmem:[%s9492_s14 + $0xe8] sm:$0xff] %vm203_vm0, %v3711_v51  ;;  %v3524_v27 = vadd.f32 1.0, %v6505_v29  ;;  %6524 = vpow2.f32 %v4932_v53  ;;  %v5765_v60 = vpop.f32.mrb[60].mxu0  ;;  %v4933_v52 = vmul.f32 -1.442695, %v8856_v35 }
 0x3a7   :  { %v6509_v18 = vpop.eup %6508  ;;  %4509 = vst.msk [vmem:[%s9492_s14 + $0xe0] sm:$0xff] %vm203_vm0, %v3710_v9  ;;  %v3527_v19 = vadd.f32 1.0, %v6507_v2  ;;  %6526 = vpow2.f32 %v4931_v24  ;;  %5960 = vmatpush3.bf16.msra.mxu0 %v9509_v11  ;;  %v8872_v55 = vadd.f32 %v5765_v60, %v8352_v14  ;;  %v3199_v42 = vpop.f32.mrb[61].mxu0  ;;  %v5961_v22 = vpack.c.bf16 %v3711_v51, %v3710_v9 }
 0x3a8   :  { %6528 = vrcp.f32 %v3524_v27  ;;  %v3526_v16 = vadd.f32 1.0, %v6509_v18  ;;  %v8876_v59 = vadd.f32 %v8352_v14, %v3199_v42  ;;  %v9511_v42 = vpack.c.bf16 %v8692_v13, %v8698_v48 }
 0x3a9   :  { %v6511_v6 = vpop.eup %6510  ;;  %6530 = vrcp.f32 %v3527_v19  ;;  %v4936_v34 = vmul.f32 -1.442695, %v8872_v55  ;;  %5962 = vmatprep.subr.bf16.mxu0 %v5961_v22 }
 0x3aa   :  { %v6513_v53 = vpop.eup %6512  ;;  %v3713_v45 = vmul.f32 %v6511_v6, %v8725_v21  ;;  %6532 = vrcp.f32 %v3526_v16  ;;  %v4935_v26 = vmul.f32 -1.442695, %v8876_v59  ;;  %v5768_v24 = vpop.f32.mrb[62].mxu0 }
 0x3ab   :  { %v6515_v47 = vpop.eup %6514  ;;  %v3712_v41 = vmul.f32 %v6513_v53, %v8734_v50  ;;  %6534 = vpow2.f32 %v4934_v12  ;;  %5964 = vmatpush3.bf16.msra.mxu0 %v9510_v23  ;;  %v8886_v63 = vadd.f32 %v5768_v24, %v8352_v14  ;;  %v3209_v38 = vpop.f32.mrb[63].mxu0 }
 0x3ac   :  { %v6517_v20 = vpop.eup %6516  ;;  %4512 = vst.msk [vmem:[%s9492_s14 + $0xf8] sm:$0xff] %vm203_vm0, %v3713_v45  ;;  %v8893_v21 = vmul.f32 %v6515_v47, %v8745_v7  ;;  %6536 = vpow2.f32 %v4933_v52  ;;  %v8896_v50 = vadd.f32 %v8352_v14, %v3209_v38  ;;  %v9512_v47 = vmov 1.0  }
 0x3ad   :  { %v6519_v62 = vpop.eup %6518  ;;  %4511 = vst.msk [vmem:[%s9492_s14 + $0xf0] sm:$0xff] %vm203_vm0, %v3712_v41  ;;  %v3529_v43 = vadd.f32 1.0, %v6517_v20  ;;  %6538 = vpow2.f32 %v4936_v34  ;;  %v4938_v4 = vmul.f32 -1.442695, %v8886_v63  ;;  %v5965_v51 = vpack.c.bf16 %v3713_v45, %v3712_v41  ;;  %v8944_v45 = vld [vmem:[%s9490_s8] ss:$0 sm:$0xff] }
 0x3ae   :  { %v6521_v29 = vpop.eup %6520  ;;  %4514 = vst.msk [vmem:[%s9492_s14 + $0x108] sm:$0xff] %vm203_vm0, %v8893_v21  ;;  %v3528_v7 = vadd.f32 1.0, %v6519_v62  ;;  %6540 = vpow2.f32 %v4935_v26  ;;  %v4937_v9 = vmul.f32 -1.442695, %v8896_v50  ;;  %v5771_v2 = vpop.f32.mrb[64].mxu0 }
 0x3af   :  { %v6523_v27 = vpop.eup %6522  ;;  %v8910_v12 = vmul.f32 %v6521_v29, %v8750_v15  ;;  %6542 = vrcp.f32 %v3529_v43  ;;  %5966 = vmatprep.subr.bf16.mxu0 %v5965_v51  ;;  %v8913_v60 = vadd.f32 %v5771_v2, %v8352_v14  ;;  %v3219_v18 = vpop.f32.mrb[65].mxu0 }
 0x3b0   :  { %v6525_v19 = vpop.eup %6524  ;;  %v8916_v11 = vmul.f32 %v6523_v27, %v8764_v61  ;;  %6544 = vrcp.f32 %v3528_v7  ;;  %5968 = vmatpush3.bf16.msra.mxu0 %v9511_v42  ;;  %v8922_v22 = vadd.f32 %v8352_v14, %v3219_v18 }
 0x3b1   :  { %v6527_v15 = vpop.eup %6526  ;;  %v5971_v16 = vpack.c.bf16 %v8893_v21, %v8910_v12  ;;  %4513 = vst.msk [vmem:[%s9492_s14 + $0x100] sm:$0xff] %vm203_vm0, %v8910_v12  ;;  %v3531_v61 = vadd.f32 1.0, %v6525_v19  ;;  %6546 = vpow2.f32 %v4938_v4  ;;  %v4940_v52 = vmul.f32 -1.442695, %v8913_v60 }
 0x3b2   :  { %v6529_v6 = vpop.eup %6528  ;;  %4516 = vst.msk [vmem:[%s9492_s14 + $0x118] sm:$0xff] %vm203_vm0, %v8916_v11  ;;  %v3530_v14 = vadd.f32 1.0, %v6527_v15  ;;  %6548 = vpow2.f32 %v4937_v9  ;;  %v4939_v48 = vmul.f32 -1.442695, %v8922_v22  ;;  %v5774_v13 = vpop.f32.mrb[66].mxu0 }
 0x3b3   :  { %v6531_v34 = vpop.eup %6530  ;;  %v8939_v53 = vmul.f32 %v6529_v6, %v8771_v39  ;;  %6550 = vrcp.f32 %v3531_v61  ;;  %v8947_v26 = vadd.f32 %v8944_v45, %v5774_v13  ;;  %v3229_v24 = vpop.f32.mrb[67].mxu0  ;;  %4988 = vmatmul.mubr.msk.f32.vlgmr.msra.gmra.mrb[80].mxu0 %vm3771_vm4, %v9512_v47  ;;  %vm9513_vm4 = vcmp.eq.s32.totalorder %v8469_v40, %v8382_v28 }
 0x3b4   :  { %v6533_v41 = vpop.eup %6532  ;;  %v8954_v23 = vmul.f32 %v6531_v34, %v8785_v5  ;;  %6552 = vrcp.f32 %v3530_v14  ;;  %v8957_v39 = vadd.f32 %v8944_v45, %v3229_v24  ;;  %4989 = vmatprep.mubr.msk.f32.mxu0 %vm3776_vm5, %v9512_v47  ;;  %vm9514_vm5 = vcmp.eq.s32.totalorder %v8506_v8, %v8376_v36 }
 0x3b5   :  { %v6535_v38 = vpop.eup %6534  ;;  %v5975_v20 = vpack.c.bf16 %v8916_v11, %v8939_v53  ;;  %4515 = vst.msk [vmem:[%s9492_s14 + $0x110] sm:$0xff] %vm203_vm0, %v8939_v53  ;;  %v8971_v5 = vmul.f32 %v6533_v41, %v8792_v33  ;;  %6554 = vpow2.f32 %v4940_v52  ;;  %v4942_v62 = vmul.f32 -1.442695, %v8947_v26 }
 0x3b6   :  { %v6537_v43 = vpop.eup %6536  ;;  %4518 = vst.msk [vmem:[%s9492_s14 + $0x128] sm:$0xff] %vm203_vm0, %v8954_v23  ;;  %v3533_v4 = vadd.f32 1.0, %v6535_v38  ;;  %6556 = vpow2.f32 %v4939_v48  ;;  %v5777_v51 = vpop.f32.mrb[68].mxu0  ;;  %v4941_v19 = vmul.f32 -1.442695, %v8957_v39 }
 0x3b7   :  { %v6539_v29 = vpop.eup %6538  ;;  %4517 = vst.msk [vmem:[%s9492_s14 + $0x120] sm:$0xff] %vm203_vm0, %v8971_v5  ;;  %v3532_v33 = vadd.f32 1.0, %v6537_v43  ;;  %6558 = vpow2.f32 %v4942_v62  ;;  %v8987_v9 = vadd.f32 %v8944_v45, %v5777_v51  ;;  %v3239_v2 = vpop.f32.mrb[69].mxu0  ;;  %4990 = vmatmul.mubr.msk.f32.gmra.mrb[82].mxu0 %vm3775_vm6, %v9512_v47  ;;  %vm9515_vm6 = vcmp.eq.s32.totalorder %v8506_v8, %v8382_v28 }
 0x3b8   :  { %v6541_v27 = vpop.eup %6540  ;;  %6560 = vrcp.f32 %v3533_v4  ;;  %v3535_v18 = vadd.f32 1.0, %v6539_v29  ;;  %v8995_v42 = vadd.f32 %v8944_v45, %v3239_v2  ;;  %4991 = vmatprep.mubr.msk.f32.mxu0 %vm3780_vm7, %v9512_v47  ;;  %vm9522_vm7 = vcmp.eq.s32.totalorder %v8358_v44, %v8562_v3  ;;  %v4077_v44 = vld [vmem:[%s9493_s9] sm:$0xff] }
 0x3b9   :  { %v6543_v15 = vpop.eup %6542  ;;  %6562 = vrcp.f32 %v3532_v33  ;;  %v3534_v61 = vadd.f32 1.0, %v6541_v27  ;;  %v4944_v52 = vmul.f32 -1.442695, %v8987_v9 }
 0x3ba   :  { %v6545_v6 = vpop.eup %6544  ;;  %v9003_v14 = vmul.f32 %v6543_v15, %v8807_v49  ;;  %6564 = vrcp.f32 %v3535_v18  ;;  %v5780_v48 = vpop.f32.mrb[70].mxu0 }
 0x3bb   :  { %v6547_v13 = vpop.eup %6546  ;;  %v9006_v34 = vmul.f32 %v6545_v6, %v8815_v57  ;;  %6566 = vrcp.f32 %v3534_v61  ;;  %v9009_v24 = vadd.f32 %v8944_v45, %v5780_v48  ;;  %v3249_v41 = vpop.f32.mrb[71].mxu0  ;;  %4992 = vmatmul.mubr.msk.f32.gmra.mrb[84].mxu0 %vm3779_vm8, %v9512_v47  ;;  %v4943_v57 = vmul.f32 -1.442695, %v8995_v42 }
 0x3bc   :  { %v6549_v38 = vpop.eup %6548  ;;  %4520 = vst.msk [vmem:[%s9492_s14 + $0x138] sm:$0xff] %vm203_vm0, %v9003_v14  ;;  %v3537_v49 = vadd.f32 1.0, %v6547_v13  ;;  %6568 = vpow2.f32 %v4941_v19  ;;  %v9022_v62 = vadd.f32 %v8944_v45, %v3249_v41  ;;  %4993 = vmatprep.mubr.msk.f32.mxu0 %vm3784_vm9, %v9512_v47  ;;  %vm9523_vm8 = vcmp.eq.s32.totalorder %v8395_v1, %v8559_v17 }
 0x3bd   :  { %v6551_v43 = vpop.eup %6550  ;;  %4519 = vst.msk [vmem:[%s9492_s14 + $0x130] sm:$0xff] %vm203_vm0, %v9006_v34  ;;  %v3536_v51 = vadd.f32 1.0, %v6549_v38  ;;  %6570 = vpow2.f32 %v4944_v52  ;;  %v4946_v29 = vmul.f32 -1.442695, %v9009_v24  ;;  %vm9524_vm9 = vcmp.eq.s32.totalorder %v8395_v1, %v8562_v3  ;;  %v4078_v1 = vld [vmem:[%s9493_s9 + $0x8] sm:$0xff] }
 0x3be   :  { %v6553_v33 = vpop.eup %6552  ;;  %v9037_v2 = vmul.f32 %v6551_v43, %v8831_v37  ;;  %6572 = vrcp.f32 %v3537_v49  ;;  %v5783_v27 = vpop.f32.mrb[72].mxu0  ;;  %v4945_v41 = vmul.f32 -1.442695, %v9022_v62 }
 0x3bf   :  { %v6555_v18 = vpop.eup %6554  ;;  %v9040_v19 = vmul.f32 %v6553_v33, %v8835_v46  ;;  %6574 = vrcp.f32 %v3536_v51  ;;  %v9043_v15 = vadd.f32 %v8944_v45, %v5783_v27  ;;  %v3259_v61 = vpop.f32.mrb[73].mxu0  ;;  %4994 = vmatmul.mubr.msk.f32.gmra.mrb[86].mxu0 %vm3783_vm10, %v9512_v47  ;;  %vm9525_vm10 = vcmp.eq.s32.totalorder %v8407_v54, %v8559_v17 }
 0x3c0   :  { %v6557_v52 = vpop.eup %6556  ;;  %4522 = vst.msk [vmem:[%s9492_s14 + $0x148] sm:$0xff] %vm203_vm0, %v9037_v2  ;;  %v3539_v37 = vadd.f32 1.0, %v6555_v18  ;;  %6576 = vpow2.f32 %v4943_v57  ;;  %v9055_v46 = vadd.f32 %v8944_v45, %v3259_v61  ;;  %4995 = vmatprep.mubr.msk.f32.mxu0 %vm3788_vm11, %v9512_v47  ;;  %vm9526_vm11 = vcmp.eq.s32.totalorder %v8407_v54, %v8562_v3 }
 0x3c1   :  { %v6559_v6 = vpop.eup %6558  ;;  %4521 = vst.msk [vmem:[%s9492_s14 + $0x140] sm:$0xff] %vm203_vm0, %v9040_v19  ;;  %v3538_v13 = vadd.f32 1.0, %v6557_v52  ;;  %6578 = vpow2.f32 %v4946_v29  ;;  %v4948_v57 = vmul.f32 -1.442695, %v9043_v15  ;;  %v6001_v54 = vpack.c.bf16 %v4078_v1, %v4077_v44 }
 0x3c2   :  { %v6561_v38 = vpop.eup %6560  ;;  %6580 = vrcp.f32 %v3539_v37  ;;  %v3541_v49 = vadd.f32 1.0, %v6559_v6  ;;  %v5786_v43 = vpop.f32.mrb[74].mxu0  ;;  %v4947_v27 = vmul.f32 -1.442695, %v9055_v46 }
 0x3c3   :  { %v6563_v51 = vpop.eup %6562  ;;  %v9071_v33 = vmul.f32 %v6561_v38, %v8852_v30  ;;  %6582 = vrcp.f32 %v3538_v13  ;;  %v9075_v18 = vadd.f32 %v8944_v45, %v5786_v43  ;;  %v3269_v61 = vpop.f32.mrb[75].mxu0  ;;  %4996 = vmatmul.mubr.msk.f32.gmra.mrb[88].mxu0 %vm3787_vm12, %v9512_v47  ;;  %vm9527_vm12 = vcmp.eq.s32.totalorder %v8421_v32, %v8559_v17 }
 0x3c4   :  { %v6565_v29 = vpop.eup %6564  ;;  %v9082_v52 = vmul.f32 %v6563_v51, %v8856_v35  ;;  %6584 = vrcp.f32 %v3541_v49  ;;  %v9085_v30 = vadd.f32 %v8944_v45, %v3269_v61  ;;  %4997 = vmatprep.mubr.msk.f32.mxu0 %vm3792_vm13, %v9512_v47  ;;  %vm9528_vm13 = vcmp.eq.s32.totalorder %v8421_v32, %v8562_v3  ;;  %v4079_v32 = vld [vmem:[%s9493_s9 + $0x10] sm:$0xff] }
 0x3c5   :  { %v6567_v37 = vpop.eup %6566  ;;  %4524 = vst.msk [vmem:[%s9492_s14 + $0x158] sm:$0xff] %vm203_vm0, %v9071_v33  ;;  %v9097_v6 = vmul.f32 %v6565_v29, %v8872_v55  ;;  %6586 = vpow2.f32 %v4945_v41  ;;  %v4950_v35 = vmul.f32 -1.442695, %v9075_v18 }
 0x3c6   :  { %v6569_v13 = vpop.eup %6568  ;;  %4523 = vst.msk [vmem:[%s9492_s14 + $0x150] sm:$0xff] %vm203_vm0, %v9082_v52  ;;  %v9108_v49 = vmul.f32 %v6567_v37, %v8876_v59  ;;  %6588 = vpow2.f32 %v4948_v57  ;;  %v5789_v43 = vpop.f32.mrb[76].mxu0  ;;  %v4949_v51 = vmul.f32 -1.442695, %v9085_v30 }
 0x3c7   :  { %v6571_v55 = vpop.eup %6570  ;;  %4526 = vst.msk [vmem:[%s9492_s14 + $0x168] sm:$0xff] %vm203_vm0, %v9097_v6  ;;  %v3540_v41 = vadd.f32 1.0, %v6569_v13  ;;  %6590 = vpow2.f32 %v4947_v27  ;;  %v9117_v61 = vadd.f32 %v8944_v45, %v5789_v43  ;;  %v3279_v29 = vpop.f32.mrb[77].mxu0  ;;  %4998 = vmatmul.mubr.msk.f32.gmra.mrb[90].mxu0 %vm3791_vm14, %v9512_v47  ;;  %vm9529_vm14 = vcmp.eq.s32.totalorder %v8436_v31, %v8559_v17 }
 0x3c8   :  { %v6573_v59 = vpop.eup %6572  ;;  %4525 = vst.msk [vmem:[%s9492_s14 + $0x160] sm:$0xff] %vm203_vm0, %v9108_v49  ;;  %v3543_v27 = vadd.f32 1.0, %v6571_v55  ;;  %6592 = vpow2.f32 %v4950_v35  ;;  %v9131_v37 = vadd.f32 %v8944_v45, %v3279_v29  ;;  %4999 = vmatprep.mubr.msk.f32.mxu0 %vm3796_vm15, %v9512_v47  ;;  %vm9530_vm15 = vcmp.eq.s32.totalorder %v8436_v31, %v8562_v3  ;;  %v4080_v31 = vld [vmem:[%s9493_s9 + $0x18] sm:$0xff] }
 0x3c9   :  { %v6575_v13 = vpop.eup %6574  ;;  %v9138_v43 = vmul.f32 %v6573_v59, %v8886_v63  ;;  %6594 = vrcp.f32 %v3540_v41  ;;  %v4952_v57 = vmul.f32 -1.442695, %v9117_v61 }
 0x3ca   :  { %v6577_v38 = vpop.eup %6576  ;;  %v9142_v48 = vmul.f32 %v6575_v13, %v8896_v50  ;;  %6596 = vrcp.f32 %v3543_v27  ;;  %v5792_v35 = vpop.f32.mrb[78].mxu0  ;;  %v4951_v63 = vmul.f32 -1.442695, %v9131_v37 }
 0x3cb   :  { %v6579_v55 = vpop.eup %6578  ;;  %4528 = vst.msk [vmem:[%s9492_s14 + $0x178] sm:$0xff] %vm203_vm0, %v9138_v43  ;;  %v3542_v29 = vadd.f32 1.0, %v6577_v38  ;;  %6598 = vpow2.f32 %v4949_v51  ;;  %v9151_v41 = vadd.f32 %v8944_v45, %v5792_v35  ;;  %v3289_v59 = vpop.f32.mrb[79].mxu0  ;;  %5000 = vmatmul.mubr.msk.f32.gmra.mrb[92].mxu0 %vm9513_vm4, %v9512_v47  ;;  %vm9532_vm4 = vcmp.eq.s32.totalorder %v8451_v58, %v8562_v3 }
 0x3cc   :  { %v6581_v50 = vpop.eup %6580  ;;  %4527 = vst.msk [vmem:[%s9492_s14 + $0x170] sm:$0xff] %vm203_vm0, %v9142_v48  ;;  %v3545_v38 = vadd.f32 1.0, %v6579_v55  ;;  %6600 = vpow2.f32 %v4952_v57  ;;  %v9165_v51 = vadd.f32 %v8944_v45, %v3289_v59  ;;  %5001 = vmatprep.mubr.msk.f32.mxu0 %vm9514_vm5, %v9512_v47  ;;  %vm9533_vm5 = vcmp.eq.s32.totalorder %v8469_v40, %v8559_v17 }
 0x3cd   :  { %v6583_v13 = vpop.eup %6582  ;;  %v3731_v35 = vmul.f32 %v6581_v50, %v8913_v60  ;;  %6602 = vrcp.f32 %v3542_v29  ;;  %v4954_v27 = vmul.f32 -1.442695, %v9151_v41 }
 0x3ce   :  { %v6585_v4 = vpop.eup %6584  ;;  %v3730_v7 = vmul.f32 %v6583_v13, %v8922_v22  ;;  %6604 = vrcp.f32 %v3545_v38  ;;  %v4953_v57 = vmul.f32 -1.442695, %v9165_v51 }
 0x3cf   :  { %v6587_v55 = vpop.eup %6586  ;;  %4530 = vst.msk [vmem:[%s9492_s14 + $0x188] sm:$0xff] %vm203_vm0, %v3731_v35  ;;  %v3733_v36 = vmul.f32 %v6585_v4, %v8947_v26  ;;  %6606 = vpow2.f32 %v4951_v63  ;;  %5002 = vmatmul.mubr.msk.f32.gmra.mrb[94].mxu0 %vm9515_vm6, %v9512_v47  ;;  %vm9534_vm6 = vcmp.eq.s32.totalorder %v8469_v40, %v8562_v3 }
 0x3d0   :  { %v6589_v60 = vpop.eup %6588  ;;  %4529 = vst.msk [vmem:[%s9492_s14 + $0x180] sm:$0xff] %vm203_vm0, %v3730_v7  ;;  %v3544_v22 = vadd.f32 1.0, %v6587_v55  ;;  %6608 = vpow2.f32 %v4954_v27  ;;  %v5969_v45 = vpack.c.bf16 %v3731_v35, %v3730_v7  ;;  %5003 = vmatprep.mubr.msk.f32.mxu0 %vm3774_vm1, %v9512_v47  ;;  %vm9531_vm1 = vcmp.eq.s32.totalorder %v8451_v58, %v8559_v17 }
 0x3d1   :  { %v6591_v26 = vpop.eup %6590  ;;  %4532 = vst.msk [vmem:[%s9492_s14 + $0x198] sm:$0xff] %vm203_vm0, %v3733_v36  ;;  %v3547_v28 = vadd.f32 1.0, %v6589_v60  ;;  %6610 = vpow2.f32 %v4953_v57  ;;  %v6005_v58 = vpack.c.bf16 %v4080_v31, %v4079_v32  ;;  %v4290_v32 = vld [vmem:[%s9494_s11 + $0x8] sm:$0xff] }
 0x3d2   :  { %v6593_v4 = vpop.eup %6592  ;;  %6612 = vrcp.f32 %v3544_v22  ;;  %v3546_v29 = vadd.f32 1.0, %v6591_v26  ;;  %5970 = vmatprep.subr.bf16.mxu0 %v5969_v45 }
 0x3d3   :  { %v6595_v63 = vpop.eup %6594  ;;  %6614 = vrcp.f32 %v3547_v28  ;;  %v3549_v7 = vadd.f32 1.0, %v6593_v4  ;;  %5972 = vmatpush3.bf16.msra.mxu0 %v5971_v16 }
 0x3d4   :  { %v6597_v59 = vpop.eup %6596  ;;  %v3732_v50 = vmul.f32 %v6595_v63, %v8957_v39  ;;  %6616 = vrcp.f32 %v3546_v29 }
 0x3d5   :  { %v6599_v27 = vpop.eup %6598  ;;  %v3735_v38 = vmul.f32 %v6597_v59, %v8987_v9  ;;  %6618 = vrcp.f32 %v3549_v7 }
 0x3d6   :  { %v6601_v13 = vpop.eup %6600  ;;  %4531 = vst.msk [vmem:[%s9492_s14 + $0x190] sm:$0xff] %vm203_vm0, %v3732_v50  ;;  %v3548_v35 = vadd.f32 1.0, %v6599_v27  ;;  %v5973_v57 = vpack.c.bf16 %v3733_v36, %v3732_v50 }
 0x3d7   :  { %v6603_v55 = vpop.eup %6602  ;;  %4534 = vst.msk [vmem:[%s9492_s14 + $0x1a8] sm:$0xff] %vm203_vm0, %v3735_v38  ;;  %v3551_v21 = vadd.f32 1.0, %v6601_v13 }
 0x3d8   :  { %v6605_v12 = vpop.eup %6604  ;;  %v3734_v16 = vmul.f32 %v6603_v55, %v8995_v42  ;;  %6620 = vrcp.f32 %v3548_v35  ;;  %5974 = vmatprep.subr.bf16.mxu0 %v5973_v57 }
 0x3d9   :  { %v6607_v39 = vpop.eup %6606  ;;  %v3737_v9 = vmul.f32 %v6605_v12, %v9009_v24  ;;  %6622 = vrcp.f32 %v3551_v21  ;;  %5976 = vmatpush3.bf16.msra.mxu0 %v5975_v20  ;;  %v9516_v20 = vpack.c.bf16 %v8954_v23, %v8971_v5 }
 0x3da   :  { %v6609_v36 = vpop.eup %6608  ;;  %4533 = vst.msk [vmem:[%s9492_s14 + $0x1a0] sm:$0xff] %vm203_vm0, %v3734_v16  ;;  %v3550_v60 = vadd.f32 1.0, %v6607_v39  ;;  %v5977_v22 = vpack.c.bf16 %v3735_v38, %v3734_v16 }
 0x3db   :  { %v6611_v45 = vpop.eup %6610  ;;  %4536 = vst.msk [vmem:[%s9492_s14 + $0x1b8] sm:$0xff] %vm203_vm0, %v3737_v9  ;;  %v3553_v42 = vadd.f32 1.0, %v6609_v36 }
 0x3dc   :  { %v6613_v24 = vpop.eup %6612  ;;  %6624 = vrcp.f32 %v3550_v60  ;;  %v3552_v26 = vadd.f32 1.0, %v6611_v45  ;;  %5978 = vmatprep.subr.bf16.mxu0 %v5977_v22 }
 0x3dd   :  { %v6615_v11 = vpop.eup %6614  ;;  %v3736_v53 = vmul.f32 %v6613_v24, %v9022_v62  ;;  %6626 = vrcp.f32 %v3553_v42  ;;  %5980 = vmatpush3.bf16.msra.mxu0 %v9516_v20 }
 0x3de   :  { %v6617_v28 = vpop.eup %6616  ;;  %v3739_v4 = vmul.f32 %v6615_v11, %v9043_v15  ;;  %6628 = vrcp.f32 %v3552_v26  ;;  %v9517_v15 = vpack.c.bf16 %v9003_v14, %v9006_v34  ;;  %v9518_v14 = vpack.c.bf16 %v9037_v2, %v9040_v19 }
 0x3df   :  { %v6619_v29 = vpop.eup %6618  ;;  %4535 = vst.msk [vmem:[%s9492_s14 + $0x1b0] sm:$0xff] %vm203_vm0, %v3736_v53  ;;  %v3738_v63 = vmul.f32 %v6617_v28, %v9055_v46  ;;  %v5981_v7 = vpack.c.bf16 %v3737_v9, %v3736_v53  ;;  %v9519_v2 = vpack.c.bf16 %v9071_v33, %v9082_v52 }
 0x3e0   :  { %4538 = vst.msk [vmem:[%s9492_s14 + $0x1c8] sm:$0xff] %vm203_vm0, %v3739_v4  ;;  %v3741_v23 = vmul.f32 %v6619_v29, %v9075_v18 }
 0x3e1   :  { %4537 = vst.msk [vmem:[%s9492_s14 + $0x1c0] sm:$0xff] %vm203_vm0, %v3738_v63  ;;  %5982 = vmatprep.subr.bf16.mxu0 %v5981_v7  ;;  %v5985_v5 = vpack.c.bf16 %v3739_v4, %v3738_v63 }
 0x3e2   :  { %v6621_v62 = vpop.eup %6620  ;;  %4540 = vst.msk [vmem:[%s9492_s14 + $0x1d8] sm:$0xff] %vm203_vm0, %v3741_v23  ;;  %5984 = vmatpush3.bf16.msra.mxu0 %v9517_v15 }
 0x3e3   :  { %v6623_v46 = vpop.eup %6622  ;;  %v3740_v18 = vmul.f32 %v6621_v62, %v9085_v30  ;;  %5986 = vmatprep.subr.bf16.mxu0 %v5985_v5 }
 0x3e4   :  { %v3743_v59 = vmul.f32 %v6623_v46, %v9117_v61 }
 0x3e5   :  { %4539 = vst.msk [vmem:[%s9492_s14 + $0x1d0] sm:$0xff] %vm203_vm0, %v3740_v18  ;;  %v5989_v50 = vpack.c.bf16 %v3741_v23, %v3740_v18 }
 0x3e6   :  { %v6625_v27 = vpop.eup %6624  ;;  %4542 = vst.msk [vmem:[%s9492_s14 + $0x1e8] sm:$0xff] %vm203_vm0, %v3743_v59  ;;  %5988 = vmatpush3.bf16.msra.mxu0 %v9518_v14 }
 0x3e7   :  { %v6627_v34 = vpop.eup %6626  ;;  %v3742_v30 = vmul.f32 %v6625_v27, %v9131_v37  ;;  %5990 = vmatprep.subr.bf16.mxu0 %v5989_v50  ;;  %v9520_v37 = vpack.c.bf16 %v9097_v6, %v9108_v49 }
 0x3e8   :  { %v6629_v61 = vpop.eup %6628  ;;  %v3745_v38 = vmul.f32 %v6627_v34, %v9151_v41  ;;  %v9521_v41 = vpack.c.bf16 %v9138_v43, %v9142_v48 }
 0x3e9   :  { %4541 = vst.msk [vmem:[%s9492_s14 + $0x1e0] sm:$0xff] %vm203_vm0, %v3742_v30  ;;  %v3744_v13 = vmul.f32 %v6629_v61, %v9165_v51  ;;  %v5993_v35 = vpack.c.bf16 %v3743_v59, %v3742_v30 }
 0x3ea   :  { %4544 = vst.msk [vmem:[%s9492_s14 + $0x1f8] sm:$0xff] %vm203_vm0, %v3745_v38  ;;  %5992 = vmatpush3.bf16.msra.mxu0 %v9519_v2 }
 0x3eb   :  { %4543 = vst.msk [vmem:[%s9492_s14 + $0x1f0] sm:$0xff] %vm203_vm0, %v3744_v13  ;;  %5994 = vmatprep.subr.bf16.mxu0 %v5993_v35  ;;  %v5997_v19 = vpack.c.bf16 %v3745_v38, %v3744_v13 }
 0x3ee   :  { %5996 = vmatpush3.bf16.msra.mxu0 %v9520_v37 }
 0x3ef   :  { %5998 = vmatprep.subr.bf16.mxu0 %v5997_v19 }
 0x3f2   :  { %6000 = vmatpush3.bf16.msra.mxu0 %v9521_v41 }
 0x3f3   :  { %6002 = vmatprep.subr.bf16.mxu0 %v6001_v54 }
 0x3f5   :  { %5004 = vmatmul.mubr.msk.f32.vlgmr.msra.gmra.mrb[96].mxu0 %vm9522_vm7, %v9512_v47 }
 0x3f6   :  { %5005 = vmatprep.mubr.msk.f32.mxu0 %vm9523_vm8, %v9512_v47  ;;  %6004 = vmatpush3.bf16.msra.mxu0 %v6001_v54  ;;  %v4289_v54 = vld [vmem:[%s9494_s11] sm:$0xff] }
 0x3f7   :  { %6006 = vmatprep.subr.bf16.mxu0 %v6005_v58  ;;  %v6009_v31 = vpack.c.bf16 %v4290_v32, %v4289_v54 }
 0x3f9   :  { %5006 = vmatmul.mubr.msk.f32.gmra.mrb[98].mxu0 %vm9524_vm9, %v9512_v47 }
 0x3fa   :  { %5007 = vmatprep.mubr.msk.f32.mxu0 %vm9525_vm10, %v9512_v47  ;;  %6008 = vmatpush3.bf16.msra.mxu0 %v6005_v58  ;;  %v4291_v58 = vld [vmem:[%s9494_s11 + $0x10] sm:$0xff] }
 0x3fb   :  { %6010 = vmatprep.subr.bf16.mxu0 %v6009_v31 }
 0x3fd   :  { %5008 = vmatmul.mubr.msk.f32.gmra.mrb[100].mxu0 %vm9526_vm11, %v9512_v47 }
 0x3fe   :  { %5009 = vmatprep.mubr.msk.f32.mxu0 %vm9527_vm12, %v9512_v47 }
 0x401   :  { %5010 = vmatmul.mubr.msk.f32.gmra.mrb[102].mxu0 %vm9528_vm13, %v9512_v47 }
 0x402   :  { %5011 = vmatprep.mubr.msk.f32.mxu0 %vm9529_vm14, %v9512_v47 }
 0x405   :  { %5012 = vmatmul.mubr.msk.f32.gmra.mrb[104].mxu0 %vm9530_vm15, %v9512_v47 }
 0x406   :  { %5013 = vmatprep.mubr.msk.f32.mxu0 %vm9531_vm1, %v9512_v47 }
 0x409   :  { %5014 = vmatmul.mubr.msk.f32.gmra.mrb[106].mxu0 %vm9532_vm4, %v9512_v47 }
 0x40a   :  { %5015 = vmatprep.mubr.msk.f32.mxu0 %vm9533_vm5, %v9512_v47 }
 0x40d   :  { %5016 = vmatmul.mubr.msk.f32.gmra.mrb[108].mxu0 %vm9534_vm6, %v9512_v47 }
 0x40e   :  { %5017 = vmatprep.mubr.msk.f32.mxu0 %vm3802_vm2, %v9512_v47 }
 0x411   :  { %5018 = vmatmul.mubr.msk.f32.gmra.mrb[110].mxu0 %vm3801_vm3, %v9512_v47 }
 0x486   :  { %v5305_v40 = vpop.f32.mrb[80].mxu0 }
 0x487   :  { %v5306_v8 = vpop.f32.mrb[81].mxu0 }
 0x488   :  { %v5307_v17 = vadd.f32 %v5306_v8, %v5305_v40  ;;  %v4292_v40 = vld [vmem:[%s9494_s11 + $0x18] sm:$0xff] }
 0x489   :  { %v6013_v8 = vpack.c.bf16 %v4292_v40, %v4291_v58 }
 0x48a   :  { %v5308_v3 = vpop.f32.mrb[82].mxu0 }
 0x48b   :  { %v5309_v47 = vpop.f32.mrb[83].mxu0 }
 0x48c   :  { %v5310_v48 = vadd.f32 %v5309_v47, %v5308_v3  ;;  %v4294_v3 = vld [vmem:[%s9494_s11 + $0x28] sm:$0xff] }
 0x48e   :  { %v5311_v33 = vpop.f32.mrb[84].mxu0 }
 0x48f   :  { %v5312_v52 = vpop.f32.mrb[85].mxu0 }
 0x490   :  { %v5313_v6 = vadd.f32 %v5312_v52, %v5311_v33  ;;  %v4296_v33 = vld [vmem:[%s9494_s11 + $0x38] sm:$0xff] }
 0x492   :  { %v5314_v49 = vpop.f32.mrb[86].mxu0 }
 0x493   :  { %v5315_v43 = vpop.f32.mrb[87].mxu0 }
 0x494   :  { %v5316_v51 = vadd.f32 %v5315_v43, %v5314_v49  ;;  %v4298_v49 = vld [vmem:[%s9494_s11 + $0x48] sm:$0xff] }
 0x496   :  { %v5317_v57 = vpop.f32.mrb[88].mxu0 }
 0x497   :  { %v5318_v55 = vpop.f32.mrb[89].mxu0 }
 0x498   :  { %v5319_v21 = vadd.f32 %v5318_v55, %v5317_v57  ;;  %v4300_v57 = vld [vmem:[%s9494_s11 + $0x58] sm:$0xff] }
 0x49a   :  { %v5320_v12 = vpop.f32.mrb[90].mxu0 }
 0x49b   :  { %v5321_v16 = vpop.f32.mrb[91].mxu0 }
 0x49c   :  { %v5322_v39 = vadd.f32 %v5321_v16, %v5320_v12  ;;  %v4302_v12 = vld [vmem:[%s9494_s11 + $0x68] sm:$0xff] }
 0x49e   :  { %v5323_v9 = vpop.f32.mrb[92].mxu0 }
 0x49f   :  { %v5324_v36 = vpop.f32.mrb[93].mxu0 }
 0x4a0   :  { %v5325_v60 = vadd.f32 %v5324_v36, %v5323_v9  ;;  %v4304_v9 = vld [vmem:[%s9494_s11 + $0x78] sm:$0xff] }
 0x4a2   :  { %v5326_v22 = vpop.f32.mrb[94].mxu0 }
 0x4a3   :  { %v5327_v45 = vpop.f32.mrb[95].mxu0 }
 0x4a4   :  { %v5328_v42 = vadd.f32 %v5327_v45, %v5326_v22  ;;  %v5027_v22 = vld [vmem:[%s9495_s10] ss:$0 sm:$0xff] }
 0x4c8   :  { %v5361_v24 = vpop.f32.mrb[96].mxu0 }
 0x4c9   :  { %v5362_v26 = vpop.f32.mrb[97].mxu0 }
 0x4ca   :  { %v5363_v11 = vadd.f32 %v5362_v26, %v5361_v24 }
 0x4cc   :  { %v4039_v53 = vadd.f32 %v5363_v11, %v5307_v17  ;;  %v5364_v20 = vpop.f32.mrb[98].mxu0  ;;  %v4293_v17 = vld [vmem:[%s9494_s11 + $0x20] sm:$0xff] }
 0x4cd   :  { %v5365_v28 = vpop.f32.mrb[99].mxu0  ;;  %v6017_v47 = vpack.c.bf16 %v4294_v3, %v4293_v17 }
 0x4ce   :  { %v5366_v4 = vadd.f32 %v5365_v28, %v5364_v20  ;;  %5801 = vmatprep.mubr.msk.f32.mxu0 %vm203_vm0, %v4039_v53 }
 0x4d0   :  { %v4044_v29 = vadd.f32 %v5366_v4, %v5310_v48  ;;  %v5367_v63 = vpop.f32.mrb[100].mxu0  ;;  %v4295_v48 = vld [vmem:[%s9494_s11 + $0x30] sm:$0xff] }
 0x4d1   :  { %v5368_v7 = vpop.f32.mrb[101].mxu0  ;;  %v6021_v52 = vpack.c.bf16 %v4296_v33, %v4295_v48 }
 0x4d2   :  { %5802 = vmatmul.mubr.msk.f32.vlgmr.msra.gmra.mrb[112].mxu0 %vm203_vm0, %v4044_v29  ;;  %v5369_v23 = vadd.f32 %v5368_v7, %v5367_v63 }
 0x4d3   :  { %6012 = vmatpush3.bf16.msra.mxu0 %v6009_v31 }
 0x4d4   :  { %v4049_v5 = vadd.f32 %v5369_v23, %v5313_v6  ;;  %v5370_v62 = vpop.f32.mrb[102].mxu0  ;;  %6014 = vmatprep.subr.bf16.mxu0 %v6013_v8  ;;  %v4297_v6 = vld [vmem:[%s9494_s11 + $0x40] sm:$0xff] }
 0x4d5   :  { %v5371_v15 = vpop.f32.mrb[103].mxu0  ;;  %v6025_v43 = vpack.c.bf16 %v4298_v49, %v4297_v6 }
 0x4d6   :  { %v5372_v46 = vadd.f32 %v5371_v15, %v5370_v62  ;;  %5804 = vmatprep.mubr.msk.f32.mxu0 %vm203_vm0, %v4049_v5  ;;  %v9535_v15 = vld [vmem:[#allocation2_spill] sm:$0xff] }
 0x4d7   :  { %6016 = vmatpush3.bf16.msra.mxu0 %v6013_v8 }
 0x4d8   :  { %v4054_v18 = vadd.f32 %v5372_v46, %v5316_v51  ;;  %v5373_v59 = vpop.f32.mrb[104].mxu0  ;;  %6018 = vmatprep.subr.bf16.mxu0 %v6017_v47  ;;  %v4299_v51 = vld [vmem:[%s9494_s11 + $0x50] sm:$0xff] }
 0x4d9   :  { %v5374_v50 = vpop.f32.mrb[105].mxu0  ;;  %v6029_v55 = vpack.c.bf16 %v4300_v57, %v4299_v51 }
 0x4da   :  { %5805 = vmatmul.mubr.msk.f32.gmra.mrb[114].mxu0 %vm203_vm0, %v4054_v18  ;;  %v5375_v27 = vadd.f32 %v5374_v50, %v5373_v59 }
 0x4db   :  { %6020 = vmatpush3.bf16.msra.mxu0 %v6017_v47 }
 0x4dc   :  { %v4059_v14 = vadd.f32 %v5375_v27, %v5319_v21  ;;  %v5376_v34 = vpop.f32.mrb[106].mxu0  ;;  %6022 = vmatprep.subr.bf16.mxu0 %v6021_v52  ;;  %v4301_v21 = vld [vmem:[%s9494_s11 + $0x60] sm:$0xff]  ;;  %v9536_v27 = vld [vmem:[#allocation3_spill] sm:$0xff] }
 0x4dd   :  { %v5377_v30 = vpop.f32.mrb[107].mxu0  ;;  %v6033_v16 = vpack.c.bf16 %v4302_v12, %v4301_v21 }
 0x4de   :  { %v5378_v61 = vadd.f32 %v5377_v30, %v5376_v34  ;;  %5807 = vmatprep.mubr.msk.f32.mxu0 %vm203_vm0, %v4059_v14 }
 0x4df   :  { %6024 = vmatpush3.bf16.msra.mxu0 %v6021_v52 }
 0x4e0   :  { %v4064_v38 = vadd.f32 %v5378_v61, %v5322_v39  ;;  %v5379_v13 = vpop.f32.mrb[108].mxu0  ;;  %6026 = vmatprep.subr.bf16.mxu0 %v6025_v43  ;;  %v4303_v39 = vld [vmem:[%s9494_s11 + $0x70] sm:$0xff] }
 0x4e1   :  { %v5380_v35 = vpop.f32.mrb[109].mxu0  ;;  %v6037_v36 = vpack.c.bf16 %v4304_v9, %v4303_v39 }
 0x4e2   :  { %5808 = vmatmul.mubr.msk.f32.gmra.mrb[116].mxu0 %vm203_vm0, %v4064_v38  ;;  %v5381_v2 = vadd.f32 %v5380_v35, %v5379_v13  ;;  %v9537_v35 = vld [vmem:[#allocation4_spill] sm:$0xff] }
 0x4e3   :  { %6028 = vmatpush3.bf16.msra.mxu0 %v6025_v43 }
 0x4e4   :  { %v4069_v19 = vadd.f32 %v5381_v2, %v5325_v60  ;;  %v5382_v37 = vpop.f32.mrb[110].mxu0  ;;  %6030 = vmatprep.subr.bf16.mxu0 %v6029_v55 }
 0x4e5   :  { %v5383_v41 = vpop.f32.mrb[111].mxu0 }
 0x4e6   :  { %v5384_v44 = vadd.f32 %v5383_v41, %v5382_v37  ;;  %5810 = vmatprep.mubr.msk.f32.mxu0 %vm203_vm0, %v4069_v19 }
 0x4e7   :  { %6032 = vmatpush3.bf16.msra.mxu0 %v6029_v55 }
 0x4e8   :  { %v4074_v1 = vadd.f32 %v5384_v44, %v5328_v42  ;;  %6034 = vmatprep.subr.bf16.mxu0 %v6033_v16  ;;  %v9538_v44 = vld [vmem:[#allocation5_spill] sm:$0xff] }
 0x4ea   :  { %5811 = vmatmul.mubr.msk.f32.gmra.mrb[118].mxu0 %vm203_vm0, %v4074_v1 }
 0x4eb   :  { %6036 = vmatpush3.bf16.msra.mxu0 %v6033_v16 }
 0x4ec   :  { %6038 = vmatprep.subr.bf16.mxu0 %v6037_v36 }
 0x4ef   :  { %6040 = vmatpush3.bf16.msra.mxu0 %v6037_v36 }
 0x5a5   :  { %v5803_v60 = vpop.f32.mrb[112].mxu0 }
 0x5a6   :  { %v4211_v45 = vadd.f32 %v5803_v60, %v7562_v10  ;;  %v4171_v42 = vpop.f32.mrb[113].mxu0 }
 0x5a7   :  { %v4210_v24 = vadd.f32 %v4171_v42, %v7564_v0 }
 0x5a8   :  { %v4226_v26 = vadd.f32 %v5027_v22, %v4211_v45 }
 0x5a9   :  { %v4225_v11 = vadd.f32 %v5027_v22, %v4210_v24 }
 0x5aa   :  { %v5029_v53 = vmul.f32 -1.442695, %v4226_v26 }
 0x5ab   :  { %v5028_v20 = vmul.f32 -1.442695, %v4225_v11 }
 0x5ac   :  { %6630 = vpow2.f32 %v5029_v53 }
 0x5ad   :  { %6632 = vpow2.f32 %v5028_v20  ;;  %v5806_v28 = vpop.f32.mrb[114].mxu0 }
 0x5ae   :  { %v4213_v4 = vadd.f32 %v5806_v28, %v7576_v25  ;;  %v4181_v29 = vpop.f32.mrb[115].mxu0 }
 0x5af   :  { %v4212_v63 = vadd.f32 %v4181_v29, %v7578_v56 }
 0x5b0   :  { %v4228_v7 = vadd.f32 %v5027_v22, %v4213_v4  ;;  %v6664_v4 = vld [vmem:[%s9485_s3 + $0x8] sm:$0xff] }
 0x5b1   :  { %v4227_v23 = vadd.f32 %v5027_v22, %v4212_v63  ;;  %v4433_v63 = vpop.permute.xlu1 %4432 }
 0x5b2   :  { %v5031_v5 = vmul.f32 -1.442695, %v4228_v7 }
 0x5b3   :  { %v5030_v62 = vmul.f32 -1.442695, %v4227_v23 }
 0x5b4   :  { %6634 = vpow2.f32 %v5031_v5  ;;  %v4428_v5 = vpop.permute.xlu0 %4427 }
 0x5b5   :  { %6636 = vpow2.f32 %v5030_v62  ;;  %v5809_v10 = vpop.f32.mrb[116].mxu0 }
 0x5b6   :  { %v6631_v0 = vpop.eup %6630  ;;  %v4215_v46 = vadd.f32 %v5809_v10, %v9535_v15  ;;  %v4191_v18 = vpop.f32.mrb[117].mxu0 }
 0x5b7   :  { %v6633_v59 = vpop.eup %6632  ;;  %v4258_v50 = vadd.f32 1.0, %v6631_v0  ;;  %v4214_v14 = vadd.f32 %v4191_v18, %v9536_v27  ;;  %v4443_v27 = vpop.permute.xlu1 %4442 }
 0x5b8   :  { %v4257_v34 = vadd.f32 1.0, %v6633_v59  ;;  %v4230_v25 = vadd.f32 %v5027_v22, %v4215_v46  ;;  %v6666_v59 = vld [vmem:[%s9485_s3 + $0x18] sm:$0xff] }
 0x5b9   :  { %6638 = vrcp.f32 %v4258_v50  ;;  %v4229_v30 = vadd.f32 %v5027_v22, %v4214_v14  ;;  %v6667_v14 = vld [vmem:[%s9485_s3 + $0x10] sm:$0xff] }
 0x5ba   :  { %6640 = vrcp.f32 %v4257_v34  ;;  %v5033_v56 = vmul.f32 -1.442695, %v4230_v25 }
 0x5bb   :  { %v5032_v61 = vmul.f32 -1.442695, %v4229_v30 }
 0x5bc   :  { %6642 = vpow2.f32 %v5033_v56 }
 0x5bd   :  { %6644 = vpow2.f32 %v5032_v61  ;;  %v5812_v38 = vpop.f32.mrb[118].mxu0 }
 0x5be   :  { %v6635_v13 = vpop.eup %6634  ;;  %v4217_v2 = vadd.f32 %v5812_v38, %v9537_v35  ;;  %v4201_v19 = vpop.f32.mrb[119].mxu0 }
 0x5bf   :  { %v6637_v37 = vpop.eup %6636  ;;  %v4260_v41 = vadd.f32 1.0, %v6635_v13  ;;  %v4216_v1 = vadd.f32 %v4201_v19, %v9538_v44 }
 0x5c0   :  { %v4259_v54 = vadd.f32 1.0, %v6637_v37  ;;  %v4232_v32 = vadd.f32 %v5027_v22, %v4217_v2  ;;  %v6668_v2 = vld [vmem:[%s9485_s3 + $0x28] sm:$0xff]  ;;  %v4453_v37 = vpop.permute.xlu1 %4452 }
 0x5c1   :  { %6646 = vrcp.f32 %v4260_v41  ;;  %v4231_v31 = vadd.f32 %v5027_v22, %v4216_v1  ;;  %v6669_v41 = vld [vmem:[%s9485_s3 + $0x20] sm:$0xff] }
 0x5c2   :  { %6648 = vrcp.f32 %v4259_v54  ;;  %v5035_v58 = vmul.f32 -1.442695, %v4232_v32 }
 0x5c3   :  { %v6639_v40 = vpop.eup %6638  ;;  %v5034_v8 = vmul.f32 -1.442695, %v4231_v31 }
 0x5c4   :  { %v6641_v17 = vpop.eup %6640  ;;  %6650 = vpow2.f32 %v5035_v58  ;;  %v4282_v48 = vmul.f32 %v6639_v40, %v4226_v26  ;;  %v5036_v26 = vld [vmem:[%s9496_s12] ss:$0 sm:$0xff] }
 0x5c5   :  { %6652 = vpow2.f32 %v5034_v8  ;;  %v4281_v3 = vmul.f32 %v6641_v17, %v4225_v11  ;;  %v6670_v17 = vld [vmem:[%s9485_s3 + $0x38] sm:$0xff] }
 0x5c6   :  { %v6643_v47 = vpop.eup %6642 }
 0x5c7   :  { %v6645_v33 = vpop.eup %6644  ;;  %v4262_v52 = vadd.f32 1.0, %v6643_v47  ;;  %5845 = vmatprep.mubr.f32.mxu0 %v4281_v3  ;;  %v4463_v47 = vpop.permute.xlu1 %4462 }
 0x5c8   :  { %v4261_v6 = vadd.f32 1.0, %v6645_v33  ;;  %5846 = vmatmul.mubr.f32.vlgmr.msra.gmra.mrb[120].mxu0 %v4282_v48  ;;  %v6671_v48 = vld [vmem:[%s9485_s3 + $0x30] sm:$0xff] }
 0x5c9   :  { %6654 = vrcp.f32 %v4262_v52 }
 0x5ca   :  { %6656 = vrcp.f32 %v4261_v6 }
 0x5cb   :  { %v6647_v49 = vpop.eup %6646 }
 0x5cc   :  { %v6649_v43 = vpop.eup %6648  ;;  %v4284_v55 = vmul.f32 %v6647_v49, %v4228_v7  ;;  %v6665_v7 = vld [vmem:[%s9485_s3] sm:$0xff] }
 0x5cd   :  { %v4283_v51 = vmul.f32 %v6649_v43, %v4227_v23 }
 0x5ce   :  { %v6651_v57 = vpop.eup %6650 }
 0x5cf   :  { %v6653_v21 = vpop.eup %6652  ;;  %v4264_v12 = vadd.f32 1.0, %v6651_v57  ;;  %5848 = vmatprep.mubr.f32.mxu0 %v4283_v51 }
 0x5d0   :  { %v4263_v16 = vadd.f32 1.0, %v6653_v21  ;;  %5849 = vmatmul.mubr.f32.gmra.mrb[122].mxu0 %v4284_v55 }
 0x5d1   :  { %6658 = vrcp.f32 %v4264_v12 }
 0x5d2   :  { %6660 = vrcp.f32 %v4263_v16 }
 0x5d3   :  { %v6655_v39 = vpop.eup %6654 }
 0x5d4   :  { %v6657_v9 = vpop.eup %6656  ;;  %v4286_v60 = vmul.f32 %v6655_v39, %v4230_v25  ;;  %v4438_v25 = vpop.permute.xlu0 %4437 }
 0x5d5   :  { %v4285_v36 = vmul.f32 %v6657_v9, %v4229_v30 }
 0x5d7   :  { %5851 = vmatprep.mubr.f32.mxu0 %v4285_v36 }
 0x5d8   :  { %5852 = vmatmul.mubr.f32.gmra.mrb[124].mxu0 %v4286_v60  ;;  %v4448_v1 = vpop.permute.xlu0 %4447 }
 0x5db   :  { %v6659_v22 = vpop.eup %6658 }
 0x5dc   :  { %v6661_v45 = vpop.eup %6660  ;;  %v4288_v24 = vmul.f32 %v6659_v22, %v4232_v32  ;;  %v4458_v52 = vpop.permute.xlu0 %4457 }
 0x5dd   :  { %v4287_v42 = vmul.f32 %v6661_v45, %v4231_v31 }
 0x5df   :  { %5854 = vmatprep.mubr.f32.mxu0 %v4287_v42 }
 0x5e0   :  { %5855 = vmatmul.mubr.f32.gmra.mrb[126].mxu0 %v4288_v24 }
 0x69b   :  { %v5847_v11 = vpop.f32.mrb[120].mxu0 }
 0x69c   :  { %v4384_v53 = vadd.f32 %v5847_v11, %v5036_v26  ;;  %v4378_v20 = vpop.f32.mrb[121].mxu0 }
 0x69d   :  { %v4379_v28 = vadd.f32 %v5036_v26, %v4378_v20 }
 0x69e   :  { %v4418_v29 = vadd.f32 %v6664_v4, %v4384_v53 }
 0x69f   :  { %v4417_v23 = vadd.f32 %v6665_v7, %v4379_v28 }
 0x6a0   :  { %v4466_v62 = vmul.f32 %v4433_v63, %v4418_v29 }
 0x6a1   :  { %v4465_v10 = vmul.f32 %v4428_v5, %v4417_v23 }
 0x6a2   :  { %4474 = vst.msk [vmem:[%s9497_s13 + $0x8] sm:$0xff] %vm203_vm0, %v4466_v62 }
 0x6a3   :  { %4473 = vst.msk [vmem:[%s9497_s13] sm:$0xff] %vm203_vm0, %v4465_v10  ;;  %v5850_v0 = vpop.f32.mrb[122].mxu0 }
 0x6a4   :  { %v4394_v15 = vadd.f32 %v5850_v0, %v5036_v26  ;;  %v4388_v46 = vpop.f32.mrb[123].mxu0 }
 0x6a5   :  { %v4389_v18 = vadd.f32 %v5036_v26, %v4388_v46 }
 0x6a6   :  { %v4420_v50 = vadd.f32 %v6666_v59, %v4394_v15 }
 0x6a7   :  { %v4419_v34 = vadd.f32 %v6667_v14, %v4389_v18 }
 0x6a8   :  { %v4468_v30 = vmul.f32 %v4443_v27, %v4420_v50 }
 0x6a9   :  { %v4467_v56 = vmul.f32 %v4438_v25, %v4419_v34 }
 0x6aa   :  { %4476 = vst.msk [vmem:[%s9497_s13 + $0x18] sm:$0xff] %vm203_vm0, %v4468_v30 }
 0x6ab   :  { %4475 = vst.msk [vmem:[%s9497_s13 + $0x10] sm:$0xff] %vm203_vm0, %v4467_v56  ;;  %v5853_v61 = vpop.f32.mrb[124].mxu0 }
 0x6ac   :  { %v4404_v38 = vadd.f32 %v5853_v61, %v5036_v26  ;;  %v4398_v13 = vpop.f32.mrb[125].mxu0 }
 0x6ad   :  { %v4399_v35 = vadd.f32 %v5036_v26, %v4398_v13 }
 0x6ae   :  { %v4422_v19 = vadd.f32 %v6668_v2, %v4404_v38 }
 0x6af   :  { %v4421_v44 = vadd.f32 %v6669_v41, %v4399_v35 }
 0x6b0   :  { %v4470_v54 = vmul.f32 %v4453_v37, %v4422_v19 }
 0x6b1   :  { %v4469_v32 = vmul.f32 %v4448_v1, %v4421_v44 }
 0x6b2   :  { %4478 = vst.msk [vmem:[%s9497_s13 + $0x28] sm:$0xff] %vm203_vm0, %v4470_v54 }
 0x6b3   :  { %4477 = vst.msk [vmem:[%s9497_s13 + $0x20] sm:$0xff] %vm203_vm0, %v4469_v32  ;;  %v5856_v31 = vpop.f32.mrb[126].mxu0 }
 0x6b4   :  { %v4414_v58 = vadd.f32 %v5856_v31, %v5036_v26  ;;  %v4408_v40 = vpop.f32.mrb[127].mxu0 }
 0x6b5   :  { %v4409_v8 = vadd.f32 %v5036_v26, %v4408_v40 }
 0x6b6   :  { %v4424_v3 = vadd.f32 %v6670_v17, %v4414_v58 }
 0x6b7   :  { %v4423_v33 = vadd.f32 %v6671_v48, %v4409_v8 }
 0x6b8   :  { %v4472_v6 = vmul.f32 %v4463_v47, %v4424_v3 }
 0x6b9   :  { %v4471_v49 = vmul.f32 %v4458_v52, %v4423_v33 }
 0x6ba   :  { %4480 = vst.msk [vmem:[%s9497_s13 + $0x38] sm:$0xff] %vm203_vm0, %v4472_v6 }
 0x6bb   :  { %4479 = vst.msk [vmem:[%s9497_s13 + $0x30] sm:$0xff] %vm203_vm0, %v4471_v49 }

</bundles_post_ra>
